<compile_context>
chip_gen: v5e
topology: v5e:2x2
jax: 0.10.0
libtpu: 0.0.40
codegen_flags: <defaults>
</compile_context>

<pallas_src>
import jax
import jax.numpy as jnp
from jax import lax
from jax.experimental import pallas as pl
from jax.experimental.pallas import tpu as pltpu

LEAKY_SLOPE = 0.2
BN_EPS = 1e-5


# ----------------------------- Pallas kernel -------------------------------

def _make_kernel(num_blocks):
    """One grid step == one image; the whole decoder stays in VMEM."""

    def kernel(*refs):
        x_ref = refs[0]                              # (1, latent*Hin, 4*Win)
        blk_refs = refs[1:1 + 3 * num_blocks]        # (A_stack, B_stack, shift) per block
        u_fin_ref = refs[1 + 3 * num_blocks]         # upsample2 ∘ final 1x1 conv (rows)
        e_fin_ref = refs[2 + 3 * num_blocks]         # upsample2 (cols)
        o_ref = refs[-1]                             # (1, out*Hf, Wf)

        f32 = jnp.float32
        y = x_ref[0]                                 # (latent*Hin, 4*Win)

        for b in range(num_blocks):
            a_ref, b_ref, s_ref = blk_refs[3 * b:3 * b + 3]

            # 3x3 conv (pad=1) with the preceding upsample, the preceding 1x1
            # conv (block 0 only) and the BN scale all folded into A/B:
            #   acc = sum_dx  A_dx @ (y @ B_dx)
            acc = jnp.dot(a_ref[0],
                          jnp.dot(y, b_ref[0], preferred_element_type=f32),
                          preferred_element_type=f32)
            for k in (1, 2):
                acc = acc + jnp.dot(
                    a_ref[k],
                    jnp.dot(y, b_ref[k], preferred_element_type=f32),
                    preferred_element_type=f32)

            # folded conv bias + BN shift, then LeakyReLU(0.2)
            z = acc + s_ref[...]
            y = jnp.where(z >= 0, z, LEAKY_SLOPE * z)

        # last nearest x2 upsample with the final 1x1 conv folded into the
        # row matrix:  out = (W_final ⊗ U2) @ y @ E2
        out = jnp.dot(u_fin_ref[...], y, preferred_element_type=f32)
        o_ref[0] = jnp.dot(out, e_fin_ref[...], preferred_element_type=f32)

    return kernel


# --------------------------- operand preparation ---------------------------

def _combine(coeffs_t, stacked):
    # curve parameter: sum_k coeffs_t[k] * param_k
    return jnp.tensordot(coeffs_t, stacked, axes=((0,), (0,)))


def _up_rows(n, s):
    # (s*n, n) nearest-neighbour expansion: out[r, j] = 1 iff j == r // s
    return (jnp.arange(s * n)[:, None] // s ==
            jnp.arange(n)[None, :]).astype(jnp.float32)


def prepare_operands(x_nchw, coeffs_t, params):
    """Build the small dense matrices the kernel multiplies with.

    Per-image activations use a (C*H, W) layout.  For block b:
      A_{b,dx} = sum_dy kron(conv_w[:,:,dy+1,dx+1]*bn_scale @ cmix,
                             eye(H_b, k=dy) @ rowup_prev)
      B_{b,dx} = colup_prev @ eye(W_b, k=-dx)
    where cmix/rowup/colup fold the upsample (x4 or x2) and, for block 0,
    the 1x1 upconv that precede the 3x3 conv.
    """
    n, latent, hin, win = x_nchw.shape
    f32 = jnp.float32

    # Only the x4 *column* expansion is applied on the host (tiny tensor);
    # the x4 row expansion + 1x1 upconv are folded into block 0's A matrices.
    x2 = jnp.repeat(x_nchw.reshape(n, latent * hin, win).astype(f32), 4, axis=-1)

    w_up = _combine(coeffs_t, params["upconv_w"])[:, :, 0, 0]      # (input_dim, latent)
    w_final = _combine(coeffs_t, params["final_w"])[:, :, 0, 0]    # (out, out)

    blocks = []
    h_prev, w_cur = hin, 4 * win
    first = True
    for p in params["blocks"]:
        wc = _combine(coeffs_t, p["conv_w"])                       # (cout, cin, 3, 3)
        bias = _combine(coeffs_t, p["conv_b"])
        gamma = _combine(coeffs_t, p["bn_w"])
        beta = _combine(coeffs_t, p["bn_b"])
        scale = gamma / jnp.sqrt(p["bn_rv"] + BN_EPS)
        shift = beta + (bias - p["bn_rm"]) * scale

        if first:
            cmix = w_up                                            # fold 1x1 upconv
            rowup = _up_rows(hin, 4)                               # fold upsample4 rows
            h = 4 * hin
            w_new = w_cur                                          # cols already expanded
            b_mats = [jnp.eye(w_new, k=-dx, dtype=f32) for dx in (-1, 0, 1)]
        else:
            cin = wc.shape[1]
            cmix = jnp.eye(cin, dtype=f32)
            rowup = _up_rows(h_prev, 2)                            # fold upsample2 rows
            h = 2 * h_prev
            w_new = 2 * w_cur
            colup = _up_rows(w_cur, 2).T                           # fold upsample2 cols
            b_mats = [colup @ jnp.eye(w_new, k=-dx, dtype=f32) for dx in (-1, 0, 1)]

        a_mats = []
        for dx in (-1, 0, 1):
            a = sum(jnp.kron((wc[:, :, dy + 1, dx + 1] * scale[:, None]) @ cmix,
                             jnp.eye(h, k=dy, dtype=f32) @ rowup)
                    for dy in (-1, 0, 1))
            a_mats.append(a)                                       # (cout*h, prev_rows)

        a_stack = jnp.stack(a_mats)                                # (3, cout*h, prev_rows)
        b_stack = jnp.stack(b_mats)                                # (3, prev_cols, w_new)
        shift_col = jnp.repeat(shift, h)[:, None]                  # (cout*h, 1)
        blocks.append((a_stack, b_stack, shift_col))

        h_prev, w_cur = h, w_new
        first = False

    # final nearest x2 upsample with the final 1x1 conv folded in
    u_fin = jnp.kron(w_final, _up_rows(h_prev, 2))                 # (out*2h, cout*h)
    e_fin = _up_rows(w_cur, 2).T                                   # (w, 2w)
    hf, wf = 2 * h_prev, 2 * w_cur
    return x2, blocks, u_fin, e_fin, (hf, wf)


# ------------------------------ forward pass -------------------------------

def decoder_curve_forward(x_nchw, coeffs_t, params):
    n = x_nchw.shape[0]
    out_ch = params["final_w"].shape[1]
    x2, blocks, u_fin, e_fin, (hf, wf) = prepare_operands(x_nchw, coeffs_t, params)
    weights = [m for blk in blocks for m in blk] + [u_fin, e_fin]

    in_specs = [pl.BlockSpec((1,) + x2.shape[1:], lambda i: (i, 0, 0))]
    for arr in weights:
        # constant block index -> the weight tile is fetched once, not per image
        in_specs.append(
            pl.BlockSpec(arr.shape, lambda i, _nd=arr.ndim: (0,) * _nd))

    rows = out_ch * hf
    out = pl.pallas_call(
        _make_kernel(len(blocks)),
        out_shape=jax.ShapeDtypeStruct((n, rows, wf), jnp.float32),
        grid=(n,),
        in_specs=in_specs,
        out_specs=pl.BlockSpec((1, rows, wf), lambda i: (i, 0, 0)),
        compiler_params=pltpu.CompilerParams(
            dimension_semantics=("parallel",)),
    )(x2, *weights)
    return out.reshape(n, out_ch, hf, wf)            # (C*H, W) -> NCHW is a free reshape


# --------------------------- parameter creation ----------------------------

def init_params(key, out_channels, latent_dim, input_dim, num_blocks, num_bends):
    def normal(k, shape, std):
        return std * jax.random.normal(k, shape, dtype=jnp.float32)

    keys = iter(jax.random.split(key, 64))
    params = {"upconv_w": normal(next(keys), (num_bends, input_dim, latent_dim, 1, 1), 0.2)}

    dims = []
    hidden = input_dim
    for _ in range(num_blocks - 1):
        dims.append((hidden, hidden // 2))
        hidden //= 2
    dims.append((hidden, out_channels))

    blocks = []
    for cin, cout in dims:
        blocks.append(dict(
            conv_w=normal(next(keys), (num_bends, cout, cin, 3, 3), 0.2),
            conv_b=normal(next(keys), (num_bends, cout), 0.1),
            bn_w=1.0 + normal(next(keys), (num_bends, cout), 0.1),
            bn_b=normal(next(keys), (num_bends, cout), 0.1),
            bn_rm=jnp.zeros((cout,), jnp.float32),
            bn_rv=jnp.ones((cout,), jnp.float32),
        ))
    params["blocks"] = blocks
    params["final_w"] = normal(next(keys), (num_bends, out_channels, out_channels, 1, 1), 0.2)
    return params


# ----------------------------- pure-JAX reference ---------------------------

def reference_forward(x, coeffs_t, params):
    def conv2d(x, w, b=None, padding=0):
        out = lax.conv_general_dilated(
            x, w, (1, 1), [(padding, padding)] * 2,
            dimension_numbers=("NCHW", "OIHW", "NCHW"),
            precision=lax.Precision.HIGHEST)
        if b is not None:
            out = out + b[None, :, None, None]
        return out

    def up(x, s):
        return jnp.repeat(jnp.repeat(x, s, axis=2), s, axis=3)

    c = lambda ws: jnp.tensordot(coeffs_t, ws, axes=((0,), (0,)))

    x = conv2d(up(x, 4), c(params["upconv_w"]))
    for p in params["blocks"]:
        y = conv2d(x, c(p["conv_w"]), c(p["conv_b"]), padding=1)
        y = (y - p["bn_rm"][None, :, None, None]) / jnp.sqrt(
            p["bn_rv"][None, :, None, None] + BN_EPS)
        y = y * c(p["bn_w"])[None, :, None, None] + c(p["bn_b"])[None, :, None, None]
        y = jnp.where(y >= 0, y, LEAKY_SLOPE * y)
        x = up(y, 2)
    x = conv2d(x, c(params["final_w"]))
    return x


# ---------------------------------- main ------------------------------------

if __name__ == "__main__":
    N, latent_dim, Hin, Win = 2, 8, 2, 2
    out_channels, input_dim, num_blocks, num_bends = 4, 16, 4, 3

    key = jax.random.PRNGKey(0)
    key, kparam, kx = jax.random.split(key, 3)
    params = init_params(kparam, out_channels, latent_dim, input_dim, num_blocks, num_bends)
    x = jax.random.normal(kx, (N, latent_dim, Hin, Win), dtype=jnp.float32)

    t = 0.25  # position on the Bezier curve; coeffs = ((1-t)^2, 2t(1-t), t^2)
    coeffs_t = jnp.array([(1 - t) ** 2, 2 * t * (1 - t), t ** 2], dtype=jnp.float32)

    out = jax.jit(decoder_curve_forward)(x, coeffs_t, params)
    out = jax.block_until_ready(out)

    expected_hw = Hin * 4 * (2 ** num_blocks)  # 2 -> 8 -> (x2 per block)*4 -> 128
    assert out.shape == (N, out_channels, expected_hw, expected_hw), out.shape

    ref = reference_forward(x, coeffs_t, params)
    assert jnp.allclose(out, ref, rtol=2e-2, atol=2e-2), float(jnp.max(jnp.abs(out - ref)))

    print("KERNEL_OK")
</pallas_src>

<mosaic_0001>
module attributes {stable_mosaic.version = 11 : i64} {
  func.func @kernel(%arg0: i32, %arg1: memref<1x16x8xf32, #tpu.memory_space<vmem>>, %arg2: memref<3x64x16xf32, #tpu.memory_space<vmem>>, %arg3: memref<3x8x8xf32, #tpu.memory_space<vmem>>, %arg4: memref<64x1xf32, #tpu.memory_space<vmem>>, %arg5: memref<3x64x64xf32, #tpu.memory_space<vmem>>, %arg6: memref<3x8x16xf32, #tpu.memory_space<vmem>>, %arg7: memref<64x1xf32, #tpu.memory_space<vmem>>, %arg8: memref<3x64x64xf32, #tpu.memory_space<vmem>>, %arg9: memref<3x16x32xf32, #tpu.memory_space<vmem>>, %arg10: memref<64x1xf32, #tpu.memory_space<vmem>>, %arg11: memref<3x256x64xf32, #tpu.memory_space<vmem>>, %arg12: memref<3x32x64xf32, #tpu.memory_space<vmem>>, %arg13: memref<256x1xf32, #tpu.memory_space<vmem>>, %arg14: memref<512x256xf32, #tpu.memory_space<vmem>>, %arg15: memref<64x128xf32, #tpu.memory_space<vmem>>, %arg16: memref<1x512x128xf32, #tpu.memory_space<vmem>>) attributes {dimension_semantics = [#tpu.dimension_semantics<parallel>], iteration_bounds = array<i64: 2>, scalar_prefetch = 0 : i64, scratch_operands = 0 : i64, tpu.core_type = #tpu.core_type<tc>, window_params = [{transform_indices = @transform_0, window_bounds = array<i64: 1, 16, 8>}, {pipeline_mode = #tpu.pipeline_mode<synchronous>, transform_indices = @transform_1, window_bounds = array<i64: 3, 64, 16>}, {pipeline_mode = #tpu.pipeline_mode<synchronous>, transform_indices = @transform_2, window_bounds = array<i64: 3, 8, 8>}, {pipeline_mode = #tpu.pipeline_mode<synchronous>, transform_indices = @transform_3, window_bounds = array<i64: 64, 1>}, {pipeline_mode = #tpu.pipeline_mode<synchronous>, transform_indices = @transform_4, window_bounds = array<i64: 3, 64, 64>}, {pipeline_mode = #tpu.pipeline_mode<synchronous>, transform_indices = @transform_5, window_bounds = array<i64: 3, 8, 16>}, {pipeline_mode = #tpu.pipeline_mode<synchronous>, transform_indices = @transform_6, window_bounds = array<i64: 64, 1>}, {pipeline_mode = #tpu.pipeline_mode<synchronous>, transform_indices = @transform_7, window_bounds = array<i64: 3, 64, 64>}, {pipeline_mode = #tpu.pipeline_mode<synchronous>, transform_indices = @transform_8, window_bounds = array<i64: 3, 16, 32>}, {pipeline_mode = #tpu.pipeline_mode<synchronous>, transform_indices = @transform_9, window_bounds = array<i64: 64, 1>}, {pipeline_mode = #tpu.pipeline_mode<synchronous>, transform_indices = @transform_10, window_bounds = array<i64: 3, 256, 64>}, {pipeline_mode = #tpu.pipeline_mode<synchronous>, transform_indices = @transform_11, window_bounds = array<i64: 3, 32, 64>}, {pipeline_mode = #tpu.pipeline_mode<synchronous>, transform_indices = @transform_12, window_bounds = array<i64: 256, 1>}, {pipeline_mode = #tpu.pipeline_mode<synchronous>, transform_indices = @transform_13, window_bounds = array<i64: 512, 256>}, {pipeline_mode = #tpu.pipeline_mode<synchronous>, transform_indices = @transform_14, window_bounds = array<i64: 64, 128>}, {transform_indices = @transform_15, window_bounds = array<i64: 1, 512, 128>}]} {
    %c0 = arith.constant 0 : index
    %c0_0 = arith.constant 0 : index
    %c0_1 = arith.constant 0 : index
    %0 = vector.load %arg1[%c0, %c0_0, %c0_1] : memref<1x16x8xf32, #tpu.memory_space<vmem>>, vector<1x16x8xf32>
    %1 = vector.shape_cast %0 : vector<1x16x8xf32> to vector<16x8xf32>
    %c0_2 = arith.constant 0 : index
    %c0_3 = arith.constant 0 : index
    %c0_4 = arith.constant 0 : index
    %2 = vector.load %arg2[%c0_2, %c0_3, %c0_4] : memref<3x64x16xf32, #tpu.memory_space<vmem>>, vector<1x64x16xf32>
    %3 = vector.shape_cast %2 : vector<1x64x16xf32> to vector<64x16xf32>
    %c0_5 = arith.constant 0 : index
    %c0_6 = arith.constant 0 : index
    %c0_7 = arith.constant 0 : index
    %4 = vector.load %arg3[%c0_5, %c0_6, %c0_7] : memref<3x8x8xf32, #tpu.memory_space<vmem>>, vector<1x8x8xf32>
    %5 = vector.shape_cast %4 : vector<1x8x8xf32> to vector<8x8xf32>
    %cst = arith.constant dense<0.000000e+00> : vector<16x8xf32>
    %6 = tpu.matmul %1, %5, %cst {dimension_numbers = #tpu.dot_dimension_numbers<[1], [0], [0], [1], [0, 0, 1, 1], [], []>} : vector<16x8xf32>, vector<8x8xf32>, vector<16x8xf32> -> vector<16x8xf32>
    %cst_8 = arith.constant dense<0.000000e+00> : vector<64x8xf32>
    %7 = tpu.matmul %3, %6, %cst_8 {dimension_numbers = #tpu.dot_dimension_numbers<[1], [0], [0], [1], [0, 0, 1, 1], [], []>} : vector<64x16xf32>, vector<16x8xf32>, vector<64x8xf32> -> vector<64x8xf32>
    %c1 = arith.constant 1 : index
    %c0_9 = arith.constant 0 : index
    %c0_10 = arith.constant 0 : index
    %8 = vector.load %arg2[%c1, %c0_9, %c0_10] : memref<3x64x16xf32, #tpu.memory_space<vmem>>, vector<1x64x16xf32>
    %9 = vector.shape_cast %8 : vector<1x64x16xf32> to vector<64x16xf32>
    %c1_11 = arith.constant 1 : index
    %c0_12 = arith.constant 0 : index
    %c0_13 = arith.constant 0 : index
    %10 = vector.load %arg3[%c1_11, %c0_12, %c0_13] : memref<3x8x8xf32, #tpu.memory_space<vmem>>, vector<1x8x8xf32>
    %11 = vector.shape_cast %10 : vector<1x8x8xf32> to vector<8x8xf32>
    %cst_14 = arith.constant dense<0.000000e+00> : vector<16x8xf32>
    %12 = tpu.matmul %1, %11, %cst_14 {dimension_numbers = #tpu.dot_dimension_numbers<[1], [0], [0], [1], [0, 0, 1, 1], [], []>} : vector<16x8xf32>, vector<8x8xf32>, vector<16x8xf32> -> vector<16x8xf32>
    %cst_15 = arith.constant dense<0.000000e+00> : vector<64x8xf32>
    %13 = tpu.matmul %9, %12, %cst_15 {dimension_numbers = #tpu.dot_dimension_numbers<[1], [0], [0], [1], [0, 0, 1, 1], [], []>} : vector<64x16xf32>, vector<16x8xf32>, vector<64x8xf32> -> vector<64x8xf32>
    %14 = arith.addf %7, %13 : vector<64x8xf32>
    %c2 = arith.constant 2 : index
    %c0_16 = arith.constant 0 : index
    %c0_17 = arith.constant 0 : index
    %15 = vector.load %arg2[%c2, %c0_16, %c0_17] : memref<3x64x16xf32, #tpu.memory_space<vmem>>, vector<1x64x16xf32>
    %16 = vector.shape_cast %15 : vector<1x64x16xf32> to vector<64x16xf32>
    %c2_18 = arith.constant 2 : index
    %c0_19 = arith.constant 0 : index
    %c0_20 = arith.constant 0 : index
    %17 = vector.load %arg3[%c2_18, %c0_19, %c0_20] : memref<3x8x8xf32, #tpu.memory_space<vmem>>, vector<1x8x8xf32>
    %18 = vector.shape_cast %17 : vector<1x8x8xf32> to vector<8x8xf32>
    %cst_21 = arith.constant dense<0.000000e+00> : vector<16x8xf32>
    %19 = tpu.matmul %1, %18, %cst_21 {dimension_numbers = #tpu.dot_dimension_numbers<[1], [0], [0], [1], [0, 0, 1, 1], [], []>} : vector<16x8xf32>, vector<8x8xf32>, vector<16x8xf32> -> vector<16x8xf32>
    %cst_22 = arith.constant dense<0.000000e+00> : vector<64x8xf32>
    %20 = tpu.matmul %16, %19, %cst_22 {dimension_numbers = #tpu.dot_dimension_numbers<[1], [0], [0], [1], [0, 0, 1, 1], [], []>} : vector<64x16xf32>, vector<16x8xf32>, vector<64x8xf32> -> vector<64x8xf32>
    %21 = arith.addf %14, %20 : vector<64x8xf32>
    %c0_23 = arith.constant 0 : index
    %c0_24 = arith.constant 0 : index
    %22 = vector.load %arg4[%c0_23, %c0_24] : memref<64x1xf32, #tpu.memory_space<vmem>>, vector<64x1xf32>
    %23 = vector.broadcast %22 : vector<64x1xf32> to vector<64x8xf32>
    %24 = arith.addf %21, %23 : vector<64x8xf32>
    %cst_25 = arith.constant 0.000000e+00 : f32
    %25 = vector.broadcast %cst_25 : f32 to vector<64x8xf32>
    %26 = arith.cmpf oge, %24, %25 : vector<64x8xf32>
    %cst_26 = arith.constant 2.000000e-01 : f32
    %27 = vector.broadcast %cst_26 : f32 to vector<64x8xf32>
    %28 = arith.mulf %27, %24 : vector<64x8xf32>
    %29 = arith.select %26, %24, %28 : vector<64x8xi1>, vector<64x8xf32>
    %c0_27 = arith.constant 0 : index
    %c0_28 = arith.constant 0 : index
    %c0_29 = arith.constant 0 : index
    %30 = vector.load %arg5[%c0_27, %c0_28, %c0_29] : memref<3x64x64xf32, #tpu.memory_space<vmem>>, vector<1x64x64xf32>
    %31 = vector.shape_cast %30 : vector<1x64x64xf32> to vector<64x64xf32>
    %c0_30 = arith.constant 0 : index
    %c0_31 = arith.constant 0 : index
    %c0_32 = arith.constant 0 : index
    %32 = vector.load %arg6[%c0_30, %c0_31, %c0_32] : memref<3x8x16xf32, #tpu.memory_space<vmem>>, vector<1x8x16xf32>
    %33 = vector.shape_cast %32 : vector<1x8x16xf32> to vector<8x16xf32>
    %cst_33 = arith.constant dense<0.000000e+00> : vector<64x16xf32>
    %34 = tpu.matmul %29, %33, %cst_33 {dimension_numbers = #tpu.dot_dimension_numbers<[1], [0], [0], [1], [0, 0, 1, 1], [], []>} : vector<64x8xf32>, vector<8x16xf32>, vector<64x16xf32> -> vector<64x16xf32>
    %cst_34 = arith.constant dense<0.000000e+00> : vector<64x16xf32>
    %35 = tpu.matmul %31, %34, %cst_34 {dimension_numbers = #tpu.dot_dimension_numbers<[1], [0], [0], [1], [0, 0, 1, 1], [], []>} : vector<64x64xf32>, vector<64x16xf32>, vector<64x16xf32> -> vector<64x16xf32>
    %c1_35 = arith.constant 1 : index
    %c0_36 = arith.constant 0 : index
    %c0_37 = arith.constant 0 : index
    %36 = vector.load %arg5[%c1_35, %c0_36, %c0_37] : memref<3x64x64xf32, #tpu.memory_space<vmem>>, vector<1x64x64xf32>
    %37 = vector.shape_cast %36 : vector<1x64x64xf32> to vector<64x64xf32>
    %c1_38 = arith.constant 1 : index
    %c0_39 = arith.constant 0 : index
    %c0_40 = arith.constant 0 : index
    %38 = vector.load %arg6[%c1_38, %c0_39, %c0_40] : memref<3x8x16xf32, #tpu.memory_space<vmem>>, vector<1x8x16xf32>
    %39 = vector.shape_cast %38 : vector<1x8x16xf32> to vector<8x16xf32>
    %cst_41 = arith.constant dense<0.000000e+00> : vector<64x16xf32>
    %40 = tpu.matmul %29, %39, %cst_41 {dimension_numbers = #tpu.dot_dimension_numbers<[1], [0], [0], [1], [0, 0, 1, 1], [], []>} : vector<64x8xf32>, vector<8x16xf32>, vector<64x16xf32> -> vector<64x16xf32>
    %cst_42 = arith.constant dense<0.000000e+00> : vector<64x16xf32>
    %41 = tpu.matmul %37, %40, %cst_42 {dimension_numbers = #tpu.dot_dimension_numbers<[1], [0], [0], [1], [0, 0, 1, 1], [], []>} : vector<64x64xf32>, vector<64x16xf32>, vector<64x16xf32> -> vector<64x16xf32>
    %42 = arith.addf %35, %41 : vector<64x16xf32>
    %c2_43 = arith.constant 2 : index
    %c0_44 = arith.constant 0 : index
    %c0_45 = arith.constant 0 : index
    %43 = vector.load %arg5[%c2_43, %c0_44, %c0_45] : memref<3x64x64xf32, #tpu.memory_space<vmem>>, vector<1x64x64xf32>
    %44 = vector.shape_cast %43 : vector<1x64x64xf32> to vector<64x64xf32>
    %c2_46 = arith.constant 2 : index
    %c0_47 = arith.constant 0 : index
    %c0_48 = arith.constant 0 : index
    %45 = vector.load %arg6[%c2_46, %c0_47, %c0_48] : memref<3x8x16xf32, #tpu.memory_space<vmem>>, vector<1x8x16xf32>
    %46 = vector.shape_cast %45 : vector<1x8x16xf32> to vector<8x16xf32>
    %cst_49 = arith.constant dense<0.000000e+00> : vector<64x16xf32>
    %47 = tpu.matmul %29, %46, %cst_49 {dimension_numbers = #tpu.dot_dimension_numbers<[1], [0], [0], [1], [0, 0, 1, 1], [], []>} : vector<64x8xf32>, vector<8x16xf32>, vector<64x16xf32> -> vector<64x16xf32>
    %cst_50 = arith.constant dense<0.000000e+00> : vector<64x16xf32>
    %48 = tpu.matmul %44, %47, %cst_50 {dimension_numbers = #tpu.dot_dimension_numbers<[1], [0], [0], [1], [0, 0, 1, 1], [], []>} : vector<64x64xf32>, vector<64x16xf32>, vector<64x16xf32> -> vector<64x16xf32>
    %49 = arith.addf %42, %48 : vector<64x16xf32>
    %c0_51 = arith.constant 0 : index
    %c0_52 = arith.constant 0 : index
    %50 = vector.load %arg7[%c0_51, %c0_52] : memref<64x1xf32, #tpu.memory_space<vmem>>, vector<64x1xf32>
    %51 = vector.broadcast %50 : vector<64x1xf32> to vector<64x16xf32>
    %52 = arith.addf %49, %51 : vector<64x16xf32>
    %cst_53 = arith.constant 0.000000e+00 : f32
    %53 = vector.broadcast %cst_53 : f32 to vector<64x16xf32>
    %54 = arith.cmpf oge, %52, %53 : vector<64x16xf32>
    %cst_54 = arith.constant 2.000000e-01 : f32
    %55 = vector.broadcast %cst_54 : f32 to vector<64x16xf32>
    %56 = arith.mulf %55, %52 : vector<64x16xf32>
    %57 = arith.select %54, %52, %56 : vector<64x16xi1>, vector<64x16xf32>
    %c0_55 = arith.constant 0 : index
    %c0_56 = arith.constant 0 : index
    %c0_57 = arith.constant 0 : index
    %58 = vector.load %arg8[%c0_55, %c0_56, %c0_57] : memref<3x64x64xf32, #tpu.memory_space<vmem>>, vector<1x64x64xf32>
    %59 = vector.shape_cast %58 : vector<1x64x64xf32> to vector<64x64xf32>
    %c0_58 = arith.constant 0 : index
    %c0_59 = arith.constant 0 : index
    %c0_60 = arith.constant 0 : index
    %60 = vector.load %arg9[%c0_58, %c0_59, %c0_60] : memref<3x16x32xf32, #tpu.memory_space<vmem>>, vector<1x16x32xf32>
    %61 = vector.shape_cast %60 : vector<1x16x32xf32> to vector<16x32xf32>
    %cst_61 = arith.constant dense<0.000000e+00> : vector<64x32xf32>
    %62 = tpu.matmul %57, %61, %cst_61 {dimension_numbers = #tpu.dot_dimension_numbers<[1], [0], [0], [1], [0, 0, 1, 1], [], []>} : vector<64x16xf32>, vector<16x32xf32>, vector<64x32xf32> -> vector<64x32xf32>
    %cst_62 = arith.constant dense<0.000000e+00> : vector<64x32xf32>
    %63 = tpu.matmul %59, %62, %cst_62 {dimension_numbers = #tpu.dot_dimension_numbers<[1], [0], [0], [1], [0, 0, 1, 1], [], []>} : vector<64x64xf32>, vector<64x32xf32>, vector<64x32xf32> -> vector<64x32xf32>
    %c1_63 = arith.constant 1 : index
    %c0_64 = arith.constant 0 : index
    %c0_65 = arith.constant 0 : index
    %64 = vector.load %arg8[%c1_63, %c0_64, %c0_65] : memref<3x64x64xf32, #tpu.memory_space<vmem>>, vector<1x64x64xf32>
    %65 = vector.shape_cast %64 : vector<1x64x64xf32> to vector<64x64xf32>
    %c1_66 = arith.constant 1 : index
    %c0_67 = arith.constant 0 : index
    %c0_68 = arith.constant 0 : index
    %66 = vector.load %arg9[%c1_66, %c0_67, %c0_68] : memref<3x16x32xf32, #tpu.memory_space<vmem>>, vector<1x16x32xf32>
    %67 = vector.shape_cast %66 : vector<1x16x32xf32> to vector<16x32xf32>
    %cst_69 = arith.constant dense<0.000000e+00> : vector<64x32xf32>
    %68 = tpu.matmul %57, %67, %cst_69 {dimension_numbers = #tpu.dot_dimension_numbers<[1], [0], [0], [1], [0, 0, 1, 1], [], []>} : vector<64x16xf32>, vector<16x32xf32>, vector<64x32xf32> -> vector<64x32xf32>
    %cst_70 = arith.constant dense<0.000000e+00> : vector<64x32xf32>
    %69 = tpu.matmul %65, %68, %cst_70 {dimension_numbers = #tpu.dot_dimension_numbers<[1], [0], [0], [1], [0, 0, 1, 1], [], []>} : vector<64x64xf32>, vector<64x32xf32>, vector<64x32xf32> -> vector<64x32xf32>
    %70 = arith.addf %63, %69 : vector<64x32xf32>
    %c2_71 = arith.constant 2 : index
    %c0_72 = arith.constant 0 : index
    %c0_73 = arith.constant 0 : index
    %71 = vector.load %arg8[%c2_71, %c0_72, %c0_73] : memref<3x64x64xf32, #tpu.memory_space<vmem>>, vector<1x64x64xf32>
    %72 = vector.shape_cast %71 : vector<1x64x64xf32> to vector<64x64xf32>
    %c2_74 = arith.constant 2 : index
    %c0_75 = arith.constant 0 : index
    %c0_76 = arith.constant 0 : index
    %73 = vector.load %arg9[%c2_74, %c0_75, %c0_76] : memref<3x16x32xf32, #tpu.memory_space<vmem>>, vector<1x16x32xf32>
    %74 = vector.shape_cast %73 : vector<1x16x32xf32> to vector<16x32xf32>
    %cst_77 = arith.constant dense<0.000000e+00> : vector<64x32xf32>
    %75 = tpu.matmul %57, %74, %cst_77 {dimension_numbers = #tpu.dot_dimension_numbers<[1], [0], [0], [1], [0, 0, 1, 1], [], []>} : vector<64x16xf32>, vector<16x32xf32>, vector<64x32xf32> -> vector<64x32xf32>
    %cst_78 = arith.constant dense<0.000000e+00> : vector<64x32xf32>
    %76 = tpu.matmul %72, %75, %cst_78 {dimension_numbers = #tpu.dot_dimension_numbers<[1], [0], [0], [1], [0, 0, 1, 1], [], []>} : vector<64x64xf32>, vector<64x32xf32>, vector<64x32xf32> -> vector<64x32xf32>
    %77 = arith.addf %70, %76 : vector<64x32xf32>
    %c0_79 = arith.constant 0 : index
    %c0_80 = arith.constant 0 : index
    %78 = vector.load %arg10[%c0_79, %c0_80] : memref<64x1xf32, #tpu.memory_space<vmem>>, vector<64x1xf32>
    %79 = vector.broadcast %78 : vector<64x1xf32> to vector<64x32xf32>
    %80 = arith.addf %77, %79 : vector<64x32xf32>
    %cst_81 = arith.constant 0.000000e+00 : f32
    %81 = vector.broadcast %cst_81 : f32 to vector<64x32xf32>
    %82 = arith.cmpf oge, %80, %81 : vector<64x32xf32>
    %cst_82 = arith.constant 2.000000e-01 : f32
    %83 = vector.broadcast %cst_82 : f32 to vector<64x32xf32>
    %84 = arith.mulf %83, %80 : vector<64x32xf32>
    %85 = arith.select %82, %80, %84 : vector<64x32xi1>, vector<64x32xf32>
    %c0_83 = arith.constant 0 : index
    %c0_84 = arith.constant 0 : index
    %c0_85 = arith.constant 0 : index
    %86 = vector.load %arg11[%c0_83, %c0_84, %c0_85] : memref<3x256x64xf32, #tpu.memory_space<vmem>>, vector<1x256x64xf32>
    %87 = vector.shape_cast %86 : vector<1x256x64xf32> to vector<256x64xf32>
    %c0_86 = arith.constant 0 : index
    %c0_87 = arith.constant 0 : index
    %c0_88 = arith.constant 0 : index
    %88 = vector.load %arg12[%c0_86, %c0_87, %c0_88] : memref<3x32x64xf32, #tpu.memory_space<vmem>>, vector<1x32x64xf32>
    %89 = vector.shape_cast %88 : vector<1x32x64xf32> to vector<32x64xf32>
    %cst_89 = arith.constant dense<0.000000e+00> : vector<64x64xf32>
    %90 = tpu.matmul %85, %89, %cst_89 {dimension_numbers = #tpu.dot_dimension_numbers<[1], [0], [0], [1], [0, 0, 1, 1], [], []>} : vector<64x32xf32>, vector<32x64xf32>, vector<64x64xf32> -> vector<64x64xf32>
    %cst_90 = arith.constant dense<0.000000e+00> : vector<256x64xf32>
    %91 = tpu.matmul %87, %90, %cst_90 {dimension_numbers = #tpu.dot_dimension_numbers<[1], [0], [0], [1], [0, 0, 1, 1], [], []>} : vector<256x64xf32>, vector<64x64xf32>, vector<256x64xf32> -> vector<256x64xf32>
    %c1_91 = arith.constant 1 : index
    %c0_92 = arith.constant 0 : index
    %c0_93 = arith.constant 0 : index
    %92 = vector.load %arg11[%c1_91, %c0_92, %c0_93] : memref<3x256x64xf32, #tpu.memory_space<vmem>>, vector<1x256x64xf32>
    %93 = vector.shape_cast %92 : vector<1x256x64xf32> to vector<256x64xf32>
    %c1_94 = arith.constant 1 : index
    %c0_95 = arith.constant 0 : index
    %c0_96 = arith.constant 0 : index
    %94 = vector.load %arg12[%c1_94, %c0_95, %c0_96] : memref<3x32x64xf32, #tpu.memory_space<vmem>>, vector<1x32x64xf32>
    %95 = vector.shape_cast %94 : vector<1x32x64xf32> to vector<32x64xf32>
    %cst_97 = arith.constant dense<0.000000e+00> : vector<64x64xf32>
    %96 = tpu.matmul %85, %95, %cst_97 {dimension_numbers = #tpu.dot_dimension_numbers<[1], [0], [0], [1], [0, 0, 1, 1], [], []>} : vector<64x32xf32>, vector<32x64xf32>, vector<64x64xf32> -> vector<64x64xf32>
    %cst_98 = arith.constant dense<0.000000e+00> : vector<256x64xf32>
    %97 = tpu.matmul %93, %96, %cst_98 {dimension_numbers = #tpu.dot_dimension_numbers<[1], [0], [0], [1], [0, 0, 1, 1], [], []>} : vector<256x64xf32>, vector<64x64xf32>, vector<256x64xf32> -> vector<256x64xf32>
    %98 = arith.addf %91, %97 : vector<256x64xf32>
    %c2_99 = arith.constant 2 : index
    %c0_100 = arith.constant 0 : index
    %c0_101 = arith.constant 0 : index
    %99 = vector.load %arg11[%c2_99, %c0_100, %c0_101] : memref<3x256x64xf32, #tpu.memory_space<vmem>>, vector<1x256x64xf32>
    %100 = vector.shape_cast %99 : vector<1x256x64xf32> to vector<256x64xf32>
    %c2_102 = arith.constant 2 : index
    %c0_103 = arith.constant 0 : index
    %c0_104 = arith.constant 0 : index
    %101 = vector.load %arg12[%c2_102, %c0_103, %c0_104] : memref<3x32x64xf32, #tpu.memory_space<vmem>>, vector<1x32x64xf32>
    %102 = vector.shape_cast %101 : vector<1x32x64xf32> to vector<32x64xf32>
    %cst_105 = arith.constant dense<0.000000e+00> : vector<64x64xf32>
    %103 = tpu.matmul %85, %102, %cst_105 {dimension_numbers = #tpu.dot_dimension_numbers<[1], [0], [0], [1], [0, 0, 1, 1], [], []>} : vector<64x32xf32>, vector<32x64xf32>, vector<64x64xf32> -> vector<64x64xf32>
    %cst_106 = arith.constant dense<0.000000e+00> : vector<256x64xf32>
    %104 = tpu.matmul %100, %103, %cst_106 {dimension_numbers = #tpu.dot_dimension_numbers<[1], [0], [0], [1], [0, 0, 1, 1], [], []>} : vector<256x64xf32>, vector<64x64xf32>, vector<256x64xf32> -> vector<256x64xf32>
    %105 = arith.addf %98, %104 : vector<256x64xf32>
    %c0_107 = arith.constant 0 : index
    %c0_108 = arith.constant 0 : index
    %106 = vector.load %arg13[%c0_107, %c0_108] : memref<256x1xf32, #tpu.memory_space<vmem>>, vector<256x1xf32>
    %107 = vector.broadcast %106 : vector<256x1xf32> to vector<256x64xf32>
    %108 = arith.addf %105, %107 : vector<256x64xf32>
    %cst_109 = arith.constant 0.000000e+00 : f32
    %109 = vector.broadcast %cst_109 : f32 to vector<256x64xf32>
    %110 = arith.cmpf oge, %108, %109 : vector<256x64xf32>
    %cst_110 = arith.constant 2.000000e-01 : f32
    %111 = vector.broadcast %cst_110 : f32 to vector<256x64xf32>
    %112 = arith.mulf %111, %108 : vector<256x64xf32>
    %113 = arith.select %110, %108, %112 : vector<256x64xi1>, vector<256x64xf32>
    %c0_111 = arith.constant 0 : index
    %c0_112 = arith.constant 0 : index
    %114 = vector.load %arg14[%c0_111, %c0_112] : memref<512x256xf32, #tpu.memory_space<vmem>>, vector<512x256xf32>
    %cst_113 = arith.constant dense<0.000000e+00> : vector<512x64xf32>
    %115 = tpu.matmul %114, %113, %cst_113 {dimension_numbers = #tpu.dot_dimension_numbers<[1], [0], [0], [1], [0, 0, 1, 1], [], []>} : vector<512x256xf32>, vector<256x64xf32>, vector<512x64xf32> -> vector<512x64xf32>
    %c0_114 = arith.constant 0 : index
    %c0_115 = arith.constant 0 : index
    %116 = vector.load %arg15[%c0_114, %c0_115] : memref<64x128xf32, #tpu.memory_space<vmem>>, vector<64x128xf32>
    %cst_116 = arith.constant dense<0.000000e+00> : vector<512x128xf32>
    %117 = tpu.matmul %115, %116, %cst_116 {dimension_numbers = #tpu.dot_dimension_numbers<[1], [0], [0], [1], [0, 0, 1, 1], [], []>} : vector<512x64xf32>, vector<64x128xf32>, vector<512x128xf32> -> vector<512x128xf32>
    %c0_117 = arith.constant 0 : index
    %c0_118 = arith.constant 0 : index
    %c0_119 = arith.constant 0 : index
    %118 = vector.load %arg16[%c0_117, %c0_118, %c0_119] : memref<1x512x128xf32, #tpu.memory_space<vmem>>, vector<1x512x128xf32>
    %119 = vector.shape_cast %118 : vector<1x512x128xf32> to vector<512x128xf32>
    %120 = vector.shape_cast %117 : vector<512x128xf32> to vector<1x512x128xf32>
    tpu.vector_store %arg16[%c0_117, %c0_118, %c0_119], %120 {strides = array<i32>} : memref<1x512x128xf32, #tpu.memory_space<vmem>>, vector<1x512x128xf32>,
    return
  }
  func.func @transform_0(%arg0: i32) -> (i32, i32, i32) {
    %c0_i32 = arith.constant 0 : i32
    %c0_i32_0 = arith.constant 0 : i32
    %c0_i32_1 = arith.constant 0 : i32
    return %arg0, %c0_i32, %c0_i32_0 : i32, i32, i32
  }
  func.func @transform_1(%arg0: i32) -> (i32, i32, i32) {
    %c0_i32 = arith.constant 0 : i32
    %c0_i32_0 = arith.constant 0 : i32
    %c0_i32_1 = arith.constant 0 : i32
    %c0_i32_2 = arith.constant 0 : i32
    return %c0_i32, %c0_i32_0, %c0_i32_1 : i32, i32, i32
  }
  func.func @transform_2(%arg0: i32) -> (i32, i32, i32) {
    %c0_i32 = arith.constant 0 : i32
    %c0_i32_0 = arith.constant 0 : i32
    %c0_i32_1 = arith.constant 0 : i32
    %c0_i32_2 = arith.constant 0 : i32
    return %c0_i32, %c0_i32_0, %c0_i32_1 : i32, i32, i32
  }
  func.func @transform_3(%arg0: i32) -> (i32, i32) {
    %c0_i32 = arith.constant 0 : i32
    %c0_i32_0 = arith.constant 0 : i32
    %c0_i32_1 = arith.constant 0 : i32
    return %c0_i32, %c0_i32_0 : i32, i32
  }
  func.func @transform_4(%arg0: i32) -> (i32, i32, i32) {
    %c0_i32 = arith.constant 0 : i32
    %c0_i32_0 = arith.constant 0 : i32
    %c0_i32_1 = arith.constant 0 : i32
    %c0_i32_2 = arith.constant 0 : i32
    return %c0_i32, %c0_i32_0, %c0_i32_1 : i32, i32, i32
  }
  func.func @transform_5(%arg0: i32) -> (i32, i32, i32) {
    %c0_i32 = arith.constant 0 : i32
    %c0_i32_0 = arith.constant 0 : i32
    %c0_i32_1 = arith.constant 0 : i32
    %c0_i32_2 = arith.constant 0 : i32
    return %c0_i32, %c0_i32_0, %c0_i32_1 : i32, i32, i32
  }
  func.func @transform_6(%arg0: i32) -> (i32, i32) {
    %c0_i32 = arith.constant 0 : i32
    %c0_i32_0 = arith.constant 0 : i32
    %c0_i32_1 = arith.constant 0 : i32
    return %c0_i32, %c0_i32_0 : i32, i32
  }
  func.func @transform_7(%arg0: i32) -> (i32, i32, i32) {
    %c0_i32 = arith.constant 0 : i32
    %c0_i32_0 = arith.constant 0 : i32
    %c0_i32_1 = arith.constant 0 : i32
    %c0_i32_2 = arith.constant 0 : i32
    return %c0_i32, %c0_i32_0, %c0_i32_1 : i32, i32, i32
  }
  func.func @transform_8(%arg0: i32) -> (i32, i32, i32) {
    %c0_i32 = arith.constant 0 : i32
    %c0_i32_0 = arith.constant 0 : i32
    %c0_i32_1 = arith.constant 0 : i32
    %c0_i32_2 = arith.constant 0 : i32
    return %c0_i32, %c0_i32_0, %c0_i32_1 : i32, i32, i32
  }
  func.func @transform_9(%arg0: i32) -> (i32, i32) {
    %c0_i32 = arith.constant 0 : i32
    %c0_i32_0 = arith.constant 0 : i32
    %c0_i32_1 = arith.constant 0 : i32
    return %c0_i32, %c0_i32_0 : i32, i32
  }
  func.func @transform_10(%arg0: i32) -> (i32, i32, i32) {
    %c0_i32 = arith.constant 0 : i32
    %c0_i32_0 = arith.constant 0 : i32
    %c0_i32_1 = arith.constant 0 : i32
    %c0_i32_2 = arith.constant 0 : i32
    return %c0_i32, %c0_i32_0, %c0_i32_1 : i32, i32, i32
  }
  func.func @transform_11(%arg0: i32) -> (i32, i32, i32) {
    %c0_i32 = arith.constant 0 : i32
    %c0_i32_0 = arith.constant 0 : i32
    %c0_i32_1 = arith.constant 0 : i32
    %c0_i32_2 = arith.constant 0 : i32
    return %c0_i32, %c0_i32_0, %c0_i32_1 : i32, i32, i32
  }
  func.func @transform_12(%arg0: i32) -> (i32, i32) {
    %c0_i32 = arith.constant 0 : i32
    %c0_i32_0 = arith.constant 0 : i32
    %c0_i32_1 = arith.constant 0 : i32
    return %c0_i32, %c0_i32_0 : i32, i32
  }
  func.func @transform_13(%arg0: i32) -> (i32, i32) {
    %c0_i32 = arith.constant 0 : i32
    %c0_i32_0 = arith.constant 0 : i32
    %c0_i32_1 = arith.constant 0 : i32
    return %c0_i32, %c0_i32_0 : i32, i32
  }
  func.func @transform_14(%arg0: i32) -> (i32, i32) {
    %c0_i32 = arith.constant 0 : i32
    %c0_i32_0 = arith.constant 0 : i32
    %c0_i32_1 = arith.constant 0 : i32
    return %c0_i32, %c0_i32_0 : i32, i32
  }
  func.func @transform_15(%arg0: i32) -> (i32, i32, i32) {
    %c0_i32 = arith.constant 0 : i32
    %c0_i32_0 = arith.constant 0 : i32
    %c0_i32_1 = arith.constant 0 : i32
    return %arg0, %c0_i32, %c0_i32_0 : i32, i32, i32
  }
}

</mosaic_0001>

<bundles_post_ra>
// kernel: decoder_curve_forward.1
= control target key start
LH: loop header
LB: loop body
LE: loop exit
PB: predicated region body
PF: predicated region fallthrough
CT: control target
= control target key end

     0   :  { %s6694_s0 = inlined_call_operand.vmem [shape: f32[2,16,8], index: 0, kind: input, shape index: {}]   ;;  %s6695_s1 = inlined_call_operand.vmem [shape: f32[3,64,16], index: 1, kind: input, shape index: {}]   ;;  %s6696_s2 = inlined_call_operand.vmem [shape: f32[3,8,8], index: 2, kind: input, shape index: {}]   ;;  %s6697_s3 = inlined_call_operand.vmem [shape: f32[64,1], index: 3, kind: input, shape index: {}]   ;;  %s6698_s4 = inlined_call_operand.vmem [shape: f32[3,64,64], index: 4, kind: input, shape index: {}]   ;;  %s6699_s5 = inlined_call_operand.vmem [shape: f32[3,8,16], index: 5, kind: input, shape index: {}]   ;;  %s6700_s6 = inlined_call_operand.vmem [shape: f32[64,1], index: 6, kind: input, shape index: {}]   ;;  %s6701_s7 = inlined_call_operand.vmem [shape: f32[3,64,64], index: 7, kind: input, shape index: {}]   ;;  %s6702_s8 = inlined_call_operand.vmem [shape: f32[3,16,32], index: 8, kind: input, shape index: {}]   ;;  %s6703_s9 = inlined_call_operand.vmem [shape: f32[64,1], index: 9, kind: input, shape index: {}]   ;;  %s6704_s10 = inlined_call_operand.vmem [shape: f32[3,256,64], index: 10, kind: input, shape index: {}]   ;;  %s6705_s11 = inlined_call_operand.vmem [shape: f32[3,32,64], index: 11, kind: input, shape index: {}]   ;;  %s6706_s12 = inlined_call_operand.vmem [shape: f32[256,1], index: 12, kind: input, shape index: {}]   ;;  %s6707_s13 = inlined_call_operand.vmem [shape: f32[512,256], index: 13, kind: input, shape index: {}]   ;;  %s6708_s14 = inlined_call_operand.vmem [shape: f32[64,128], index: 14, kind: input, shape index: {}]   ;;  %s6709_s15 = inlined_call_operand.hbm [shape: f32[2,512,128], index: 15, kind: output, shape index: {}]  }
   0x1   :  { %6713 = sst [smem:[#allocation29_spill]] %s6694_s0 }
   0x2   :  { %6714 = sst [smem:[#allocation30_spill]] %s6695_s1 }
   0x3   :  { %6715 = sst [smem:[#allocation31_spill]] %s6696_s2 }
   0x4   :  { %20 = vsyncpa [#allocation3], 0 }
   0x5   :  { %22 = vsyncpa [#allocation3 + $0x1], 0  ;;  %s4808_s18 = smov 0   ;;  %s4810_s19 = smov 0  }
   0x6   :  { %s4812_s20 = smov 0   ;;  %s4814_s21 = smov 0  }
   0x7 LB: > { %6716 = sst [smem:[#allocation5_spill]] %s4719_s20  ;;  %s4829_s22 = sadd.s32 4294967295, %s4723_s21   ;;  %s4723_s21 = sphi %s4814_s21, %s6766_s21   ;;  %s4719_s20 = sphi %s4812_s20, %s6768_s20   ;;  %s4715_s19 = sphi %s4810_s19, %s6770_s19   ;;  %s4711_s18 = sphi %s4808_s18, %s6769_s18  }
   0x8   : > { %s4148_s23 = sadd.s32 4294967294, %s4723_s21   ;;  %s4833_s24 = sadd.s32 1, %s4723_s21  }
   0x9   : > { %6717 = sst [smem:[#allocation6_spill]] %s4833_s24  ;;  %s355_s25 = sadd.s32 1, %s4719_s20 }
   0xa   : > { %s352_s26 = ssub.s32 %s4723_s21, %s4833_s24  ;;  %p365_p0 = scmp.ne.s32.totalorder %s4719_s20, %s4715_s19 }
   0xb   : > { %p353_p1 = scmp.eq.s32.totalorder %s352_s26, 0  ;;  %p366_p2 = scmp.eq.s32.totalorder %s4829_s22, 1 }
   0xc   : > { %p371_p3 = scmp.ne.s32.totalorder %s4715_s19, %s4711_s18  ;;  %p372_p4 = scmp.eq.s32.totalorder %s4148_s23, 1 }
   0xd   : > { %s4844_s27 = scalar_select %p353_p1, %s4719_s20, %s355_s25  }
   0xe   : > { %p4846_p5 = por %p366_p2, %p365_p0  ;;  %p4850_p6 = por %p372_p4, %p371_p3 }
   0xf   : > { %6718 = sst [smem:[#allocation7_spill]] %s4844_s27  ;;  %p4151_p7 = scmp.ge.s32.totalorder %s4723_s21, 1 }
  0x10   : > { %p440_p8 = scmp.lt.s32.totalorder %s4723_s21, 3 }
  0x12   : > { %p441_p9 = pnand %p4151_p7, %p440_p8 }
  0x14   : > { %444 = sbr.rel (%p441_p9) target bundleno = 2798 (0xaee), region = 80 }
  0x19   : > { %s6721_s2 = sld [smem:[#allocation31_spill]]  ;;  %p488_p10 = scmp.lt.s32.totalorder %s4829_s22, 1  ;;  %v806_v3 = vld [vmem:[%s6697_s3] sm:$0xff]  ;;  %v808_v4 = vld [vmem:[%s6697_s3 + $0x10] sm:$0xff]  ;;  %v4725_v5 = vmov 0   ;;  %vm504_vm0 = vcmask 64512  }
  0x1a   : > { %4658 = vset.pattern.permute.xlu0 %v4725_v5  ;;  %4659 = vset.pattern.permute.xlu1 %v4725_v5  ;;  %s6722_s0 = sld [smem:[#allocation29_spill]]  ;;  %v807_v7 = vld [vmem:[%s6697_s3 + $0x8] sm:$0xff]  ;;  %v809_v8 = vld [vmem:[%s6697_s3 + $0x18] sm:$0xff]  ;;  %v812_v10 = vld [vmem:[%s6697_s3 + $0x30] sm:$0xff]  ;;  %vm568_vm1 = vcmask 130048   ;;  %vm1012_vm10 = vcmask 523264  }
  0x1b   : > { %s489_s16 = scalar_select %p488_p10, %s4829_s22, 1  ;;  %816 = vperm.xlu0 %4658, %v806_v3   ;;  %826 = vperm.xlu1 %4659, %v808_v4   ;;  %v813_v11 = vld [vmem:[%s6697_s3 + $0x38] sm:$0xff]  ;;  %v1269_v12 = vld [vmem:[%s6700_s6 + $0x8] sm:$0xff]  ;;  %v1270_v13 = vld [vmem:[%s6700_s6 + $0x10] sm:$0xff] }
  0x1c   : > { %4660 = vset.pattern.permute.xlu2 %v4725_v5  ;;  %v1272_v14 = vld [vmem:[%s6700_s6 + $0x20] sm:$0xff]  ;;  %v1273_v15 = vld [vmem:[%s6700_s6 + $0x28] sm:$0xff]  ;;  %v1275_v16 = vld [vmem:[%s6700_s6 + $0x38] sm:$0xff]  ;;  %s6723_s1 = sld [smem:[#allocation30_spill]]  ;;  %s485_s25 = sand.u32 1, %s4715_s19  }
  0x1d   : > { %s4598_s17 = sshll.u32 %s489_s16, 4  ;;  %v1734_v17 = vld [vmem:[%s6703_s9 + $0x10] sm:$0xff]  ;;  %v1732_v18 = vld [vmem:[%s6703_s9] sm:$0xff]  ;;  %v1737_v19 = vld [vmem:[%s6703_s9 + $0x28] sm:$0xff]  ;;  %s4152_s27 = sshll.u32 %s485_s25, 9 }
  0x1e   : > { %v810_v20 = vld [vmem:[%s6697_s3 + $0x20] sm:$0xff]  ;;  %v1735_v21 = vld [vmem:[%s6703_s9 + $0x18] sm:$0xff]  ;;  %v811_v23 = vld [vmem:[%s6697_s3 + $0x28] sm:$0xff]  ;;  %s6369_s30 = scalar_lea.vmem [#allocation2], %s4152_s27  ;;  %s4071_s24 = scalar_lea.sflag [#allocation3], %s485_s25 }
  0x1f   : > { %v503_v0 = vld [vmem:[%s6721_s2] sm:$0xff]  ;;  %v4165_v1 = vld [vmem:[%s6721_s2 + $0x8] sm:$0xff]  ;;  %v4192_v2 = vld [vmem:[%s6721_s2 + $0x10] sm:$0xff]  ;;  %836 = vperm.xlu2 %4660, %v810_v20   ;;  %s4083_s23 = sshll.u32 %s6369_s30, 4  ;;  %s4084_s23 = int_to_ptr.vmem [resolvable:$true] %s4083_s23 }
  0x20   : > { %526 = vmatpush.msra.mxu0 %v503_v0  ;;  %560 = vmatpush.msra.mxu1 %v4165_v1  ;;  %s492_s26 = scalar_lea.vmem %s6722_s0, %s4598_s17  ;;  %v2762_v22 = vld [vmem:[%s6706_s12 + $0xf8] sm:$0xff]  ;;  %v1738_v24 = vld [vmem:[%s6703_s9 + $0x30] sm:$0xff]  ;;  %v1268_v26 = vld [vmem:[%s6700_s6] sm:$0xff]  ;;  %s4599_s0 = sshll.u32 %s4829_s22, 9 }
  0x21   : > { %v493_v6 = vld [vmem:[%s492_s26] sm:$0xff]  ;;  %v494_v9 = vld [vmem:[%s492_s26 + $0x8] sm:$0xff]  ;;  %v2746_v25 = vld [vmem:[%s6706_s12 + $0x78] sm:$0xff]  ;;  %s4082_s17 = scalar_lea.hbm %s6709_s15, %s4599_s0  ;;  %s4681_s0 = scalar_lea.hbm %s6709_s15, 1024 }
  0x22   : > { %725 = vmatpush.msrb.mxu0 %v4192_v2  ;;  %4166 = vmatmul.msk.f32.vlgmr.msra.gmra.mxu1 %vm504_vm0, %v493_v6  ;;  %v2761_v27 = vld [vmem:[%s6706_s12 + $0xf0] sm:$0xff]  ;;  %v2758_v28 = vld [vmem:[%s6706_s12 + $0xd8] sm:$0xff]  ;;  %v2759_v32 = vld [vmem:[%s6706_s12 + $0xe0] sm:$0xff]  ;;  %s4085_s20 = sshll.u32 %s4082_s17, 4  ;;  %s4086_s20 = int_to_ptr.hbm [resolvable:$true] %s4085_s20 }
  0x23   : > { %4155 = vmatmul.msk.f32.vlgmr.msra.gmra.mxu0 %vm504_vm0, %v493_v6  ;;  %821 = vperm.xlu0 %4658, %v807_v7   ;;  %v1271_v31 = vld [vmem:[%s6700_s6 + $0x18] sm:$0xff]  ;;  %v2743_v33 = vld [vmem:[%s6706_s12 + $0x60] sm:$0xff]  ;;  %v1274_v38 = vld [vmem:[%s6700_s6 + $0x30] sm:$0xff]  ;;  %s4675_s26 = sshra.s32 %s4086_s20, 4  ;;  %s4676_s26 = int_to_ptr.hbm [resolvable:$true] %s4675_s26 }
  0x24   : > { %831 = vperm.xlu1 %4659, %v809_v8   ;;  %v4157_v36 = vld [vmem:[%s6723_s1 + $0x40] sm:$0xff]  ;;  %v2744_v39 = vld [vmem:[%s6706_s12 + $0x68] sm:$0xff]  ;;  %v4159_v47 = vld [vmem:[%s6723_s1 + $0x50] sm:$0xff]  ;;  %p4682_p0 = scmp.lt.s32.totalorder %s4676_s26, %s6709_s15 }
  0x25   : > { %v495_v37 = vld [vmem:[%s6723_s1] sm:$0xff]  ;;  %v4158_v41 = vld [vmem:[%s6723_s1 + $0x48] sm:$0xff]  ;;  %v497_v48 = vld [vmem:[%s6723_s1 + $0x10] sm:$0xff] }
  0x26   : > { %v2755_v40 = vld [vmem:[%s6706_s12 + $0xc0] sm:$0xff]  ;;  %v496_v42 = vld [vmem:[%s6723_s1 + $0x8] sm:$0xff]  ;;  %v2741_v51 = vld [vmem:[%s6706_s12 + $0x50] sm:$0xff] }
  0x27   : > { %841 = vperm.xlu2 %4660, %v811_v23   ;;  %v1733_v44 = vld [vmem:[%s6703_s9 + $0x8] sm:$0xff]  ;;  %v1736_v50 = vld [vmem:[%s6703_s9 + $0x20] sm:$0xff]  ;;  %v4160_v53 = vld [vmem:[%s6723_s1 + $0x58] sm:$0xff] }
  0x28   : > { %v2756_v45 = vld [vmem:[%s6706_s12 + $0xc8] sm:$0xff]  ;;  %v498_v54 = vld [vmem:[%s6723_s1 + $0x18] sm:$0xff]  ;;  %v2753_v56 = vld [vmem:[%s6706_s12 + $0xb0] sm:$0xff] }
  0x29   : > { %v2740_v46 = vld [vmem:[%s6706_s12 + $0x48] sm:$0xff]  ;;  %v1739_v55 = vld [vmem:[%s6703_s9 + $0x38] sm:$0xff]  ;;  %v2737_v57 = vld [vmem:[%s6706_s12 + $0x30] sm:$0xff] }
  0x2a   : > { %4167 = vmatmul.msk.f32.gmra.mxu1 %vm504_vm0, %v494_v9  ;;  %v2752_v52 = vld [vmem:[%s6706_s12 + $0xa8] sm:$0xff]  ;;  %v4161_v58 = vld [vmem:[%s6723_s1 + $0x60] sm:$0xff]  ;;  %v2738_v61 = vld [vmem:[%s6706_s12 + $0x38] sm:$0xff] }
  0x2b   : > { %4156 = vmatmul.msk.f32.gmra.mxu0 %vm504_vm0, %v494_v9  ;;  %846 = vperm.xlu0 %4658, %v812_v10   ;;  %v499_v59 = vld [vmem:[%s6723_s1 + $0x20] sm:$0xff]  ;;  %v2760_v60 = vld [vmem:[%s6706_s12 + $0xe8] sm:$0xff]  ;;  %v2749_v62 = vld [vmem:[%s6706_s12 + $0x90] sm:$0xff] }
  0x2c   : > { %851 = vperm.xlu1 %4659, %v813_v11   ;;  %v4162_v63 = vld [vmem:[%s6723_s1 + $0x68] sm:$0xff]  ;;  %v2745_v1 = vld [vmem:[%s6706_s12 + $0x70] sm:$0xff]  ;;  %v2750_v2 = vld [vmem:[%s6706_s12 + $0x98] sm:$0xff] }
  0x2d   : > { %v500_v0 = vld [vmem:[%s6723_s1 + $0x28] sm:$0xff]  ;;  %v2734_v3 = vld [vmem:[%s6706_s12 + $0x18] sm:$0xff]  ;;  %v4163_v4 = vld [vmem:[%s6723_s1 + $0x70] sm:$0xff] }
  0x2e   : > { %v501_v5 = vld [vmem:[%s6723_s1 + $0x30] sm:$0xff]  ;;  %v2735_v7 = vld [vmem:[%s6706_s12 + $0x20] sm:$0xff]  ;;  %v2732_v8 = vld [vmem:[%s6706_s12 + $0x8] sm:$0xff] }
  0x2f   : > { %1278 = vperm.xlu2 %4660, %v1268_v26   ;;  %v502_v10 = vld [vmem:[%s6723_s1 + $0x38] sm:$0xff]  ;;  %v2748_v23 = vld [vmem:[%s6706_s12 + $0x88] sm:$0xff]  ;;  %v4190_v26 = vld [vmem:[%s6723_s1 + $0xb0] sm:$0xff] }
  0x30   : > { %v2742_v11 = vld [vmem:[%s6706_s12 + $0x58] sm:$0xff] }
  0x31   : > { %v4187_v20 = vld [vmem:[%s6723_s1 + $0x98] sm:$0xff] }
  0x33   : > { %4193 = vmatmul.msk.f32.vlgmr.msrb.gmra.mxu0 %vm504_vm0, %v493_v6  ;;  %1283 = vperm.xlu0 %4658, %v1269_v12   ;;  %v2757_v6 = vld [vmem:[%s6706_s12 + $0xd0] sm:$0xff]  ;;  %v2747_v12 = vld [vmem:[%s6706_s12 + $0x80] sm:$0xff] }
  0x34   : > { %1288 = vperm.xlu1 %4659, %v1270_v13   ;;  %v4184_v13 = vld [vmem:[%s6723_s1 + $0x80] sm:$0xff] }
  0x37   : > { %1293 = vperm.xlu2 %4660, %v1271_v31  }
  0x3b   : > { %4194 = vmatmul.msk.f32.gmra.mxu0 %vm504_vm0, %v494_v9  ;;  %1298 = vperm.xlu0 %4658, %v1272_v14   ;;  %v4164_v9 = vld [vmem:[%s6723_s1 + $0x78] sm:$0xff] }
  0x3c   : > { %1303 = vperm.xlu1 %4659, %v1273_v15   ;;  %v2754_v14 = vld [vmem:[%s6706_s12 + $0xb8] sm:$0xff]  ;;  %v2731_v15 = vld [vmem:[%s6706_s12] sm:$0xff] }
  0x3f   : > { %1308 = vperm.xlu2 %4660, %v1274_v38  }
  0x43   : > { %1313 = vperm.xlu0 %4658, %v1275_v16   ;;  %v4185_v16 = vld [vmem:[%s6723_s1 + $0x88] sm:$0xff] }
  0x44   : > { %1742 = vperm.xlu1 %4659, %v1732_v18   ;;  %v4186_v18 = vld [vmem:[%s6723_s1 + $0x90] sm:$0xff] }
  0x47   : > { %1747 = vperm.xlu2 %4660, %v1733_v44  }
  0x4b   : > { %1752 = vperm.xlu0 %4658, %v1734_v17   ;;  %v2739_v17 = vld [vmem:[%s6706_s12 + $0x40] sm:$0xff] }
  0x4c   : > { %1757 = vperm.xlu1 %4659, %v1735_v21   ;;  %v2736_v21 = vld [vmem:[%s6706_s12 + $0x28] sm:$0xff] }
  0x4f   : > { %1762 = vperm.xlu2 %4660, %v1736_v50  }
  0x53   : > { %1767 = vperm.xlu0 %4658, %v1737_v19   ;;  %v2751_v19 = vld [vmem:[%s6706_s12 + $0xa0] sm:$0xff] }
  0x54   : > { %1772 = vperm.xlu1 %4659, %v1738_v24   ;;  %v4189_v24 = vld [vmem:[%s6723_s1 + $0xa8] sm:$0xff] }
  0x57   : > { %1777 = vperm.xlu2 %4660, %v1739_v55  }
  0x5b   : > { %2920 = vperm.xlu0 %4658, %v2762_v22   ;;  %v4188_v22 = vld [vmem:[%s6723_s1 + $0xa0] sm:$0xff] }
  0x5c   : > { %2915 = vperm.xlu1 %4659, %v2761_v27   ;;  %v4191_v27 = vld [vmem:[%s6723_s1 + $0xb8] sm:$0xff]  ;;  %s4677_s1 = scalar_lea.hbm %s4676_s26, 512 }
  0x5d   : > { %p4678_p11 = scmp.ne.s32.totalorder %s4676_s26, %s4677_s1  ;;  %p4683_p1 = scmp.lt.s32.totalorder %s4681_s0, %s4677_s1 }
  0x5f   : > { %2910 = vperm.xlu2 %4660, %v2760_v60   ;;  %p4679_p12 = pnand %p4678_p11, %p4846_p5  ;;  %p4684_p2 = por %p4683_p1, %p4682_p0 }
  0x61   : > { %p4680_p13 = pneg %p4679_p12 }
  0x63   : > { %2840 = vperm.xlu0 %4658, %v2746_v25   ;;  %v2733_v25 = vld [vmem:[%s6706_s12 + $0x10] sm:$0xff]  ;;  %p4685_p3 = pnand %p4684_p2, %p4680_p13 }
  0x64   : > { %2905 = vperm.xlu1 %4659, %v2759_v32  }
  0x67   : > { %2835 = vperm.xlu2 %4660, %v2745_v1  }
  0x6b   : > { %2900 = vperm.xlu0 %4658, %v2758_v28  }
  0x6c   : > { %2830 = vperm.xlu1 %4659, %v2744_v39  }
  0x6f   : > { %2895 = vperm.xlu2 %4660, %v2757_v6  }
  0x73   : > { %2825 = vperm.xlu0 %4658, %v2743_v33   ;;  %v894_v33 = vld [vmem:[%s6699_s5] sm:$0xff] }
  0x74   : > { %2890 = vperm.xlu1 %4659, %v2756_v45   ;;  %934 = vmatpush.msra.mxu0 %v894_v33 }
  0x77   : > { %2820 = vperm.xlu2 %4660, %v2742_v11   ;;  %v4252_v11 = vld [vmem:[%s6699_s5 + $0x10] sm:$0xff] }
  0x78   : > { %1169 = vmatpush.msrb.mxu0 %v4252_v11  ;;  %v4245_v11 = vld [vmem:[%s6698_s4 + $0x88] sm:$0xff] }
  0x79   : > { %v837_v6 = vpop.permute.xlu2 %836 }
  0x7b   : > { %2885 = vperm.xlu0 %4658, %v2755_v40  }
  0x7c   : > { %2815 = vperm.xlu1 %4659, %v2741_v51  }
  0x7f   : > { %2880 = vperm.xlu2 %4660, %v2754_v14  }
  0x83   : > { %2810 = vperm.xlu0 %4658, %v2740_v46  }
  0x84   : > { %2875 = vperm.xlu1 %4659, %v2753_v56  }
  0x87   : > { %2805 = vperm.xlu2 %4660, %v2739_v17  }
  0x8b   : > { %2870 = vperm.xlu0 %4658, %v2752_v52  }
  0x8c   : > { %2800 = vperm.xlu1 %4659, %v2738_v61  }
  0x8f   : > { %2865 = vperm.xlu2 %4660, %v2751_v19   ;;  %v842_v19 = vpop.permute.xlu2 %841 }
  0x93   : > { %2795 = vperm.xlu0 %4658, %v2737_v57   ;;  %v827_v57 = vpop.permute.xlu1 %826 }
  0x94   : > { %2860 = vperm.xlu1 %4659, %v2750_v2  }
  0x97   : > { %2790 = vperm.xlu2 %4660, %v2736_v21  }
  0x9b   : > { %2855 = vperm.xlu0 %4658, %v2749_v62  }
  0x9c   : > { %2785 = vperm.xlu1 %4659, %v2735_v7  }
  0x9f   : > { %v562_v30 = vpop.f32.mrf.mxu1  ;;  %2850 = vperm.xlu2 %4660, %v2748_v23  }
  0xa0   : > { %v528_v29 = vpop.f32.mrf.mxu0 }
  0xa3   : > { %2780 = vperm.xlu0 %4658, %v2734_v3   ;;  %v832_v3 = vpop.permute.xlu1 %831 }
  0xa4   : > { %2845 = vperm.xlu1 %4659, %v2747_v12  }
  0xa7   : > { %v565_v35 = vpop.f32.mrf.mxu1  ;;  %2775 = vperm.xlu2 %4660, %v2733_v25  }
  0xa8   : > { %v531_v34 = vpop.f32.mrf.mxu0  ;;  %607 = vmatpush.msra.mxu2 %v565_v35 }
  0xa9   : > { %672 = vmatpush.msra.mxu3 %v531_v34  ;;  %v4219_v34 = vld [vmem:[%s6699_s5 + $0x8] sm:$0xff] }
  0xaa   : > { %608 = vmatpush.msra.mxu2 %v562_v30 }
  0xab   : > { %673 = vmatpush.msra.mxu3 %v528_v29  ;;  %4168 = vmatmul.msk.f32.vlgmr.msra.gmra.mxu2 %vm568_vm1, %v4157_v36 }
  0xac   : > { %4176 = vmatmul.msk.f32.vlgmr.msra.gmra.mxu3 %vm568_vm1, %v495_v37  ;;  %2770 = vperm.xlu0 %4658, %v2732_v8  }
  0xad   : > { %2765 = vperm.xlu1 %4659, %v2731_v15  }
  0xb0   : > { %v727_v43 = vpop.f32.mrf.mxu0 }
  0xb3   : > { %4169 = vmatmul.msk.f32.gmra.mxu2 %vm568_vm1, %v4158_v41  ;;  %v817_v41 = vpop.permute.xlu0 %816 }
  0xb4   : > { %4177 = vmatmul.msk.f32.gmra.mxu3 %vm568_vm1, %v496_v42 }
  0xb8   : > { %v730_v49 = vpop.f32.mrf.mxu0 }
  0xb9   : > { %771 = vmatpush.msrb.mxu2 %v730_v49 }
  0xbb   : > { %4170 = vmatmul.msk.f32.gmra.mxu2 %vm568_vm1, %v4159_v47  ;;  %v822_v51 = vpop.permute.xlu0 %821 }
  0xbc   : > { %4178 = vmatmul.msk.f32.gmra.mxu3 %vm568_vm1, %v497_v48  ;;  %772 = vmatpush.msrb.mxu2 %v727_v43 }
  0xbe   : > { %986 = vmatpush.msra.mxu2 %v4219_v34 }
  0xc3   : > { %4171 = vmatmul.msk.f32.gmra.mxu2 %vm568_vm1, %v4160_v53 }
  0xc4   : > { %4179 = vmatmul.msk.f32.gmra.mxu3 %vm568_vm1, %v498_v54 }
  0xcb   : > { %4172 = vmatmul.msk.f32.gmra.mxu2 %vm568_vm1, %v4161_v58 }
  0xcc   : > { %4180 = vmatmul.msk.f32.gmra.mxu3 %vm568_vm1, %v499_v59 }
  0xd3   : > { %4173 = vmatmul.msk.f32.gmra.mxu2 %vm568_vm1, %v4162_v63 }
  0xd4   : > { %4181 = vmatmul.msk.f32.gmra.mxu3 %vm568_vm1, %v500_v0 }
  0xdb   : > { %4174 = vmatmul.msk.f32.gmra.mxu2 %vm568_vm1, %v4163_v4 }
  0xdc   : > { %4182 = vmatmul.msk.f32.gmra.mxu3 %vm568_vm1, %v501_v5 }
  0xe3   : > { %4175 = vmatmul.msk.f32.gmra.mxu2 %vm568_vm1, %v4164_v9 }
  0xe4   : > { %4183 = vmatmul.msk.f32.gmra.mxu3 %vm568_vm1, %v502_v10 }
  0xeb   : > { %4195 = vmatmul.msk.f32.vlgmr.msrb.gmra.mxu2 %vm568_vm1, %v4184_v13 }
  0xf3   : > { %4196 = vmatmul.msk.f32.gmra.mxu2 %vm568_vm1, %v4185_v16 }
  0xfb   : > { %4197 = vmatmul.msk.f32.gmra.mxu2 %vm568_vm1, %v4186_v18 }
 0x103   : > { %4198 = vmatmul.msk.f32.gmra.mxu2 %vm568_vm1, %v4187_v20 }
 0x10b   : > { %4199 = vmatmul.msk.f32.gmra.mxu2 %vm568_vm1, %v4188_v22 }
 0x113   : > { %4200 = vmatmul.msk.f32.gmra.mxu2 %vm568_vm1, %v4189_v24 }
 0x11b   : > { %4201 = vmatmul.msk.f32.gmra.mxu2 %vm568_vm1, %v4190_v26 }
 0x123   : > { %4202 = vmatmul.msk.f32.gmra.mxu2 %vm568_vm1, %v4191_v27  ;;  %v847_v27 = vpop.permute.xlu0 %846 }
 0x12e   : > { %v610_v28 = vpop.f32.mrf.mxu2 }
 0x12f   : > { %v675_v36 = vpop.f32.mrf.mxu3 }
 0x130   : > { %v676_v40 = vadd.f32 %v675_v36, %v610_v28 }
 0x136   : > { %v613_v29 = vpop.f32.mrf.mxu2 }
 0x137   : > { %v678_v38 = vpop.f32.mrf.mxu3 }
 0x138   : > { %v679_v47 = vadd.f32 %v678_v38, %v613_v29 }
 0x13e   : > { %v616_v30 = vpop.f32.mrf.mxu2 }
 0x13f   : > { %v681_v44 = vpop.f32.mrf.mxu3 }
 0x140   : > { %v682_v55 = vadd.f32 %v681_v44, %v616_v30 }
 0x146   : > { %v619_v31 = vpop.f32.mrf.mxu2 }
 0x147   : > { %v684_v53 = vpop.f32.mrf.mxu3 }
 0x148   : > { %v685_v63 = vadd.f32 %v684_v53, %v619_v31 }
 0x14e   : > { %v622_v32 = vpop.f32.mrf.mxu2 }
 0x14f   : > { %v687_v62 = vpop.f32.mrf.mxu3 }
 0x150   : > { %v688_v7 = vadd.f32 %v687_v62, %v622_v32  ;;  %v886_v62 = vld [vmem:[%s6698_s4] sm:$0xff] }
 0x156   : > { %v625_v35 = vpop.f32.mrf.mxu2 }
 0x157   : > { %v690_v9 = vpop.f32.mrf.mxu3 }
 0x158   : > { %v691_v15 = vadd.f32 %v690_v9, %v625_v35  ;;  %v852_v35 = vpop.permute.xlu1 %851  ;;  %v890_v9 = vld [vmem:[%s6698_s4 + $0x20] sm:$0xff] }
 0x15e   : > { %v5146_v37 = vpop.f32.mrf.mxu2 }
 0x15f   : > { %v693_v20 = vpop.f32.mrf.mxu3 }
 0x160   : > { %v694_v23 = vadd.f32 %v693_v20, %v5146_v37  ;;  %v4249_v20 = vld [vmem:[%s6698_s4 + $0xa8] sm:$0xff] }
 0x166   : > { %v5148_v39 = vpop.f32.mrf.mxu2 }
 0x167   : > { %v696_v29 = vpop.f32.mrf.mxu3 }
 0x168   : > { %v697_v31 = vadd.f32 %v696_v29, %v5148_v39 }
 0x16e   : > { %v774_v42 = vpop.f32.mrf.mxu2 }
 0x16f   : > { %v798_v43 = vadd.f32 %v774_v42, %v676_v40 }
 0x171   : > { %v854_v45 = vadd.f32 %v817_v41, %v798_v43 }
 0x173   : > { %v870_v46 = vmul.f32 0.2, %v854_v45  ;;  %vm862_vm2 = vcmp.ge.f32.partialorder %v854_v45, 0.0 }
 0x175   : > { %v5150_v48 = vsel %vm862_vm2, %v854_v45, %v870_v46 }
 0x176   : > { %v777_v49 = vpop.f32.mrf.mxu2  ;;  %4203 = vmatmul.msk.f32.vlgmr.msra.gmra.mxu0 %vm504_vm0, %v5150_v48  ;;  %4220 = vmatmul.msk.f32.vlgmr.msra.gmra.mxu2 %vm504_vm0, %v5150_v48 }
 0x177   : > { %v799_v50 = vadd.f32 %v777_v49, %v679_v47 }
 0x179   : > { %v855_v52 = vadd.f32 %v822_v51, %v799_v50 }
 0x17b   : > { %vm863_vm3 = vcmp.ge.f32.partialorder %v855_v52, 0.0  ;;  %v871_v54 = vmul.f32 0.2, %v855_v52 }
 0x17d   : > { %v5156_v56 = vsel %vm863_vm3, %v855_v52, %v871_v54 }
 0x17e   : > { %v780_v58 = vpop.f32.mrf.mxu2  ;;  %4204 = vmatmul.msk.f32.gmra.mxu0 %vm504_vm0, %v5156_v56  ;;  %4221 = vmatmul.msk.f32.gmra.mxu2 %vm504_vm0, %v5156_v56 }
 0x17f   : > { %v800_v59 = vadd.f32 %v780_v58, %v682_v55 }
 0x181   : > { %v856_v60 = vadd.f32 %v827_v57, %v800_v59 }
 0x183   : > { %vm864_vm4 = vcmp.ge.f32.partialorder %v856_v60, 0.0  ;;  %v872_v61 = vmul.f32 0.2, %v856_v60 }
 0x185   : > { %v880_v0 = vsel %vm864_vm4, %v856_v60, %v872_v61  ;;  %v4211_v60 = vld [vmem:[%s6698_s4 + $0x40] sm:$0xff]  ;;  %vm1848_vm4 = vcmask 261120  }
 0x186   : > { %v783_v1 = vpop.f32.mrf.mxu2  ;;  %4205 = vmatmul.msk.f32.gmra.mxu0 %vm504_vm0, %v880_v0  ;;  %4222 = vmatmul.msk.f32.gmra.mxu2 %vm504_vm0, %v880_v0 }
 0x187   : > { %v801_v2 = vadd.f32 %v783_v1, %v685_v63  ;;  %v4212_v63 = vld [vmem:[%s6698_s4 + $0x48] sm:$0xff] }
 0x188   : > { %v887_v1 = vld [vmem:[%s6698_s4 + $0x8] sm:$0xff] }
 0x189   : > { %v857_v4 = vadd.f32 %v832_v3, %v801_v2  ;;  %v4213_v2 = vld [vmem:[%s6698_s4 + $0x50] sm:$0xff] }
 0x18b   : > { %vm865_vm5 = vcmp.ge.f32.partialorder %v857_v4, 0.0  ;;  %v873_v5 = vmul.f32 0.2, %v857_v4 }
 0x18d   : > { %v881_v8 = vsel %vm865_vm5, %v857_v4, %v873_v5  ;;  %v888_v4 = vld [vmem:[%s6698_s4 + $0x10] sm:$0xff]  ;;  %v4214_v5 = vld [vmem:[%s6698_s4 + $0x58] sm:$0xff] }
 0x18e   : > { %v786_v10 = vpop.f32.mrf.mxu2  ;;  %4206 = vmatmul.msk.f32.gmra.mxu0 %vm504_vm0, %v881_v8  ;;  %4223 = vmatmul.msk.f32.gmra.mxu2 %vm504_vm0, %v881_v8 }
 0x18f   : > { %v802_v12 = vadd.f32 %v786_v10, %v688_v7  ;;  %v4215_v7 = vld [vmem:[%s6698_s4 + $0x60] sm:$0xff]  ;;  %v4216_v10 = vld [vmem:[%s6698_s4 + $0x68] sm:$0xff] }
 0x191   : > { %v858_v13 = vadd.f32 %v837_v6, %v802_v12  ;;  %v889_v6 = vld [vmem:[%s6698_s4 + $0x18] sm:$0xff]  ;;  %v891_v12 = vld [vmem:[%s6698_s4 + $0x28] sm:$0xff] }
 0x193   : > { %vm866_vm6 = vcmp.ge.f32.partialorder %v858_v13, 0.0  ;;  %v874_v14 = vmul.f32 0.2, %v858_v13 }
 0x195   : > { %v882_v16 = vsel %vm866_vm6, %v858_v13, %v874_v14  ;;  %v4217_v13 = vld [vmem:[%s6698_s4 + $0x70] sm:$0xff] }
 0x196   : > { %v789_v17 = vpop.f32.mrf.mxu2  ;;  %4207 = vmatmul.msk.f32.gmra.mxu0 %vm504_vm0, %v882_v16  ;;  %4224 = vmatmul.msk.f32.gmra.mxu2 %vm504_vm0, %v882_v16  ;;  %v4246_v14 = vld [vmem:[%s6698_s4 + $0x90] sm:$0xff] }
 0x197   : > { %v803_v18 = vadd.f32 %v789_v17, %v691_v15  ;;  %v892_v15 = vld [vmem:[%s6698_s4 + $0x30] sm:$0xff]  ;;  %v4247_v17 = vld [vmem:[%s6698_s4 + $0x98] sm:$0xff] }
 0x199   : > { %v859_v21 = vadd.f32 %v842_v19, %v803_v18  ;;  %v893_v18 = vld [vmem:[%s6698_s4 + $0x38] sm:$0xff]  ;;  %v4248_v19 = vld [vmem:[%s6698_s4 + $0xa0] sm:$0xff] }
 0x19b   : > { %vm867_vm7 = vcmp.ge.f32.partialorder %v859_v21, 0.0  ;;  %v875_v22 = vmul.f32 0.2, %v859_v21 }
 0x19d   : > { %v883_v24 = vsel %vm867_vm7, %v859_v21, %v875_v22  ;;  %v4250_v21 = vld [vmem:[%s6698_s4 + $0xb0] sm:$0xff]  ;;  %v4251_v22 = vld [vmem:[%s6698_s4 + $0xb8] sm:$0xff] }
 0x19e   : > { %v792_v25 = vpop.f32.mrf.mxu2  ;;  %4208 = vmatmul.msk.f32.gmra.mxu0 %vm504_vm0, %v883_v24  ;;  %4225 = vmatmul.msk.f32.gmra.mxu2 %vm504_vm0, %v883_v24 }
 0x19f   : > { %v804_v26 = vadd.f32 %v792_v25, %v694_v23  ;;  %v1357_v23 = vld [vmem:[%s6702_s8 + $0x8] sm:$0xff]  ;;  %v1356_v25 = vld [vmem:[%s6702_s8] sm:$0xff] }
 0x1a1   : > { %v860_v28 = vadd.f32 %v847_v27, %v804_v26  ;;  %v4285_v26 = vld [vmem:[%s6702_s8 + $0x10] sm:$0xff] }
 0x1a3   : > { %vm868_vm8 = vcmp.ge.f32.partialorder %v860_v28, 0.0  ;;  %v876_v30 = vmul.f32 0.2, %v860_v28 }
 0x1a5   : > { %v884_v32 = vsel %vm868_vm8, %v860_v28, %v876_v30 }
 0x1a6   : > { %v795_v33 = vpop.f32.mrf.mxu2  ;;  %4209 = vmatmul.msk.f32.gmra.mxu0 %vm504_vm0, %v884_v32  ;;  %4226 = vmatmul.msk.f32.gmra.mxu2 %vm504_vm0, %v884_v32 }
 0x1a7   : > { %v805_v34 = vadd.f32 %v795_v33, %v697_v31 }
 0x1a9   : > { %v861_v36 = vadd.f32 %v852_v35, %v805_v34 }
 0x1ab   : > { %vm869_vm9 = vcmp.ge.f32.partialorder %v861_v36, 0.0  ;;  %v877_v37 = vmul.f32 0.2, %v861_v36 }
 0x1ad   : > { %v885_v38 = vsel %vm869_vm9, %v861_v36, %v877_v37  ;;  %v1279_v36 = vpop.permute.xlu2 %1278 }
 0x1ae   : > { %4210 = vmatmul.msk.f32.gmra.mxu0 %vm504_vm0, %v885_v38  ;;  %4227 = vmatmul.msk.f32.gmra.mxu2 %vm504_vm0, %v885_v38 }
 0x1b6   : > { %4253 = vmatmul.msk.f32.vlgmr.msrb.gmra.mxu0 %vm504_vm0, %v5150_v48 }
 0x1be   : > { %4254 = vmatmul.msk.f32.gmra.mxu0 %vm504_vm0, %v5156_v56 }
 0x1c6   : > { %4255 = vmatmul.msk.f32.gmra.mxu0 %vm504_vm0, %v880_v0 }
 0x1ce   : > { %4256 = vmatmul.msk.f32.gmra.mxu0 %vm504_vm0, %v881_v8  ;;  %v4244_v8 = vld [vmem:[%s6698_s4 + $0x80] sm:$0xff] }
 0x1d6   : > { %4257 = vmatmul.msk.f32.gmra.mxu0 %vm504_vm0, %v882_v16  ;;  %v4218_v16 = vld [vmem:[%s6698_s4 + $0x78] sm:$0xff] }
 0x1de   : > { %4258 = vmatmul.msk.f32.gmra.mxu0 %vm504_vm0, %v883_v24  ;;  %v4286_v24 = vld [vmem:[%s6702_s8 + $0x18] sm:$0xff] }
 0x1e6   : > { %4259 = vmatmul.msk.f32.gmra.mxu0 %vm504_vm0, %v884_v32 }
 0x1ee   : > { %4260 = vmatmul.msk.f32.gmra.mxu0 %vm504_vm0, %v885_v38 }
 0x1f3   : > { %v936_v39 = vpop.f32.mrf.mxu0 }
 0x1f9   : > { %v988_v40 = vpop.f32.mrf.mxu2 }
 0x1fb   : > { %v939_v41 = vpop.f32.mrf.mxu0 }
 0x201   : > { %v991_v42 = vpop.f32.mrf.mxu2 }
 0x203   : > { %v942_v43 = vpop.f32.mrf.mxu0 }
 0x209   : > { %v994_v44 = vpop.f32.mrf.mxu2 }
 0x20b   : > { %v945_v45 = vpop.f32.mrf.mxu0 }
 0x211   : > { %v997_v46 = vpop.f32.mrf.mxu2 }
 0x213   : > { %v948_v47 = vpop.f32.mrf.mxu0 }
 0x219   : > { %v1000_v48 = vpop.f32.mrf.mxu2 }
 0x21b   : > { %v951_v49 = vpop.f32.mrf.mxu0 }
 0x221   : > { %v1003_v50 = vpop.f32.mrf.mxu2 }
 0x223   : > { %v954_v51 = vpop.f32.mrf.mxu0 }
 0x229   : > { %v1006_v52 = vpop.f32.mrf.mxu2 }
 0x22b   : > { %v957_v53 = vpop.f32.mrf.mxu0 }
 0x22c   : > { %1110 = vmatpush.msrb.mxu1 %v957_v53 }
 0x22e   : > { %1111 = vmatpush.msrb.mxu1 %v954_v51 }
 0x230   : > { %1112 = vmatpush.msrb.mxu1 %v951_v49 }
 0x231   : > { %v1009_v54 = vpop.f32.mrf.mxu2 }
 0x232   : > { %1045 = vmatpush.msrb.mxu3 %v1009_v54  ;;  %1113 = vmatpush.msrb.mxu1 %v948_v47 }
 0x233   : > { %v1171_v55 = vpop.f32.mrf.mxu0 }
 0x234   : > { %1046 = vmatpush.msrb.mxu3 %v1006_v52  ;;  %1114 = vmatpush.msrb.mxu1 %v945_v45  ;;  %v1289_v52 = vpop.permute.xlu1 %1288 }
 0x236   : > { %1047 = vmatpush.msrb.mxu3 %v1003_v50  ;;  %1115 = vmatpush.msrb.mxu1 %v942_v43 }
 0x238   : > { %1048 = vmatpush.msrb.mxu3 %v1000_v48  ;;  %1116 = vmatpush.msrb.mxu1 %v939_v41 }
 0x23a   : > { %1049 = vmatpush.msrb.mxu3 %v997_v46  ;;  %1117 = vmatpush.msrb.mxu1 %v936_v39 }
 0x23b   : > { %v1174_v56 = vpop.f32.mrf.mxu0  ;;  %4236 = vmatmul.msk.f32.vlgmr.msrb.gmra.mxu1 %vm1012_vm10, %v886_v62 }
 0x23c   : > { %1050 = vmatpush.msrb.mxu3 %v994_v44  ;;  %1449 = vmatpush.msra.mxu1 %v4286_v24  ;;  %v1284_v44 = vpop.permute.xlu0 %1283 }
 0x23e   : > { %1051 = vmatpush.msrb.mxu3 %v991_v42  ;;  %1450 = vmatpush.msra.mxu1 %v4285_v26 }
 0x240   : > { %1052 = vmatpush.msrb.mxu3 %v988_v40 }
 0x241   : > { %4228 = vmatmul.msk.f32.vlgmr.msrb.gmra.mxu3 %vm1012_vm10, %v4211_v60 }
 0x242   : > { %1396 = vmatpush.msra.mxu3 %v1357_v23 }
 0x243   : > { %v1177_v57 = vpop.f32.mrf.mxu0  ;;  %4237 = vmatmul.msk.f32.gmra.mxu1 %vm1012_vm10, %v887_v1 }
 0x244   : > { %1397 = vmatpush.msra.mxu3 %v1356_v25 }
 0x249   : > { %4229 = vmatmul.msk.f32.gmra.mxu3 %vm1012_vm10, %v4212_v63 }
 0x24b   : > { %v1180_v58 = vpop.f32.mrf.mxu0  ;;  %4238 = vmatmul.msk.f32.gmra.mxu1 %vm1012_vm10, %v888_v4 }
 0x251   : > { %4230 = vmatmul.msk.f32.gmra.mxu3 %vm1012_vm10, %v4213_v2 }
 0x253   : > { %v1183_v59 = vpop.f32.mrf.mxu0  ;;  %4239 = vmatmul.msk.f32.gmra.mxu1 %vm1012_vm10, %v889_v6  ;;  %v4319_v6 = vld [vmem:[%s6702_s8 + $0x20] sm:$0xff] }
 0x259   : > { %4231 = vmatmul.msk.f32.gmra.mxu3 %vm1012_vm10, %v4214_v5  ;;  %v4320_v5 = vld [vmem:[%s6702_s8 + $0x28] sm:$0xff] }
 0x25a   : > { %1632 = vmatpush.msrb.mxu3 %v4320_v5  ;;  %v1352_v5 = vld [vmem:[%s6701_s7 + $0x20] sm:$0xff] }
 0x25b   : > { %v1186_v61 = vpop.f32.mrf.mxu0  ;;  %4240 = vmatmul.msk.f32.gmra.mxu1 %vm1012_vm10, %v890_v9 }
 0x25c   : > { %1633 = vmatpush.msrb.mxu3 %v4319_v6  ;;  %v4281_v6 = vld [vmem:[%s6701_s7 + $0x60] sm:$0xff] }
 0x261   : > { %4232 = vmatmul.msk.f32.gmra.mxu3 %vm1012_vm10, %v4215_v7 }
 0x263   : > { %v1189_v0 = vpop.f32.mrf.mxu0  ;;  %4241 = vmatmul.msk.f32.gmra.mxu1 %vm1012_vm10, %v891_v12 }
 0x269   : > { %4233 = vmatmul.msk.f32.gmra.mxu3 %vm1012_vm10, %v4216_v10 }
 0x26b   : > { %v1192_v3 = vpop.f32.mrf.mxu0  ;;  %4242 = vmatmul.msk.f32.gmra.mxu1 %vm1012_vm10, %v892_v15 }
 0x26c   : > { %1227 = vmatpush.msrb.mxu2 %v1192_v3 }
 0x26e   : > { %1228 = vmatpush.msrb.mxu2 %v1189_v0 }
 0x270   : > { %1229 = vmatpush.msrb.mxu2 %v1186_v61  ;;  %v1294_v61 = vpop.permute.xlu2 %1293 }
 0x271   : > { %4234 = vmatmul.msk.f32.gmra.mxu3 %vm1012_vm10, %v4217_v13 }
 0x272   : > { %1230 = vmatpush.msrb.mxu2 %v1183_v59 }
 0x273   : > { %4243 = vmatmul.msk.f32.gmra.mxu1 %vm1012_vm10, %v893_v18 }
 0x274   : > { %1231 = vmatpush.msrb.mxu2 %v1180_v58 }
 0x276   : > { %1232 = vmatpush.msrb.mxu2 %v1177_v57 }
 0x278   : > { %1233 = vmatpush.msrb.mxu2 %v1174_v56  ;;  %v1309_v23 = vpop.permute.xlu2 %1308 }
 0x279   : > { %4235 = vmatmul.msk.f32.gmra.mxu3 %vm1012_vm10, %v4218_v16 }
 0x27a   : > { %1234 = vmatpush.msrb.mxu2 %v1171_v55 }
 0x27b   : > { %4261 = vmatmul.msk.f32.vlgmr.msrb.gmra.mxu2 %vm1012_vm10, %v4244_v8  ;;  %v1299_v8 = vpop.permute.xlu0 %1298 }
 0x283   : > { %4262 = vmatmul.msk.f32.gmra.mxu2 %vm1012_vm10, %v4245_v11 }
 0x28b   : > { %4263 = vmatmul.msk.f32.gmra.mxu2 %vm1012_vm10, %v4246_v14 }
 0x293   : > { %4264 = vmatmul.msk.f32.gmra.mxu2 %vm1012_vm10, %v4247_v17  ;;  %v1304_v17 = vpop.permute.xlu1 %1303 }
 0x29b   : > { %4265 = vmatmul.msk.f32.gmra.mxu2 %vm1012_vm10, %v4248_v19 }
 0x2a3   : > { %4266 = vmatmul.msk.f32.gmra.mxu2 %vm1012_vm10, %v4249_v20 }
 0x2ab   : > { %4267 = vmatmul.msk.f32.gmra.mxu2 %vm1012_vm10, %v4250_v21 }
 0x2b3   : > { %4268 = vmatmul.msk.f32.gmra.mxu2 %vm1012_vm10, %v4251_v22 }
 0x2b8   : > { %v1119_v27 = vpop.f32.mrf.mxu1 }
 0x2c0   : > { %v1122_v29 = vpop.f32.mrf.mxu1 }
 0x2c4   : > { %v1054_v28 = vpop.f32.mrf.mxu3 }
 0x2c5   : > { %v1120_v31 = vadd.f32 %v1119_v27, %v1054_v28 }
 0x2c8   : > { %v1125_v32 = vpop.f32.mrf.mxu1 }
 0x2cc   : > { %v1057_v30 = vpop.f32.mrf.mxu3 }
 0x2cd   : > { %v1123_v39 = vadd.f32 %v1122_v29, %v1057_v30 }
 0x2d0   : > { %v1128_v43 = vpop.f32.mrf.mxu1 }
 0x2d4   : > { %v1060_v34 = vpop.f32.mrf.mxu3 }
 0x2d5   : > { %v1126_v47 = vadd.f32 %v1125_v32, %v1060_v34 }
 0x2d8   : > { %v1131_v54 = vpop.f32.mrf.mxu1 }
 0x2dc   : > { %v1063_v45 = vpop.f32.mrf.mxu3 }
 0x2dd   : > { %v1129_v56 = vadd.f32 %v1128_v43, %v1063_v45 }
 0x2e0   : > { %v1134_v1 = vpop.f32.mrf.mxu1 }
 0x2e4   : > { %v1066_v55 = vpop.f32.mrf.mxu3 }
 0x2e5   : > { %v1132_v63 = vadd.f32 %v1131_v54, %v1066_v55 }
 0x2e8   : > { %v1137_v13 = vpop.f32.mrf.mxu1 }
 0x2ec   : > { %v1069_v2 = vpop.f32.mrf.mxu3 }
 0x2ed   : > { %v1135_v10 = vadd.f32 %v1134_v1, %v1069_v2  ;;  %v4279_v1 = vld [vmem:[%s6701_s7 + $0x50] sm:$0xff]  ;;  %v1351_v2 = vld [vmem:[%s6701_s7 + $0x18] sm:$0xff] }
 0x2f0   : > { %v1140_v26 = vpop.f32.mrf.mxu1 }
 0x2f4   : > { %v1072_v15 = vpop.f32.mrf.mxu3 }
 0x2f5   : > { %v1138_v19 = vadd.f32 %v1137_v13, %v1072_v15  ;;  %v4313_v13 = vld [vmem:[%s6701_s7 + $0x90] sm:$0xff]  ;;  %v4284_v15 = vld [vmem:[%s6701_s7 + $0x78] sm:$0xff] }
 0x2fc   : > { %v1075_v25 = vpop.f32.mrf.mxu3 }
 0x2fd   : > { %v1141_v28 = vadd.f32 %v1140_v26, %v1075_v25  ;;  %v1845_v25 = vld [vmem:[%s6705_s11 + $0x8] sm:$0xff] }
 0x2fe   : > { %v1236_v33 = vpop.f32.mrf.mxu2  ;;  %v4378_v26 = vld [vmem:[%s6705_s11 + $0x28] sm:$0xff] }
 0x2ff   : > { %v1260_v35 = vadd.f32 %v1236_v33, %v1120_v31  ;;  %v1314_v33 = vpop.permute.xlu0 %1313 }
 0x301   : > { %v1316_v37 = vadd.f32 %v1279_v36, %v1260_v35 }
 0x303   : > { %v1332_v38 = vmul.f32 0.2, %v1316_v37  ;;  %vm1324_vm11 = vcmp.ge.f32.partialorder %v1316_v37, 0.0 }
 0x305   : > { %v5297_v40 = vsel %vm1324_vm11, %v1316_v37, %v1332_v38 }
 0x306   : > { %v1239_v41 = vpop.f32.mrf.mxu2  ;;  %4269 = vmatmul.msk.f32.vlgmr.msra.gmra.mxu3 %vm568_vm1, %v5297_v40  ;;  %4287 = vmatmul.msk.f32.vlgmr.msra.gmra.mxu1 %vm568_vm1, %v5297_v40 }
 0x307   : > { %v1261_v42 = vadd.f32 %v1239_v41, %v1123_v39 }
 0x309   : > { %v1317_v46 = vadd.f32 %v1284_v44, %v1261_v42 }
 0x30b   : > { %vm1325_vm12 = vcmp.ge.f32.partialorder %v1317_v46, 0.0  ;;  %v1333_v48 = vmul.f32 0.2, %v1317_v46 }
 0x30d   : > { %v5303_v49 = vsel %vm1325_vm12, %v1317_v46, %v1333_v48 }
 0x30e   : > { %v1242_v50 = vpop.f32.mrf.mxu2  ;;  %4270 = vmatmul.msk.f32.gmra.mxu3 %vm568_vm1, %v5303_v49  ;;  %4288 = vmatmul.msk.f32.gmra.mxu1 %vm568_vm1, %v5303_v49 }
 0x30f   : > { %v1262_v51 = vadd.f32 %v1242_v50, %v1126_v47 }
 0x311   : > { %v1318_v53 = vadd.f32 %v1289_v52, %v1262_v51 }
 0x313   : > { %vm1326_vm13 = vcmp.ge.f32.partialorder %v1318_v53, 0.0  ;;  %v1334_v57 = vmul.f32 0.2, %v1318_v53 }
 0x315   : > { %v5309_v58 = vsel %vm1326_vm13, %v1318_v53, %v1334_v57  ;;  %v1348_v57 = vld [vmem:[%s6701_s7] sm:$0xff] }
 0x316   : > { %v1245_v59 = vpop.f32.mrf.mxu2  ;;  %4271 = vmatmul.msk.f32.gmra.mxu3 %vm568_vm1, %v5309_v58  ;;  %4289 = vmatmul.msk.f32.gmra.mxu1 %vm568_vm1, %v5309_v58 }
 0x317   : > { %v1263_v60 = vadd.f32 %v1245_v59, %v1129_v56  ;;  %v4277_v59 = vld [vmem:[%s6701_s7 + $0x40] sm:$0xff] }
 0x319   : > { %v1319_v62 = vadd.f32 %v1294_v61, %v1263_v60  ;;  %v1349_v60 = vld [vmem:[%s6701_s7 + $0x8] sm:$0xff] }
 0x31b   : > { %vm1327_vm14 = vcmp.ge.f32.partialorder %v1319_v62, 0.0  ;;  %v1335_v0 = vmul.f32 0.2, %v1319_v62 }
 0x31d   : > { %v1343_v3 = vsel %vm1327_vm14, %v1319_v62, %v1335_v0  ;;  %v4278_v62 = vld [vmem:[%s6701_s7 + $0x48] sm:$0xff] }
 0x31e   : > { %v1248_v4 = vpop.f32.mrf.mxu2  ;;  %4272 = vmatmul.msk.f32.gmra.mxu3 %vm568_vm1, %v1343_v3  ;;  %4290 = vmatmul.msk.f32.gmra.mxu1 %vm568_vm1, %v1343_v3 }
 0x31f   : > { %v1264_v7 = vadd.f32 %v1248_v4, %v1132_v63  ;;  %v1350_v63 = vld [vmem:[%s6701_s7 + $0x10] sm:$0xff]  ;;  %v4280_v4 = vld [vmem:[%s6701_s7 + $0x58] sm:$0xff] }
 0x321   : > { %v1320_v9 = vadd.f32 %v1299_v8, %v1264_v7  ;;  %v4311_v7 = vld [vmem:[%s6701_s7 + $0x80] sm:$0xff]  ;;  %v1353_v8 = vld [vmem:[%s6701_s7 + $0x28] sm:$0xff] }
 0x323   : > { %vm1328_vm15 = vcmp.ge.f32.partialorder %v1320_v9, 0.0  ;;  %v1336_v11 = vmul.f32 0.2, %v1320_v9 }
 0x325   : > { %v1344_v12 = vsel %vm1328_vm15, %v1320_v9, %v1336_v11  ;;  %v4282_v9 = vld [vmem:[%s6701_s7 + $0x68] sm:$0xff]  ;;  %v1354_v11 = vld [vmem:[%s6701_s7 + $0x30] sm:$0xff] }
 0x326   : > { %v1251_v14 = vpop.f32.mrf.mxu2  ;;  %4273 = vmatmul.msk.f32.gmra.mxu3 %vm568_vm1, %v1344_v12  ;;  %4291 = vmatmul.msk.f32.gmra.mxu1 %vm568_vm1, %v1344_v12 }
 0x327   : > { %v1265_v16 = vadd.f32 %v1251_v14, %v1135_v10  ;;  %v4312_v10 = vld [vmem:[%s6701_s7 + $0x88] sm:$0xff]  ;;  %v1355_v14 = vld [vmem:[%s6701_s7 + $0x38] sm:$0xff] }
 0x329   : > { %v1321_v18 = vadd.f32 %v1304_v17, %v1265_v16  ;;  %v4314_v16 = vld [vmem:[%s6701_s7 + $0x98] sm:$0xff]  ;;  %v4315_v17 = vld [vmem:[%s6701_s7 + $0xa0] sm:$0xff] }
 0x32b   : > { %vm1329_vm0 = vcmp.ge.f32.partialorder %v1321_v18, 0.0  ;;  %v1337_v20 = vmul.f32 0.2, %v1321_v18 }
 0x32d   : > { %v1345_v21 = vsel %vm1329_vm0, %v1321_v18, %v1337_v20  ;;  %v4316_v18 = vld [vmem:[%s6701_s7 + $0xa8] sm:$0xff]  ;;  %v4318_v20 = vld [vmem:[%s6701_s7 + $0xb8] sm:$0xff] }
 0x32e   : > { %v1254_v22 = vpop.f32.mrf.mxu2  ;;  %4274 = vmatmul.msk.f32.gmra.mxu3 %vm568_vm1, %v1345_v21  ;;  %4292 = vmatmul.msk.f32.gmra.mxu1 %vm568_vm1, %v1345_v21 }
 0x32f   : > { %v1266_v24 = vadd.f32 %v1254_v22, %v1138_v19  ;;  %v4317_v19 = vld [vmem:[%s6701_s7 + $0xb0] sm:$0xff]  ;;  %v4380_v22 = vld [vmem:[%s6705_s11 + $0x38] sm:$0xff] }
 0x331   : > { %v1322_v27 = vadd.f32 %v1309_v23, %v1266_v24  ;;  %v1846_v23 = vld [vmem:[%s6705_s11 + $0x10] sm:$0xff] }
 0x332   : > { %v4379_v24 = vld [vmem:[%s6705_s11 + $0x30] sm:$0xff] }
 0x333   : > { %vm1330_vm2 = vcmp.ge.f32.partialorder %v1322_v27, 0.0  ;;  %v1338_v29 = vmul.f32 0.2, %v1322_v27 }
 0x335   : > { %v1346_v30 = vsel %vm1330_vm2, %v1322_v27, %v1338_v29  ;;  %v1844_v27 = vld [vmem:[%s6705_s11] sm:$0xff] }
 0x336   : > { %v1257_v31 = vpop.f32.mrf.mxu2  ;;  %4275 = vmatmul.msk.f32.gmra.mxu3 %vm568_vm1, %v1346_v30  ;;  %4293 = vmatmul.msk.f32.gmra.mxu1 %vm568_vm1, %v1346_v30 }
 0x337   : > { %v1267_v32 = vadd.f32 %v1257_v31, %v1141_v28  ;;  %v4377_v28 = vld [vmem:[%s6705_s11 + $0x20] sm:$0xff] }
 0x339   : > { %v1323_v34 = vadd.f32 %v1314_v33, %v1267_v32 }
 0x33b   : > { %vm1331_vm3 = vcmp.ge.f32.partialorder %v1323_v34, 0.0  ;;  %v1339_v35 = vmul.f32 0.2, %v1323_v34 }
 0x33d   : > { %v1347_v36 = vsel %vm1331_vm3, %v1323_v34, %v1339_v35 }
 0x33e   : > { %4276 = vmatmul.msk.f32.gmra.mxu3 %vm568_vm1, %v1347_v36  ;;  %4294 = vmatmul.msk.f32.gmra.mxu1 %vm568_vm1, %v1347_v36 }
 0x346   : > { %4321 = vmatmul.msk.f32.vlgmr.msrb.gmra.mxu3 %vm568_vm1, %v5297_v40 }
 0x34e   : > { %4322 = vmatmul.msk.f32.gmra.mxu3 %vm568_vm1, %v5303_v49 }
 0x356   : > { %4323 = vmatmul.msk.f32.gmra.mxu3 %vm568_vm1, %v5309_v58 }
 0x35e   : > { %4324 = vmatmul.msk.f32.gmra.mxu3 %vm568_vm1, %v1343_v3 }
 0x366   : > { %4325 = vmatmul.msk.f32.gmra.mxu3 %vm568_vm1, %v1344_v12  ;;  %v4283_v12 = vld [vmem:[%s6701_s7 + $0x70] sm:$0xff] }
 0x36e   : > { %4326 = vmatmul.msk.f32.gmra.mxu3 %vm568_vm1, %v1345_v21  ;;  %v1847_v21 = vld [vmem:[%s6705_s11 + $0x18] sm:$0xff] }
 0x376   : > { %4327 = vmatmul.msk.f32.gmra.mxu3 %vm568_vm1, %v1346_v30 }
 0x37e   : > { %4328 = vmatmul.msk.f32.gmra.mxu3 %vm568_vm1, %v1347_v36 }
 0x383   : > { %v1452_v37 = vpop.f32.mrf.mxu1 }
 0x389   : > { %v1399_v38 = vpop.f32.mrf.mxu3 }
 0x38b   : > { %v1455_v39 = vpop.f32.mrf.mxu1 }
 0x391   : > { %v1402_v40 = vpop.f32.mrf.mxu3 }
 0x393   : > { %v1458_v41 = vpop.f32.mrf.mxu1 }
 0x399   : > { %v1405_v42 = vpop.f32.mrf.mxu3 }
 0x39b   : > { %v1461_v43 = vpop.f32.mrf.mxu1 }
 0x3a1   : > { %v1408_v44 = vpop.f32.mrf.mxu3 }
 0x3a3   : > { %v1464_v45 = vpop.f32.mrf.mxu1 }
 0x3a9   : > { %v1411_v46 = vpop.f32.mrf.mxu3 }
 0x3ab   : > { %v1467_v47 = vpop.f32.mrf.mxu1 }
 0x3b1   : > { %v1414_v48 = vpop.f32.mrf.mxu3 }
 0x3b3   : > { %v1470_v49 = vpop.f32.mrf.mxu1 }
 0x3b9   : > { %v1417_v50 = vpop.f32.mrf.mxu3 }
 0x3bb   : > { %v1473_v51 = vpop.f32.mrf.mxu1 }
 0x3bc   : > { %1508 = vmatpush.msra.mxu0 %v1473_v51 }
 0x3be   : > { %1509 = vmatpush.msra.mxu0 %v1470_v49 }
 0x3c0   : > { %1510 = vmatpush.msra.mxu0 %v1467_v47 }
 0x3c1   : > { %v1420_v52 = vpop.f32.mrf.mxu3 }
 0x3c2   : > { %1511 = vmatpush.msra.mxu0 %v1464_v45  ;;  %1573 = vmatpush.msra.mxu2 %v1420_v52 }
 0x3c4   : > { %1512 = vmatpush.msra.mxu0 %v1461_v43  ;;  %1574 = vmatpush.msra.mxu2 %v1417_v50 }
 0x3c6   : > { %1513 = vmatpush.msra.mxu0 %v1458_v41  ;;  %1575 = vmatpush.msra.mxu2 %v1414_v48 }
 0x3c8   : > { %1514 = vmatpush.msra.mxu0 %v1455_v39  ;;  %1576 = vmatpush.msra.mxu2 %v1411_v46  ;;  %v1748_v46 = vpop.permute.xlu2 %1747 }
 0x3c9   : > { %v1635_v53 = vpop.f32.mrf.mxu3 }
 0x3ca   : > { %1515 = vmatpush.msra.mxu0 %v1452_v37  ;;  %1577 = vmatpush.msra.mxu2 %v1408_v44 }
 0x3cb   : > { %4295 = vmatmul.msk.f32.vlgmr.msra.gmra.mxu0 %vm1012_vm10, %v4277_v59 }
 0x3cc   : > { %1578 = vmatpush.msra.mxu2 %v1405_v42  ;;  %1885 = vmatpush.msrb.mxu0 %v1847_v21 }
 0x3ce   : > { %1579 = vmatpush.msra.mxu2 %v1402_v40  ;;  %1886 = vmatpush.msrb.mxu0 %v1846_v23 }
 0x3d0   : > { %1580 = vmatpush.msra.mxu2 %v1399_v38  ;;  %1887 = vmatpush.msrb.mxu0 %v1845_v25  ;;  %v1743_v38 = vpop.permute.xlu1 %1742 }
 0x3d1   : > { %v1638_v54 = vpop.f32.mrf.mxu3  ;;  %4303 = vmatmul.msk.f32.vlgmr.msra.gmra.mxu2 %vm1012_vm10, %v1348_v57 }
 0x3d2   : > { %1964 = vmatpush.msrb.mxu2 %v4380_v22  ;;  %1888 = vmatpush.msrb.mxu0 %v1844_v27 }
 0x3d3   : > { %4296 = vmatmul.msk.f32.gmra.mxu0 %vm1012_vm10, %v4278_v62 }
 0x3d4   : > { %1965 = vmatpush.msrb.mxu2 %v4379_v24 }
 0x3d6   : > { %1966 = vmatpush.msrb.mxu2 %v4378_v26 }
 0x3d8   : > { %1967 = vmatpush.msrb.mxu2 %v4377_v28 }
 0x3d9   : > { %v1641_v55 = vpop.f32.mrf.mxu3  ;;  %4304 = vmatmul.msk.f32.gmra.mxu2 %vm1012_vm10, %v1349_v60 }
 0x3db   : > { %4297 = vmatmul.msk.f32.gmra.mxu0 %vm1012_vm10, %v4279_v1 }
 0x3e1   : > { %v1644_v56 = vpop.f32.mrf.mxu3  ;;  %4305 = vmatmul.msk.f32.gmra.mxu2 %vm1012_vm10, %v1350_v63  ;;  %v1758_v63 = vpop.permute.xlu1 %1757 }
 0x3e3   : > { %4298 = vmatmul.msk.f32.gmra.mxu0 %vm1012_vm10, %v4280_v4 }
 0x3e9   : > { %v1647_v58 = vpop.f32.mrf.mxu3  ;;  %4306 = vmatmul.msk.f32.gmra.mxu2 %vm1012_vm10, %v1351_v2  ;;  %v1773_v27 = vpop.permute.xlu1 %1772 }
 0x3eb   : > { %4299 = vmatmul.msk.f32.gmra.mxu0 %vm1012_vm10, %v4281_v6 }
 0x3f1   : > { %v1650_v61 = vpop.f32.mrf.mxu3  ;;  %4307 = vmatmul.msk.f32.gmra.mxu2 %vm1012_vm10, %v1352_v5 }
 0x3f3   : > { %4300 = vmatmul.msk.f32.gmra.mxu0 %vm1012_vm10, %v4282_v9 }
 0x3f9   : > { %v1653_v0 = vpop.f32.mrf.mxu3  ;;  %4308 = vmatmul.msk.f32.gmra.mxu2 %vm1012_vm10, %v1353_v8  ;;  %v4487_v8 = vld [vmem:[%s6705_s11 + $0x50] sm:$0xff] }
 0x3fb   : > { %4301 = vmatmul.msk.f32.gmra.mxu0 %vm1012_vm10, %v4283_v12 }
 0x401   : > { %v1656_v3 = vpop.f32.mrf.mxu3  ;;  %4309 = vmatmul.msk.f32.gmra.mxu2 %vm1012_vm10, %v1354_v11  ;;  %v4486_v11 = vld [vmem:[%s6705_s11 + $0x48] sm:$0xff] }
 0x402   : > { %1691 = vmatpush.msrb.mxu1 %v1656_v3 }
 0x403   : > { %4302 = vmatmul.msk.f32.gmra.mxu0 %vm1012_vm10, %v4284_v15 }
 0x404   : > { %1692 = vmatpush.msrb.mxu1 %v1653_v0 }
 0x406   : > { %1693 = vmatpush.msrb.mxu1 %v1650_v61 }
 0x408   : > { %1694 = vmatpush.msrb.mxu1 %v1647_v58 }
 0x409   : > { %4310 = vmatmul.msk.f32.gmra.mxu2 %vm1012_vm10, %v1355_v14 }
 0x40a   : > { %1695 = vmatpush.msrb.mxu1 %v1644_v56 }
 0x40c   : > { %1696 = vmatpush.msrb.mxu1 %v1641_v55 }
 0x40e   : > { %1697 = vmatpush.msrb.mxu1 %v1638_v54  ;;  %v1753_v54 = vpop.permute.xlu0 %1752 }
 0x410   : > { %1698 = vmatpush.msrb.mxu1 %v1635_v53 }
 0x411   : > { %4329 = vmatmul.msk.f32.vlgmr.msrb.gmra.mxu1 %vm1012_vm10, %v4311_v7  ;;  %v4488_v7 = vld [vmem:[%s6705_s11 + $0x58] sm:$0xff] }
 0x412   : > { %2461 = vmatpush.msra.mxu0 %v4488_v7 }
 0x414   : > { %2462 = vmatpush.msra.mxu0 %v4487_v8  ;;  %v4349_v8 = vld [vmem:[%s6704_s10 + $0x120] sm:$0xff] }
 0x416   : > { %2463 = vmatpush.msra.mxu0 %v4486_v11  ;;  %v1768_v21 = vpop.permute.xlu0 %1767  ;;  %v4350_v11 = vld [vmem:[%s6704_s10 + $0x128] sm:$0xff] }
 0x419   : > { %4330 = vmatmul.msk.f32.gmra.mxu1 %vm1012_vm10, %v4312_v10  ;;  %v1763_v10 = vpop.permute.xlu2 %1762 }
 0x421   : > { %4331 = vmatmul.msk.f32.gmra.mxu1 %vm1012_vm10, %v4313_v13  ;;  %v4485_v13 = vld [vmem:[%s6705_s11 + $0x40] sm:$0xff] }
 0x422   : > { %2464 = vmatpush.msra.mxu0 %v4485_v13 }
 0x429   : > { %4332 = vmatmul.msk.f32.gmra.mxu1 %vm1012_vm10, %v4314_v16 }
 0x431   : > { %4333 = vmatmul.msk.f32.gmra.mxu1 %vm1012_vm10, %v4315_v17 }
 0x439   : > { %4334 = vmatmul.msk.f32.gmra.mxu1 %vm1012_vm10, %v4316_v18 }
 0x441   : > { %4335 = vmatmul.msk.f32.gmra.mxu1 %vm1012_vm10, %v4317_v19 }
 0x448   : > { %v1517_v29 = vpop.f32.mrf.mxu0 }
 0x449   : > { %4336 = vmatmul.msk.f32.gmra.mxu1 %vm1012_vm10, %v4318_v20 }
 0x450   : > { %v1520_v31 = vpop.f32.mrf.mxu0 }
 0x454   : > { %v1582_v30 = vpop.f32.mrf.mxu2 }
 0x455   : > { %v1583_v33 = vadd.f32 %v1582_v30, %v1517_v29 }
 0x458   : > { %v1523_v34 = vpop.f32.mrf.mxu0 }
 0x45c   : > { %v1585_v32 = vpop.f32.mrf.mxu2 }
 0x45d   : > { %v1586_v41 = vadd.f32 %v1585_v32, %v1520_v31 }
 0x460   : > { %v1526_v45 = vpop.f32.mrf.mxu0 }
 0x464   : > { %v1588_v36 = vpop.f32.mrf.mxu2 }
 0x465   : > { %v1589_v49 = vadd.f32 %v1588_v36, %v1523_v34 }
 0x468   : > { %v1529_v56 = vpop.f32.mrf.mxu0 }
 0x46c   : > { %v1591_v47 = vpop.f32.mrf.mxu2 }
 0x46d   : > { %v1592_v58 = vadd.f32 %v1591_v47, %v1526_v45 }
 0x470   : > { %v1532_v3 = vpop.f32.mrf.mxu0 }
 0x474   : > { %v1594_v57 = vpop.f32.mrf.mxu2 }
 0x475   : > { %v1595_v1 = vadd.f32 %v1594_v57, %v1529_v56 }
 0x478   : > { %v1535_v17 = vpop.f32.mrf.mxu0 }
 0x47c   : > { %v1597_v4 = vpop.f32.mrf.mxu2 }
 0x47d   : > { %v1598_v14 = vadd.f32 %v1597_v4, %v1532_v3  ;;  %v1817_v3 = vld [vmem:[%s6704_s10 + $0x28] sm:$0xff] }
 0x480   : > { %v1538_v29 = vpop.f32.mrf.mxu0 }
 0x484   : > { %v1600_v19 = vpop.f32.mrf.mxu2 }
 0x485   : > { %v1601_v23 = vadd.f32 %v1600_v19, %v1535_v17  ;;  %v1822_v17 = vld [vmem:[%s6704_s10 + $0x50] sm:$0xff]  ;;  %v1823_v19 = vld [vmem:[%s6704_s10 + $0x58] sm:$0xff] }
 0x48c   : > { %v1603_v30 = vpop.f32.mrf.mxu2 }
 0x48d   : > { %v1604_v32 = vadd.f32 %v1603_v30, %v1538_v29  ;;  %v4364_v29 = vld [vmem:[%s6704_s10 + $0x198] sm:$0xff]  ;;  %v4358_v30 = vld [vmem:[%s6704_s10 + $0x168] sm:$0xff] }
 0x48e   : > { %v1700_v35 = vpop.f32.mrf.mxu1 }
 0x48f   : > { %v1724_v37 = vadd.f32 %v1700_v35, %v1583_v33 }
 0x491   : > { %v1780_v39 = vadd.f32 %v1743_v38, %v1724_v37  ;;  %v1778_v37 = vpop.permute.xlu2 %1777 }
 0x493   : > { %vm1788_vm1 = vcmp.ge.f32.partialorder %v1780_v39, 0.0  ;;  %v1796_v40 = vmul.f32 0.2, %v1780_v39 }
 0x495   : > { %v5462_v42 = vsel %vm1788_vm1, %v1780_v39, %v1796_v40 }
 0x496   : > { %v1703_v43 = vpop.f32.mrf.mxu1  ;;  %4337 = vmatmul.msk.f32.vlgmr.msrb.gmra.mxu0 %vm1848_vm4, %v5462_v42  ;;  %4381 = vmatmul.msk.f32.vlgmr.msrb.gmra.mxu2 %vm1848_vm4, %v5462_v42 }
 0x497   : > { %v1725_v44 = vadd.f32 %v1703_v43, %v1586_v41 }
 0x499   : > { %v1781_v48 = vadd.f32 %v1748_v46, %v1725_v44 }
 0x49b   : > { %vm1789_vm5 = vcmp.ge.f32.partialorder %v1781_v48, 0.0  ;;  %v1797_v50 = vmul.f32 0.2, %v1781_v48 }
 0x49d   : > { %v5468_v51 = vsel %vm1789_vm5, %v1781_v48, %v1797_v50 }
 0x49e   : > { %v1706_v52 = vpop.f32.mrf.mxu1  ;;  %4338 = vmatmul.msk.f32.gmra.mxu0 %vm1848_vm4, %v5468_v51  ;;  %4382 = vmatmul.msk.f32.gmra.mxu2 %vm1848_vm4, %v5468_v51 }
 0x49f   : > { %v1726_v53 = vadd.f32 %v1706_v52, %v1589_v49 }
 0x4a1   : > { %v1782_v55 = vadd.f32 %v1753_v54, %v1726_v53 }
 0x4a3   : > { %vm1790_vm6 = vcmp.ge.f32.partialorder %v1782_v55, 0.0  ;;  %v1798_v59 = vmul.f32 0.2, %v1782_v55 }
 0x4a5   : > { %v5474_v60 = vsel %vm1790_vm6, %v1782_v55, %v1798_v59 }
 0x4a6   : > { %v1709_v61 = vpop.f32.mrf.mxu1  ;;  %4339 = vmatmul.msk.f32.gmra.mxu0 %vm1848_vm4, %v5474_v60  ;;  %4383 = vmatmul.msk.f32.gmra.mxu2 %vm1848_vm4, %v5474_v60 }
 0x4a7   : > { %v1727_v62 = vadd.f32 %v1709_v61, %v1592_v58  ;;  %v1814_v58 = vld [vmem:[%s6704_s10 + $0x10] sm:$0xff]  ;;  %v1815_v61 = vld [vmem:[%s6704_s10 + $0x18] sm:$0xff] }
 0x4a9   : > { %v1783_v0 = vadd.f32 %v1758_v63, %v1727_v62  ;;  %v4346_v63 = vld [vmem:[%s6704_s10 + $0x108] sm:$0xff] }
 0x4ab   : > { %vm1791_vm7 = vcmp.ge.f32.partialorder %v1783_v0, 0.0  ;;  %v1799_v2 = vmul.f32 0.2, %v1783_v0 }
 0x4ad   : > { %v1807_v5 = vsel %vm1791_vm7, %v1783_v0, %v1799_v2  ;;  %v1816_v0 = vld [vmem:[%s6704_s10 + $0x20] sm:$0xff]  ;;  %v4347_v2 = vld [vmem:[%s6704_s10 + $0x110] sm:$0xff] }
 0x4ae   : > { %v1712_v6 = vpop.f32.mrf.mxu1  ;;  %4340 = vmatmul.msk.f32.gmra.mxu0 %vm1848_vm4, %v1807_v5  ;;  %4384 = vmatmul.msk.f32.gmra.mxu2 %vm1848_vm4, %v1807_v5 }
 0x4af   : > { %v1728_v9 = vadd.f32 %v1712_v6, %v1595_v1  ;;  %v1818_v6 = vld [vmem:[%s6704_s10 + $0x30] sm:$0xff] }
 0x4b1   : > { %v1784_v12 = vadd.f32 %v1763_v10, %v1728_v9  ;;  %v1819_v9 = vld [vmem:[%s6704_s10 + $0x38] sm:$0xff] }
 0x4b3   : > { %vm1792_vm8 = vcmp.ge.f32.partialorder %v1784_v12, 0.0  ;;  %v1800_v15 = vmul.f32 0.2, %v1784_v12 }
 0x4b5   : > { %v1808_v16 = vsel %vm1792_vm8, %v1784_v12, %v1800_v15  ;;  %v1820_v12 = vld [vmem:[%s6704_s10 + $0x40] sm:$0xff]  ;;  %v1821_v15 = vld [vmem:[%s6704_s10 + $0x48] sm:$0xff] }
 0x4b6   : > { %v1715_v18 = vpop.f32.mrf.mxu1  ;;  %4341 = vmatmul.msk.f32.gmra.mxu0 %vm1848_vm4, %v1808_v16  ;;  %4385 = vmatmul.msk.f32.gmra.mxu2 %vm1848_vm4, %v1808_v16 }
 0x4b7   : > { %v1729_v20 = vadd.f32 %v1715_v18, %v1598_v14  ;;  %v4351_v14 = vld [vmem:[%s6704_s10 + $0x130] sm:$0xff]  ;;  %v4353_v18 = vld [vmem:[%s6704_s10 + $0x140] sm:$0xff] }
 0x4b9   : > { %v1785_v22 = vadd.f32 %v1768_v21, %v1729_v20  ;;  %v4354_v20 = vld [vmem:[%s6704_s10 + $0x148] sm:$0xff]  ;;  %v1824_v21 = vld [vmem:[%s6704_s10 + $0x60] sm:$0xff] }
 0x4bb   : > { %vm1793_vm9 = vcmp.ge.f32.partialorder %v1785_v22, 0.0  ;;  %v1801_v24 = vmul.f32 0.2, %v1785_v22 }
 0x4bd   : > { %v1809_v25 = vsel %vm1793_vm9, %v1785_v22, %v1801_v24  ;;  %v4355_v22 = vld [vmem:[%s6704_s10 + $0x150] sm:$0xff]  ;;  %v4356_v24 = vld [vmem:[%s6704_s10 + $0x158] sm:$0xff] }
 0x4be   : > { %v1718_v26 = vpop.f32.mrf.mxu1  ;;  %4342 = vmatmul.msk.f32.gmra.mxu0 %vm1848_vm4, %v1809_v25  ;;  %4386 = vmatmul.msk.f32.gmra.mxu2 %vm1848_vm4, %v1809_v25 }
 0x4bf   : > { %v1730_v28 = vadd.f32 %v1718_v26, %v1601_v23  ;;  %v1825_v23 = vld [vmem:[%s6704_s10 + $0x68] sm:$0xff]  ;;  %v4363_v26 = vld [vmem:[%s6704_s10 + $0x190] sm:$0xff] }
 0x4c1   : > { %v1786_v31 = vadd.f32 %v1773_v27, %v1730_v28  ;;  %v4357_v27 = vld [vmem:[%s6704_s10 + $0x160] sm:$0xff]  ;;  %v1827_v28 = vld [vmem:[%s6704_s10 + $0x78] sm:$0xff] }
 0x4c3   : > { %vm1794_vm11 = vcmp.ge.f32.partialorder %v1786_v31, 0.0  ;;  %v1802_v33 = vmul.f32 0.2, %v1786_v31 }
 0x4c5   : > { %v1810_v34 = vsel %vm1794_vm11, %v1786_v31, %v1802_v33  ;;  %v1828_v31 = vld [vmem:[%s6704_s10 + $0x80] sm:$0xff]  ;;  %v4359_v33 = vld [vmem:[%s6704_s10 + $0x170] sm:$0xff] }
 0x4c6   : > { %v1721_v35 = vpop.f32.mrf.mxu1  ;;  %4343 = vmatmul.msk.f32.gmra.mxu0 %vm1848_vm4, %v1810_v34  ;;  %4387 = vmatmul.msk.f32.gmra.mxu2 %vm1848_vm4, %v1810_v34 }
 0x4c7   : > { %v1731_v36 = vadd.f32 %v1721_v35, %v1604_v32  ;;  %v4365_v32 = vld [vmem:[%s6704_s10 + $0x1a0] sm:$0xff]  ;;  %v1829_v35 = vld [vmem:[%s6704_s10 + $0x88] sm:$0xff] }
 0x4c9   : > { %v1787_v38 = vadd.f32 %v1778_v37, %v1731_v36  ;;  %v4360_v36 = vld [vmem:[%s6704_s10 + $0x178] sm:$0xff]  ;;  %v4367_v37 = vld [vmem:[%s6704_s10 + $0x1b0] sm:$0xff] }
 0x4cb   : > { %vm1795_vm12 = vcmp.ge.f32.partialorder %v1787_v38, 0.0  ;;  %v1803_v39 = vmul.f32 0.2, %v1787_v38 }
 0x4cd   : > { %v1811_v40 = vsel %vm1795_vm12, %v1787_v38, %v1803_v39  ;;  %v1830_v38 = vld [vmem:[%s6704_s10 + $0x90] sm:$0xff]  ;;  %v4361_v39 = vld [vmem:[%s6704_s10 + $0x180] sm:$0xff] }
 0x4ce   : > { %4344 = vmatmul.msk.f32.gmra.mxu0 %vm1848_vm4, %v1811_v40  ;;  %4388 = vmatmul.msk.f32.gmra.mxu2 %vm1848_vm4, %v1811_v40 }
 0x4d6   : > { %4489 = vmatmul.msk.f32.vlgmr.msra.gmra.mxu0 %vm1848_vm4, %v5462_v42 }
 0x4de   : > { %4490 = vmatmul.msk.f32.gmra.mxu0 %vm1848_vm4, %v5468_v51 }
 0x4e6   : > { %4491 = vmatmul.msk.f32.gmra.mxu0 %vm1848_vm4, %v5474_v60  ;;  %v4345_v60 = vld [vmem:[%s6704_s10 + $0x100] sm:$0xff] }
 0x4ee   : > { %4492 = vmatmul.msk.f32.gmra.mxu0 %vm1848_vm4, %v1807_v5  ;;  %v4348_v5 = vld [vmem:[%s6704_s10 + $0x118] sm:$0xff] }
 0x4f6   : > { %4493 = vmatmul.msk.f32.gmra.mxu0 %vm1848_vm4, %v1808_v16  ;;  %v4352_v16 = vld [vmem:[%s6704_s10 + $0x138] sm:$0xff] }
 0x4fe   : > { %4494 = vmatmul.msk.f32.gmra.mxu0 %vm1848_vm4, %v1809_v25  ;;  %v1826_v25 = vld [vmem:[%s6704_s10 + $0x70] sm:$0xff] }
 0x506   : > { %4495 = vmatmul.msk.f32.gmra.mxu0 %vm1848_vm4, %v1810_v34  ;;  %v4366_v34 = vld [vmem:[%s6704_s10 + $0x1a8] sm:$0xff] }
 0x50e   : > { %4496 = vmatmul.msk.f32.gmra.mxu0 %vm1848_vm4, %v1811_v40 }
 0x513   : > { %v1890_v41 = vpop.f32.mrf.mxu0 }
 0x519   : > { %v1969_v43 = vpop.f32.mrf.mxu2 }
 0x51b   : > { %v1893_v44 = vpop.f32.mrf.mxu0 }
 0x521   : > { %v1972_v42 = vpop.f32.mrf.mxu2 }
 0x523   : > { %v1896_v45 = vpop.f32.mrf.mxu0 }
 0x529   : > { %v1975_v46 = vpop.f32.mrf.mxu2 }
 0x52b   : > { %v1899_v47 = vpop.f32.mrf.mxu0 }
 0x531   : > { %v1978_v48 = vpop.f32.mrf.mxu2 }
 0x533   : > { %v1902_v49 = vpop.f32.mrf.mxu0 }
 0x539   : > { %v1981_v50 = vpop.f32.mrf.mxu2 }
 0x53b   : > { %v1905_v51 = vpop.f32.mrf.mxu0 }
 0x541   : > { %v1984_v52 = vpop.f32.mrf.mxu2 }
 0x543   : > { %v1908_v53 = vpop.f32.mrf.mxu0 }
 0x549   : > { %v1987_v54 = vpop.f32.mrf.mxu2 }
 0x54b   : > { %v1911_v55 = vpop.f32.mrf.mxu0 }
 0x54c   : > { %4608 = vmatpush.msra.mxu2 %v1911_v55 }
 0x54e   : > { %4609 = vmatpush.msra.mxu2 %v1908_v53 }
 0x550   : > { %4610 = vmatpush.msra.mxu2 %v1905_v51 }
 0x551   : > { %v1990_v56 = vpop.f32.mrf.mxu2 }
 0x552   : > { %2097 = vmatpush.msra.mxu1 %v1990_v56  ;;  %4600 = vmatpush.msra.mxu3 %v1990_v56 }
 0x553   : > { %4611 = vmatpush.msra.mxu2 %v1902_v49  ;;  %v5513_v57 = vpop.f32.mrf.mxu0 }
 0x554   : > { %2098 = vmatpush.msra.mxu1 %v1987_v54  ;;  %4601 = vmatpush.msra.mxu3 %v1987_v54  ;;  %v4372_v54 = vld [vmem:[%s6704_s10 + $0x1d8] sm:$0xff] }
 0x555   : > { %4612 = vmatpush.msra.mxu2 %v1899_v47 }
 0x556   : > { %2099 = vmatpush.msra.mxu1 %v1984_v52  ;;  %4602 = vmatpush.msra.mxu3 %v1984_v52  ;;  %v1834_v52 = vld [vmem:[%s6704_s10 + $0xb0] sm:$0xff] }
 0x557   : > { %4613 = vmatpush.msra.mxu2 %v1896_v45 }
 0x558   : > { %2100 = vmatpush.msra.mxu1 %v1981_v50  ;;  %4603 = vmatpush.msra.mxu3 %v1981_v50 }
 0x559   : > { %4614 = vmatpush.msra.mxu2 %v1893_v44 }
 0x55a   : > { %2101 = vmatpush.msra.mxu1 %v1978_v48  ;;  %4604 = vmatpush.msra.mxu3 %v1978_v48  ;;  %v4370_v48 = vld [vmem:[%s6704_s10 + $0x1c8] sm:$0xff] }
 0x55b   : > { %4615 = vmatpush.msra.mxu2 %v1890_v41  ;;  %v2469_v59 = vpop.f32.mrf.mxu0 }
 0x55c   : > { %4423 = vmatmul.msk.f32.vlgmr.msra.gmra.mxu2 %vm1012_vm10, %v1814_v58  ;;  %2102 = vmatpush.msra.mxu1 %v1975_v46  ;;  %v1836_v58 = vld [vmem:[%s6704_s10 + $0xc0] sm:$0xff] }
 0x55d   : > { %4605 = vmatpush.msra.mxu3 %v1975_v46  ;;  %v1832_v46 = vld [vmem:[%s6704_s10 + $0xa0] sm:$0xff] }
 0x55e   : > { %2103 = vmatpush.msra.mxu1 %v1972_v42 }
 0x55f   : > { %4606 = vmatpush.msra.mxu3 %v1972_v42 }
 0x560   : > { %2104 = vmatpush.msra.mxu1 %v1969_v43 }
 0x561   : > { %4607 = vmatpush.msra.mxu3 %v1969_v43  ;;  %4389 = vmatmul.msk.f32.vlgmr.msra.gmra.mxu1 %vm1012_vm10, %v4345_v60  ;;  %v1831_v43 = vld [vmem:[%s6704_s10 + $0x98] sm:$0xff]  ;;  %v4374_v60 = vld [vmem:[%s6704_s10 + $0x1e8] sm:$0xff] }
 0x562   : > { %2306 = vmatpush.msrb.mxu1 %v1911_v55  ;;  %4407 = vmatmul.msk.f32.vlgmr.msra.gmra.mxu3 %vm1012_vm10, %v4363_v26  ;;  %v1835_v55 = vld [vmem:[%s6704_s10 + $0xb8] sm:$0xff] }
 0x563   : > { %v2472_v62 = vpop.f32.mrf.mxu0 }
 0x564   : > { %2307 = vmatpush.msrb.mxu1 %v1908_v53  ;;  %4424 = vmatmul.msk.f32.gmra.mxu2 %vm1012_vm10, %v1815_v61  ;;  %v1837_v61 = vld [vmem:[%s6704_s10 + $0xc8] sm:$0xff] }
 0x566   : > { %2308 = vmatpush.msrb.mxu1 %v1905_v51  ;;  %v4371_v51 = vld [vmem:[%s6704_s10 + $0x1d0] sm:$0xff] }
 0x568   : > { %2309 = vmatpush.msrb.mxu1 %v1902_v49  ;;  %v1833_v49 = vld [vmem:[%s6704_s10 + $0xa8] sm:$0xff] }
 0x569   : > { %4390 = vmatmul.msk.f32.gmra.mxu1 %vm1012_vm10, %v4346_v63  ;;  %v4375_v63 = vld [vmem:[%s6704_s10 + $0x1f0] sm:$0xff] }
 0x56a   : > { %2310 = vmatpush.msrb.mxu1 %v1899_v47  ;;  %4408 = vmatmul.msk.f32.gmra.mxu3 %vm1012_vm10, %v4364_v29  ;;  %v4460_v29 = vld [vmem:[%s6704_s10 + $0x238] sm:$0xff] }
 0x56b   : > { %v2475_v1 = vpop.f32.mrf.mxu0 }
 0x56c   : > { %2311 = vmatpush.msrb.mxu1 %v1896_v45  ;;  %4425 = vmatmul.msk.f32.gmra.mxu2 %vm1012_vm10, %v1816_v0  ;;  %v4369_v45 = vld [vmem:[%s6704_s10 + $0x1c0] sm:$0xff]  ;;  %v1838_v0 = vld [vmem:[%s6704_s10 + $0xd0] sm:$0xff] }
 0x56e   : > { %2312 = vmatpush.msrb.mxu1 %v1893_v44  ;;  %v4362_v44 = vld [vmem:[%s6704_s10 + $0x188] sm:$0xff] }
 0x570   : > { %2313 = vmatpush.msrb.mxu1 %v1890_v41  ;;  %v4368_v41 = vld [vmem:[%s6704_s10 + $0x1b8] sm:$0xff] }
 0x571   : > { %4391 = vmatmul.msk.f32.gmra.mxu1 %vm1012_vm10, %v4347_v2  ;;  %v4376_v2 = vld [vmem:[%s6704_s10 + $0x1f8] sm:$0xff] }
 0x572   : > { %4409 = vmatmul.msk.f32.gmra.mxu3 %vm1012_vm10, %v4365_v32 }
 0x573   : > { %v2478_v4 = vpop.f32.mrf.mxu0 }
 0x574   : > { %4426 = vmatmul.msk.f32.gmra.mxu2 %vm1012_vm10, %v1817_v3  ;;  %v1839_v3 = vld [vmem:[%s6704_s10 + $0xd8] sm:$0xff] }
 0x579   : > { %4392 = vmatmul.msk.f32.gmra.mxu1 %vm1012_vm10, %v4348_v5  ;;  %v1840_v5 = vld [vmem:[%s6704_s10 + $0xe0] sm:$0xff] }
 0x57a   : > { %4410 = vmatmul.msk.f32.gmra.mxu3 %vm1012_vm10, %v4366_v34 }
 0x57b   : > { %v2481_v7 = vpop.f32.mrf.mxu0 }
 0x57c   : > { %4427 = vmatmul.msk.f32.gmra.mxu2 %vm1012_vm10, %v1818_v6 }
 0x581   : > { %4393 = vmatmul.msk.f32.gmra.mxu1 %vm1012_vm10, %v4349_v8  ;;  %v1841_v8 = vld [vmem:[%s6704_s10 + $0xe8] sm:$0xff] }
 0x582   : > { %4411 = vmatmul.msk.f32.gmra.mxu3 %vm1012_vm10, %v4367_v37 }
 0x583   : > { %v2484_v10 = vpop.f32.mrf.mxu0 }
 0x584   : > { %4428 = vmatmul.msk.f32.gmra.mxu2 %vm1012_vm10, %v1819_v9 }
 0x589   : > { %4394 = vmatmul.msk.f32.gmra.mxu1 %vm1012_vm10, %v4350_v11  ;;  %v1842_v11 = vld [vmem:[%s6704_s10 + $0xf0] sm:$0xff] }
 0x58a   : > { %4412 = vmatmul.msk.f32.gmra.mxu3 %vm1012_vm10, %v4368_v41 }
 0x58b   : > { %v2487_v13 = vpop.f32.mrf.mxu0 }
 0x58c   : > { %4429 = vmatmul.msk.f32.gmra.mxu2 %vm1012_vm10, %v1820_v12 }
 0x58d   : > { %2594 = vmatpush.msrb.mxu2 %v2487_v13  ;;  %v1843_v13 = vld [vmem:[%s6704_s10 + $0xf8] sm:$0xff] }
 0x58f   : > { %2595 = vmatpush.msrb.mxu2 %v2484_v10  ;;  %v1813_v10 = vld [vmem:[%s6704_s10 + $0x8] sm:$0xff] }
 0x591   : > { %2596 = vmatpush.msrb.mxu2 %v2481_v7  ;;  %4395 = vmatmul.msk.f32.gmra.mxu1 %vm1012_vm10, %v4351_v14  ;;  %v1812_v7 = vld [vmem:[%s6704_s10] sm:$0xff] }
 0x592   : > { %4413 = vmatmul.msk.f32.gmra.mxu3 %vm1012_vm10, %v4369_v45 }
 0x593   : > { %2597 = vmatpush.msrb.mxu2 %v2478_v4 }
 0x594   : > { %4430 = vmatmul.msk.f32.gmra.mxu2 %vm1012_vm10, %v1821_v15  ;;  %v4453_v15 = vld [vmem:[%s6704_s10 + $0x200] sm:$0xff] }
 0x595   : > { %2598 = vmatpush.msrb.mxu2 %v2475_v1 }
 0x597   : > { %2599 = vmatpush.msrb.mxu2 %v2472_v62 }
 0x599   : > { %2600 = vmatpush.msrb.mxu2 %v2469_v59  ;;  %4396 = vmatmul.msk.f32.gmra.mxu1 %vm1012_vm10, %v4352_v16 }
 0x59a   : > { %4414 = vmatmul.msk.f32.gmra.mxu3 %vm1012_vm10, %v4370_v48 }
 0x59b   : > { %2601 = vmatpush.msrb.mxu2 %v5513_v57  ;;  %v4373_v57 = vld [vmem:[%s6704_s10 + $0x1e0] sm:$0xff] }
 0x59c   : > { %4431 = vmatmul.msk.f32.gmra.mxu2 %vm1012_vm10, %v1822_v17  ;;  %v4454_v17 = vld [vmem:[%s6704_s10 + $0x208] sm:$0xff] }
 0x5a1   : > { %4397 = vmatmul.msk.f32.gmra.mxu1 %vm1012_vm10, %v4353_v18 }
 0x5a2   : > { %4415 = vmatmul.msk.f32.gmra.mxu3 %vm1012_vm10, %v4371_v51  ;;  %v4467_v51 = vld [vmem:[%s6704_s10 + $0x270] sm:$0xff] }
 0x5a4   : > { %4432 = vmatmul.msk.f32.gmra.mxu2 %vm1012_vm10, %v1823_v19  ;;  %v4455_v19 = vld [vmem:[%s6704_s10 + $0x210] sm:$0xff] }
 0x5a9   : > { %4398 = vmatmul.msk.f32.gmra.mxu1 %vm1012_vm10, %v4354_v20 }
 0x5aa   : > { %4416 = vmatmul.msk.f32.gmra.mxu3 %vm1012_vm10, %v4372_v54  ;;  %v4468_v54 = vld [vmem:[%s6704_s10 + $0x278] sm:$0xff] }
 0x5ac   : > { %4433 = vmatmul.msk.f32.gmra.mxu2 %vm1012_vm10, %v1824_v21  ;;  %v4456_v21 = vld [vmem:[%s6704_s10 + $0x218] sm:$0xff] }
 0x5b1   : > { %4399 = vmatmul.msk.f32.gmra.mxu1 %vm1012_vm10, %v4355_v22 }
 0x5b2   : > { %4417 = vmatmul.msk.f32.gmra.mxu3 %vm1012_vm10, %v4373_v57 }
 0x5b4   : > { %4434 = vmatmul.msk.f32.gmra.mxu2 %vm1012_vm10, %v1825_v23  ;;  %v4457_v23 = vld [vmem:[%s6704_s10 + $0x220] sm:$0xff] }
 0x5b9   : > { %4400 = vmatmul.msk.f32.gmra.mxu1 %vm1012_vm10, %v4356_v24 }
 0x5ba   : > { %4418 = vmatmul.msk.f32.gmra.mxu3 %vm1012_vm10, %v4374_v60 }
 0x5bc   : > { %4435 = vmatmul.msk.f32.gmra.mxu2 %vm1012_vm10, %v1826_v25  ;;  %v4458_v25 = vld [vmem:[%s6704_s10 + $0x228] sm:$0xff] }
 0x5c1   : > { %4401 = vmatmul.msk.f32.gmra.mxu1 %vm1012_vm10, %v4357_v27  ;;  %v4459_v27 = vld [vmem:[%s6704_s10 + $0x230] sm:$0xff] }
 0x5c2   : > { %4419 = vmatmul.msk.f32.gmra.mxu3 %vm1012_vm10, %v4375_v63  ;;  %v4470_v63 = vld [vmem:[%s6704_s10 + $0x288] sm:$0xff] }
 0x5c4   : > { %4436 = vmatmul.msk.f32.gmra.mxu2 %vm1012_vm10, %v1827_v28 }
 0x5c9   : > { %4402 = vmatmul.msk.f32.gmra.mxu1 %vm1012_vm10, %v4358_v30 }
 0x5ca   : > { %4420 = vmatmul.msk.f32.gmra.mxu3 %vm1012_vm10, %v4376_v2 }
 0x5cc   : > { %4437 = vmatmul.msk.f32.gmra.mxu2 %vm1012_vm10, %v1828_v31  ;;  %v4461_v31 = vld [vmem:[%s6704_s10 + $0x240] sm:$0xff] }
 0x5d1   : > { %4403 = vmatmul.msk.f32.gmra.mxu1 %vm1012_vm10, %v4359_v33  ;;  %v4462_v33 = vld [vmem:[%s6704_s10 + $0x248] sm:$0xff] }
 0x5d4   : > { %4438 = vmatmul.msk.f32.gmra.mxu2 %vm1012_vm10, %v1829_v35  ;;  %v4463_v35 = vld [vmem:[%s6704_s10 + $0x250] sm:$0xff] }
 0x5d9   : > { %4404 = vmatmul.msk.f32.gmra.mxu1 %vm1012_vm10, %v4360_v36 }
 0x5dc   : > { %4439 = vmatmul.msk.f32.gmra.mxu2 %vm1012_vm10, %v1830_v38  ;;  %v4464_v38 = vld [vmem:[%s6704_s10 + $0x258] sm:$0xff] }
 0x5de   : > { %v5863_v36 = vpop.f32.mrf.mxu1 }
 0x5df   : > { %v5671_v40 = vpop.f32.mrf.mxu2 }
 0x5e1   : > { %4405 = vmatmul.msk.f32.gmra.mxu1 %vm1012_vm10, %v4361_v39 }
 0x5e4   : > { %4440 = vmatmul.msk.f32.gmra.mxu2 %vm1012_vm10, %v1831_v43  ;;  %v4465_v43 = vld [vmem:[%s6704_s10 + $0x260] sm:$0xff] }
 0x5e6   : > { %v5872_v39 = vpop.f32.mrf.mxu1 }
 0x5e7   : > { %v5685_v42 = vpop.f32.mrf.mxu2 }
 0x5e9   : > { %4406 = vmatmul.msk.f32.gmra.mxu1 %vm1012_vm10, %v4362_v44 }
 0x5ec   : > { %4441 = vmatmul.msk.f32.gmra.mxu2 %vm1012_vm10, %v1832_v46  ;;  %v4466_v46 = vld [vmem:[%s6704_s10 + $0x268] sm:$0xff] }
 0x5ee   : > { %v2112_v44 = vpop.f32.mrf.mxu1 }
 0x5ef   : > { %v5696_v47 = vpop.f32.mrf.mxu2 }
 0x5f1   : > { %4421 = vmatmul.msk.f32.vlgmr.msrb.gmra.mxu1 %vm1012_vm10, %v1812_v7 }
 0x5f4   : > { %4442 = vmatmul.msk.f32.gmra.mxu2 %vm1012_vm10, %v1833_v49 }
 0x5f6   : > { %v2115_v49 = vpop.f32.mrf.mxu1 }
 0x5f7   : > { %v5706_v50 = vpop.f32.mrf.mxu2 }
 0x5f9   : > { %4422 = vmatmul.msk.f32.gmra.mxu1 %vm1012_vm10, %v1813_v10 }
 0x5fc   : > { %4443 = vmatmul.msk.f32.gmra.mxu2 %vm1012_vm10, %v1834_v52 }
 0x5ff   : > { %v5716_v53 = vpop.f32.mrf.mxu2 }
 0x604   : > { %4444 = vmatmul.msk.f32.gmra.mxu2 %vm1012_vm10, %v1835_v55  ;;  %v2118_v55 = vpop.f32.mrf.mxu1 }
 0x607   : > { %v5726_v56 = vpop.f32.mrf.mxu2 }
 0x60c   : > { %4445 = vmatmul.msk.f32.gmra.mxu2 %vm1012_vm10, %v1836_v58  ;;  %v4469_v58 = vld [vmem:[%s6704_s10 + $0x280] sm:$0xff]  ;;  %v2121_v60 = vpop.f32.mrf.mxu1 }
 0x60f   : > { %v5736_v59 = vpop.f32.mrf.mxu2 }
 0x614   : > { %4446 = vmatmul.msk.f32.gmra.mxu2 %vm1012_vm10, %v1837_v61 }
 0x617   : > { %v5746_v62 = vpop.f32.mrf.mxu2 }
 0x61c   : > { %4447 = vmatmul.msk.f32.gmra.mxu2 %vm1012_vm10, %v1838_v0  ;;  %v2124_v0 = vpop.f32.mrf.mxu1 }
 0x61f   : > { %v5756_v1 = vpop.f32.mrf.mxu2 }
 0x624   : > { %4448 = vmatmul.msk.f32.gmra.mxu2 %vm1012_vm10, %v1839_v3  ;;  %v4471_v3 = vld [vmem:[%s6704_s10 + $0x290] sm:$0xff]  ;;  %v2127_v10 = vpop.f32.mrf.mxu1 }
 0x627   : > { %v5766_v4 = vpop.f32.mrf.mxu2 }
 0x62c   : > { %4449 = vmatmul.msk.f32.gmra.mxu2 %vm1012_vm10, %v1840_v5  ;;  %v2322_v5 = vadd.f32 %v5671_v40, %v2112_v44  ;;  %v2130_v40 = vpop.f32.mrf.mxu1 }
 0x62f   : > { %v5772_v6 = vpop.f32.mrf.mxu2 }
 0x634   : > { %4450 = vmatmul.msk.f32.gmra.mxu2 %vm1012_vm10, %v1841_v8 }
 0x637   : > { %v5782_v9 = vpop.f32.mrf.mxu2 }
 0x63c   : > { %4451 = vmatmul.msk.f32.gmra.mxu2 %vm1012_vm10, %v1842_v11  ;;  %v4472_v11 = vld [vmem:[%s6704_s10 + $0x298] sm:$0xff] }
 0x63f   : > { %v5792_v12 = vpop.f32.mrf.mxu2 }
 0x644   : > { %4452 = vmatmul.msk.f32.gmra.mxu2 %vm1012_vm10, %v1843_v13  ;;  %v2325_v13 = vadd.f32 %v5685_v42, %v2115_v49  ;;  %v5937_v42 = vpop.f32.mrf.mxu1 }
 0x647   : > { %v5798_v14 = vpop.f32.mrf.mxu2 }
 0x64c   : > { %4497 = vmatmul.msk.f32.vlgmr.msrb.gmra.mxu2 %vm1012_vm10, %v4453_v15  ;;  %v5951_v44 = vpop.f32.mrf.mxu1 }
 0x64f   : > { %v5804_v16 = vpop.f32.mrf.mxu2 }
 0x654   : > { %4498 = vmatmul.msk.f32.gmra.mxu2 %vm1012_vm10, %v4454_v17 }
 0x657   : > { %v5810_v18 = vpop.f32.mrf.mxu2 }
 0x65c   : > { %4499 = vmatmul.msk.f32.gmra.mxu2 %vm1012_vm10, %v4455_v19  ;;  %v4473_v19 = vld [vmem:[%s6704_s10 + $0x2a0] sm:$0xff] }
 0x65f   : > { %v5816_v20 = vpop.f32.mrf.mxu2 }
 0x664   : > { %4500 = vmatmul.msk.f32.gmra.mxu2 %vm1012_vm10, %v4456_v21  ;;  %v2328_v21 = vadd.f32 %v5696_v47, %v2118_v55  ;;  %v4475_v47 = vld [vmem:[%s6704_s10 + $0x2b0] sm:$0xff]  ;;  %v2337_v55 = vadd.f32 %v5726_v56, %v2127_v10  ;;  %v4478_v56 = vld [vmem:[%s6704_s10 + $0x2c8] sm:$0xff] }
 0x667   : > { %v5822_v22 = vpop.f32.mrf.mxu2 }
 0x66c   : > { %4501 = vmatmul.msk.f32.gmra.mxu2 %vm1012_vm10, %v4457_v23 }
 0x66f   : > { %v5828_v24 = vpop.f32.mrf.mxu2 }
 0x674   : > { %4502 = vmatmul.msk.f32.gmra.mxu2 %vm1012_vm10, %v4458_v25 }
 0x677   : > { %v5834_v26 = vpop.f32.mrf.mxu2 }
 0x67c   : > { %4503 = vmatmul.msk.f32.gmra.mxu2 %vm1012_vm10, %v4459_v27  ;;  %v4474_v27 = vld [vmem:[%s6704_s10 + $0x2a8] sm:$0xff] }
 0x67f   : > { %v5840_v28 = vpop.f32.mrf.mxu2 }
 0x684   : > { %4504 = vmatmul.msk.f32.gmra.mxu2 %vm1012_vm10, %v4460_v29  ;;  %v2331_v29 = vadd.f32 %v5706_v50, %v2121_v60  ;;  %v4476_v50 = vld [vmem:[%s6704_s10 + $0x2b8] sm:$0xff] }
 0x687   : > { %v5846_v30 = vpop.f32.mrf.mxu2 }
 0x688   : > { %6724 = vst [vmem:[#allocation8_spill] sm:$0xff] %v5846_v30 }
 0x68c   : > { %4505 = vmatmul.msk.f32.gmra.mxu2 %vm1012_vm10, %v4461_v31 }
 0x68f   : > { %v5852_v32 = vpop.f32.mrf.mxu2 }
 0x690   : > { %6725 = vst [vmem:[#allocation9_spill] sm:$0xff] %v5852_v32 }
 0x694   : > { %4506 = vmatmul.msk.f32.gmra.mxu2 %vm1012_vm10, %v4462_v33 }
 0x697   : > { %v5858_v34 = vpop.f32.mrf.mxu2 }
 0x698   : > { %6726 = vst [vmem:[#allocation10_spill] sm:$0xff] %v5858_v34  ;;  %v6019_v34 = vpop.f32.mrf.mxu3 }
 0x69c   : > { %4507 = vmatmul.msk.f32.gmra.mxu2 %vm1012_vm10, %v4463_v35  ;;  %v5945_v35 = vpop.permute.xlu0 %2920 }
 0x69d   : > { %6733 = vst [vmem:[#allocation17_spill] sm:$0xff] %v5945_v35 }
 0x69f   : > { %v5866_v37 = vpop.f32.mrf.mxu2 }
 0x6a0   : > { %6727 = vst [vmem:[#allocation11_spill] sm:$0xff] %v5866_v37 }
 0x6a4   : > { %4508 = vmatmul.msk.f32.gmra.mxu2 %vm1012_vm10, %v4464_v38  ;;  %v5948_v38 = vpop.permute.xlu1 %2915 }
 0x6a5   : > { %6734 = vst [vmem:[#allocation18_spill] sm:$0xff] %v5948_v38 }
 0x6a7   : > { %v5874_v41 = vpop.f32.mrf.mxu2 }
 0x6a8   : > { %6728 = vst [vmem:[#allocation12_spill] sm:$0xff] %v5874_v41 }
 0x6ac   : > { %4509 = vmatmul.msk.f32.gmra.mxu2 %vm1012_vm10, %v4465_v43  ;;  %v2334_v43 = vadd.f32 %v5716_v53, %v2124_v0  ;;  %v5964_v60 = vpop.permute.xlu1 %2905  ;;  %v4477_v0 = vld [vmem:[%s6704_s10 + $0x2c0] sm:$0xff] }
 0x6ad   : > { %6736 = vst [vmem:[#allocation20_spill] sm:$0xff] %v5964_v60 }
 0x6af   : > { %v5880_v45 = vpop.f32.mrf.mxu2 }
 0x6b0   : > { %6729 = vst [vmem:[#allocation13_spill] sm:$0xff] %v5880_v45 }
 0x6b4   : > { %4510 = vmatmul.msk.f32.gmra.mxu2 %vm1012_vm10, %v4466_v46  ;;  %v2831_v10 = vpop.permute.xlu1 %2830 }
 0x6b7   : > { %v5886_v48 = vpop.f32.mrf.mxu2 }
 0x6b8   : > { %6730 = vst [vmem:[#allocation14_spill] sm:$0xff] %v5886_v48 }
 0x6bc   : > { %4511 = vmatmul.msk.f32.gmra.mxu2 %vm1012_vm10, %v4467_v51  ;;  %v5958_v51 = vpop.permute.xlu2 %2910 }
 0x6bd   : > { %6735 = vst [vmem:[#allocation19_spill] sm:$0xff] %v5958_v51 }
 0x6bf   : > { %v5892_v52 = vpop.f32.mrf.mxu2 }
 0x6c0   : > { %6731 = vst [vmem:[#allocation15_spill] sm:$0xff] %v5892_v52 }
 0x6c4   : > { %4512 = vmatmul.msk.f32.gmra.mxu2 %vm1012_vm10, %v4468_v54  ;;  %v5961_v54 = vpop.permute.xlu0 %2840 }
 0x6c7   : > { %v5898_v57 = vpop.f32.mrf.mxu2 }
 0x6c8   : > { %6732 = vst [vmem:[#allocation16_spill] sm:$0xff] %v5898_v57 }
 0x6cc   : > { %4513 = vmatmul.msk.f32.gmra.mxu2 %vm1012_vm10, %v4469_v58 }
 0x6cf   : > { %v5904_v61 = vpop.f32.mrf.mxu2 }
 0x6d4   : > { %4514 = vmatmul.msk.f32.gmra.mxu2 %vm1012_vm10, %v4470_v63  ;;  %v2139_v63 = vpop.f32.mrf.mxu1 }
 0x6d5   : > { %v2349_v48 = vadd.f32 %v5766_v4, %v2139_v63 }
 0x6d7   : > { %v5910_v2 = vpop.f32.mrf.mxu2 }
 0x6dc   : > { %4515 = vmatmul.msk.f32.gmra.mxu2 %vm1012_vm10, %v4471_v3  ;;  %v2836_v3 = vpop.permute.xlu2 %2835 }
 0x6df   : > { %v2609_v7 = vpop.f32.mrf.mxu2 }
 0x6e0   : > { %v5917_v8 = vadd.f32 %v2609_v7, %v2322_v5  ;;  %v2340_v5 = vadd.f32 %v5736_v59, %v2130_v40  ;;  %v4479_v59 = vld [vmem:[%s6704_s10 + $0x2d0] sm:$0xff] }
 0x6e4   : > { %4516 = vmatmul.msk.f32.gmra.mxu2 %vm1012_vm10, %v4472_v11  ;;  %v5973_v11 = vpop.permute.xlu0 %2900 }
 0x6e5   : > { %6737 = vst [vmem:[#allocation21_spill] sm:$0xff] %v5973_v11 }
 0x6e7   : > { %v2612_v15 = vpop.f32.mrf.mxu2 }
 0x6e8   : > { %v5924_v17 = vadd.f32 %v2612_v15, %v2325_v13  ;;  %v2142_v15 = vpop.f32.mrf.mxu1 }
 0x6ec   : > { %4517 = vmatmul.msk.f32.gmra.mxu2 %vm1012_vm10, %v4473_v19  ;;  %v2826_v40 = vpop.permute.xlu0 %2825 }
 0x6ef   : > { %v2615_v23 = vpop.f32.mrf.mxu2 }
 0x6f0   : > { %v5931_v25 = vadd.f32 %v2615_v23, %v2328_v21  ;;  %v5983_v21 = vpop.permute.xlu2 %2895  ;;  %v5988_v23 = vpop.permute.xlu1 %2890 }
 0x6f1   : > { %6738 = vst [vmem:[#allocation22_spill] sm:$0xff] %v5983_v21 }
 0x6f2   : > { %6739 = vst [vmem:[#allocation23_spill] sm:$0xff] %v5988_v23 }
 0x6f4   : > { %4518 = vmatmul.msk.f32.gmra.mxu2 %vm1012_vm10, %v4474_v27  ;;  %v2145_v27 = vpop.f32.mrf.mxu1 }
 0x6f5   : > { %v2355_v51 = vadd.f32 %v5782_v9, %v2145_v27  ;;  %v2346_v9 = vadd.f32 %v5756_v1, %v5951_v44 }
 0x6f7   : > { %v2618_v31 = vpop.f32.mrf.mxu2 }
 0x6f8   : > { %v5940_v33 = vadd.f32 %v2618_v31, %v2331_v29  ;;  %v4480_v31 = vld [vmem:[%s6704_s10 + $0x2d8] sm:$0xff] }
 0x6fc   : > { %4519 = vmatmul.msk.f32.gmra.mxu2 %vm1012_vm10, %v4475_v47  ;;  %v2821_v47 = vpop.permute.xlu2 %2820 }
 0x6ff   : > { %v2621_v46 = vpop.f32.mrf.mxu2 }
 0x700   : > { %v5953_v49 = vadd.f32 %v2621_v46, %v2334_v43  ;;  %v5994_v43 = vpop.permute.xlu0 %2885  ;;  %v2816_v46 = vpop.permute.xlu1 %2815 }
 0x701   : > { %6740 = vst [vmem:[#allocation24_spill] sm:$0xff] %v5994_v43 }
 0x704   : > { %4520 = vmatmul.msk.f32.gmra.mxu2 %vm1012_vm10, %v4476_v50  ;;  %v2148_v50 = vpop.f32.mrf.mxu1 }
 0x707   : > { %v2624_v58 = vpop.f32.mrf.mxu2 }
 0x708   : > { %v5966_v53 = vadd.f32 %v2624_v58, %v2337_v55  ;;  %v4481_v58 = vld [vmem:[%s6704_s10 + $0x2e0] sm:$0xff] }
 0x70c   : > { %4521 = vmatmul.msk.f32.gmra.mxu2 %vm1012_vm10, %v4477_v0  ;;  %v6000_v0 = vpop.permute.xlu2 %2880 }
 0x70d   : > { %6741 = vst [vmem:[#allocation25_spill] sm:$0xff] %v6000_v0  ;;  %v4483_v0 = vld [vmem:[%s6704_s10 + $0x2f0] sm:$0xff] }
 0x70f   : > { %v2627_v7 = vpop.f32.mrf.mxu2 }
 0x710   : > { %v5975_v13 = vadd.f32 %v2627_v7, %v2340_v5  ;;  %v2811_v5 = vpop.permute.xlu0 %2810 }
 0x714   : > { %4522 = vmatmul.msk.f32.gmra.mxu2 %vm1012_vm10, %v4478_v56  ;;  %v6003_v56 = vpop.permute.xlu1 %2875  ;;  %v2806_v43 = vpop.permute.xlu2 %2805 }
 0x715   : > { %6742 = vst [vmem:[#allocation26_spill] sm:$0xff] %v6003_v56 }
 0x717   : > { %v5981_v19 = vpop.f32.mrf.mxu2 }
 0x718   : > { %v6009_v21 = vpop.permute.xlu0 %2870 }
 0x719   : > { %6743 = vst [vmem:[#allocation27_spill] sm:$0xff] %v6009_v21  ;;  %v2358_v21 = vadd.f32 %v5792_v12, %v2148_v50 }
 0x71c   : > { %4523 = vmatmul.msk.f32.gmra.mxu2 %vm1012_vm10, %v4479_v59  ;;  %v2151_v59 = vpop.f32.mrf.mxu1  ;;  %v6017_v60 = vpop.permute.xlu2 %2865 }
 0x71d   : > { %6744 = vst [vmem:[#allocation28_spill] sm:$0xff] %v6017_v60  ;;  %v2352_v60 = vadd.f32 %v5772_v6, %v2142_v15  ;;  %v2361_v41 = vadd.f32 %v5798_v14, %v2151_v59  ;;  %v2343_v6 = vadd.f32 %v5746_v62, %v5937_v42  ;;  %v6039_v15 = vpop.f32.mrf.mxu3 }
 0x71f   : > { %v2633_v29 = vpop.f32.mrf.mxu2 }
 0x720   : > { %v6024_v35 = vpop.permute.xlu0 %2795  ;;  %v2709_v14 = vadd.f32 %v2633_v29, %v2346_v9 }
 0x722   : > { %v2933_v42 = vadd.f32 %v2816_v46, %v2709_v14 }
 0x724   : > { %4524 = vmatmul.msk.f32.gmra.mxu2 %vm1012_vm10, %v4480_v31  ;;  %v4482_v31 = vld [vmem:[%s6704_s10 + $0x2e8] sm:$0xff]  ;;  %v2154_v11 = vpop.f32.mrf.mxu1  ;;  %v2791_v12 = vpop.permute.xlu2 %2790  ;;  %vm2965_vm3 = vcmp.ge.f32.partialorder %v2933_v42, 0.0 }
 0x725   : > { %v6050_v29 = vpop.f32.mrf.mxu3 }
 0x727   : > { %v2636_v55 = vpop.f32.mrf.mxu2 }
 0x72c   : > { %4525 = vmatmul.msk.f32.gmra.mxu2 %vm1012_vm10, %v4481_v58  ;;  %v6014_v58 = vpop.permute.xlu1 %2800 }
 0x72d   : > { %v2930_v46 = vadd.f32 %v6014_v58, %v5966_v53  ;;  %v2928_v53 = vadd.f32 %v2791_v12, %v5940_v33 }
 0x72f   : > { %v2639_v7 = vpop.f32.mrf.mxu2  ;;  %vm2962_vm5 = vcmp.ge.f32.partialorder %v2930_v46, 0.0  ;;  %v2992_v14 = vmul.f32 0.2, %v2928_v53  ;;  %vm2960_vm7 = vcmp.ge.f32.partialorder %v2928_v53, 0.0 }
 0x730   : > { %v2711_v52 = vadd.f32 %v2639_v7, %v2352_v60 }
 0x732   : > { %v2935_v4 = vadd.f32 %v2826_v40, %v2711_v52 }
 0x734   : > { %4526 = vmatmul.msk.f32.gmra.mxu2 %vm1012_vm10, %v4482_v31  ;;  %v4484_v31 = vld [vmem:[%s6704_s10 + $0x2f8] sm:$0xff]  ;;  %v6029_v38 = vpop.permute.xlu1 %2860  ;;  %v2999_v63 = vmul.f32 0.2, %v2935_v4  ;;  %vm2967_vm0 = vcmp.ge.f32.partialorder %v2935_v4, 0.0 }
 0x736   : > { %v3031_v40 = vsel %vm2967_vm0, %v2935_v4, %v2999_v63  ;;  %v2169_v4 = vpop.f32.mrf.mxu3 }
 0x737   : > { %v2642_v23 = vpop.f32.mrf.mxu2 }
 0x738   : > { %v2712_v57 = vadd.f32 %v2642_v23, %v2355_v51  ;;  %v6041_v51 = vpop.permute.xlu0 %2855  ;;  %v2997_v23 = vmul.f32 0.2, %v2933_v42 }
 0x73a   : > { %v2936_v27 = vadd.f32 %v2831_v10, %v2712_v57  ;;  %v6047_v10 = vpop.permute.xlu2 %2850  ;;  %v3029_v59 = vsel %vm2965_vm3, %v2933_v42, %v2997_v23  ;;  %v2379_v23 = vadd.f32 %v5834_v26, %v2169_v4 }
 0x73c   : > { %4527 = vmatmul.msk.f32.gmra.mxu2 %vm1012_vm10, %v4483_v0  ;;  %v2157_v0 = vpop.f32.mrf.mxu1  ;;  %v3000_v57 = vmul.f32 0.2, %v2936_v27  ;;  %v2786_v44 = vpop.permute.xlu1 %2785  ;;  %vm2968_vm15 = vcmp.ge.f32.partialorder %v2936_v27, 0.0 }
 0x73f   : > { %v2645_v56 = vpop.f32.mrf.mxu2 }
 0x740   : > { %v2713_v37 = vadd.f32 %v2645_v56, %v2358_v21  ;;  %v2710_v21 = vadd.f32 %v2636_v55, %v2349_v48 }
 0x742   : > { %v2937_v32 = vadd.f32 %v2836_v3, %v2713_v37  ;;  %v2934_v48 = vadd.f32 %v2821_v47, %v2710_v21  ;;  %v2781_v47 = vpop.permute.xlu0 %2780 }
 0x743   : > { %v2926_v33 = vadd.f32 %v2781_v47, %v5924_v17 }
 0x744   : > { %4528 = vmatmul.msk.f32.gmra.mxu2 %vm1012_vm10, %v4484_v31  ;;  %v3001_v37 = vmul.f32 0.2, %v2937_v32  ;;  %v2315_v1 = vpop.f32.mrf.mxu1  ;;  %vm2969_vm14 = vcmp.ge.f32.partialorder %v2937_v32, 0.0  ;;  %vm2966_vm2 = vcmp.ge.f32.partialorder %v2934_v48, 0.0  ;;  %v6059_v9 = vpop.permute.xlu1 %2845 }
 0x745   : > { %v2316_v21 = vadd.f32 %v2315_v1, %v5863_v36  ;;  %v3024_v1 = vsel %vm2960_vm7, %v2928_v53, %v2992_v14  ;;  %v2990_v17 = vmul.f32 0.2, %v2926_v33  ;;  %vm2958_vm9 = vcmp.ge.f32.partialorder %v2926_v33, 0.0 }
 0x746   : > { %v3033_v52 = vsel %vm2969_vm14, %v2937_v32, %v3001_v37  ;;  %v2367_v32 = vadd.f32 %v5810_v18, %v2157_v0  ;;  %v2994_v0 = vmul.f32 0.2, %v2930_v46 }
 0x747   : > { %v2648_v45 = vpop.f32.mrf.mxu2  ;;  %v2699_v36 = vadd.f32 %v5904_v61, %v2316_v21 }
 0x748   : > { %v2714_v30 = vadd.f32 %v2648_v45, %v2361_v41  ;;  %v2364_v41 = vadd.f32 %v5804_v16, %v2154_v11  ;;  %v2708_v45 = vadd.f32 %v5981_v19, %v2343_v6  ;;  %v3032_v16 = vsel %vm2968_vm15, %v2936_v27, %v3000_v57  ;;  %v2776_v6 = vpop.permute.xlu2 %2775 }
 0x749   : > { %v2998_v11 = vmul.f32 0.2, %v2934_v48  ;;  %v2931_v19 = vadd.f32 %v2806_v43, %v5975_v13  ;;  %v2929_v13 = vadd.f32 %v6024_v35, %v5953_v49  ;;  %v2927_v35 = vadd.f32 %v2786_v44, %v5931_v25 }
 0x74a   : > { %v2938_v50 = vadd.f32 %v5961_v54, %v2714_v30  ;;  %v2932_v3 = vadd.f32 %v2811_v5, %v2708_v45  ;;  %v3026_v12 = vsel %vm2962_vm5, %v2930_v46, %v2994_v0  ;;  %v2925_v25 = vadd.f32 %v2776_v6, %v5917_v8 }
 0x74b   : > { %v3030_v55 = vsel %vm2966_vm2, %v2934_v48, %v2998_v11  ;;  %v2995_v31 = vmul.f32 0.2, %v2931_v19  ;;  %vm2963_vm4 = vcmp.ge.f32.partialorder %v2931_v19, 0.0  ;;  %v2993_v27 = vmul.f32 0.2, %v2929_v13 }
 0x74c   : > { %v3002_v60 = vmul.f32 0.2, %v2938_v50  ;;  %vm2970_vm13 = vcmp.ge.f32.partialorder %v2938_v50, 0.0  ;;  %v2996_v5 = vmul.f32 0.2, %v2932_v3  ;;  %v2318_v7 = vpop.f32.mrf.mxu1  ;;  %vm2964_vm1 = vcmp.ge.f32.partialorder %v2932_v3, 0.0  ;;  %v2766_v45 = vpop.permute.xlu1 %2765 }
 0x74d   : > { %v2319_v18 = vadd.f32 %v2318_v7, %v5872_v39  ;;  %v3027_v49 = vsel %vm2963_vm4, %v2931_v19, %v2995_v31  ;;  %vm2961_vm6 = vcmp.ge.f32.partialorder %v2929_v13, 0.0  ;;  %vm2959_vm8 = vcmp.ge.f32.partialorder %v2927_v35, 0.0 }
 0x74e   : > { %v3034_v30 = vsel %vm2970_vm13, %v2938_v50, %v3002_v60  ;;  %v3028_v58 = vsel %vm2964_vm1, %v2932_v3, %v2996_v5  ;;  %v2370_v50 = vadd.f32 %v5816_v20, %v6019_v34  ;;  %v3025_v20 = vsel %vm2961_vm6, %v2929_v13, %v2993_v27  ;;  %v2172_v3 = vpop.f32.mrf.mxu3 }
 0x74f   : > { %v2651_v62 = vpop.f32.mrf.mxu2  ;;  %3179 = vmatpush.msrb.mxu0 %v3034_v30  ;;  %v2700_v39 = vadd.f32 %v5910_v2, %v2319_v18  ;;  %v2991_v34 = vmul.f32 0.2, %v2927_v35  ;;  %v2923_v48 = vadd.f32 %v2766_v45, %v2699_v36  ;;  %v2989_v30 = vmul.f32 0.2, %v2925_v25  ;;  %v6748_v36 = vld [vmem:[#allocation14_spill] sm:$0xff]  ;;  %v6751_v45 = vld [vmem:[#allocation12_spill] sm:$0xff] }
 0x750   : > { %v6045_v54 = vadd.f32 %v2651_v62, %v2364_v41  ;;  %v2771_v41 = vpop.permute.xlu0 %2770  ;;  %vm2957_vm11 = vcmp.ge.f32.partialorder %v2925_v25, 0.0  ;;  %v2373_v8 = vadd.f32 %v5822_v22, %v6039_v15  ;;  %v3022_v57 = vsel %vm2958_vm9, %v2926_v33, %v2990_v17 }
 0x751   : > { %3180 = vmatpush.msrb.mxu0 %v3033_v52  ;;  %v2924_v2 = vadd.f32 %v2771_v41, %v2700_v39  ;;  %v3023_v61 = vsel %vm2959_vm8, %v2927_v35, %v2991_v34  ;;  %v3021_v52 = vsel %vm2957_vm11, %v2925_v25, %v2989_v30  ;;  %v2987_v63 = vmul.f32 0.2, %v2923_v48  ;;  %v6750_v41 = vld [vmem:[#allocation16_spill] sm:$0xff]  ;;  %v6752_v30 = vld [vmem:[#allocation18_spill] sm:$0xff] }
 0x752   : > { %vm2955_vm13 = vcmp.ge.f32.partialorder %v2923_v48, 0.0  ;;  %v2376_v19 = vadd.f32 %v5828_v24, %v6050_v29  ;;  %v6746_v29 = vld [vmem:[#allocation9_spill] sm:$0xff] }
 0x753   : > { %3181 = vmatpush.msrb.mxu0 %v3032_v16  ;;  %v2988_v44 = vmul.f32 0.2, %v2924_v2  ;;  %vm2956_vm12 = vcmp.ge.f32.partialorder %v2924_v2, 0.0  ;;  %v3019_v11 = vsel %vm2955_vm13, %v2923_v48, %v2987_v63  ;;  %v6754_v63 = vld [vmem:[#allocation19_spill] sm:$0xff] }
 0x755   : > { %3182 = vmatpush.msrb.mxu0 %v3031_v40  ;;  %v3020_v16 = vsel %vm2956_vm12, %v2924_v2, %v2988_v44  ;;  %v6753_v44 = vld [vmem:[#allocation11_spill] sm:$0xff] }
 0x756   : > { %v2175_v40 = vpop.f32.mrf.mxu3 }
 0x757   : > { %v2654_v56 = vpop.f32.mrf.mxu2  ;;  %3183 = vmatpush.msrb.mxu0 %v3030_v55  ;;  %v2382_v55 = vadd.f32 %v5840_v28, %v2172_v3 }
 0x758   : > { %v6057_v43 = vadd.f32 %v2654_v56, %v2367_v32  ;;  %v6745_v56 = vld [vmem:[#allocation8_spill] sm:$0xff] }
 0x759   : > { %3184 = vmatpush.msrb.mxu0 %v3029_v59  ;;  %v2385_v13 = vadd.f32 %v6745_v56, %v2175_v40  ;;  %v6758_v56 = vld [vmem:[#allocation21_spill] sm:$0xff] }
 0x75b   : > { %3185 = vmatpush.msrb.mxu0 %v3028_v58 }
 0x75d   : > { %3186 = vmatpush.msrb.mxu0 %v3027_v49 }
 0x75e   : > { %v2178_v46 = vpop.f32.mrf.mxu3 }
 0x75f   : > { %v2657_v60 = vpop.f32.mrf.mxu2  ;;  %3187 = vmatpush.msrb.mxu0 %v3026_v12  ;;  %v2388_v18 = vadd.f32 %v6746_v29, %v2178_v46  ;;  %v6747_v12 = vld [vmem:[#allocation15_spill] sm:$0xff] }
 0x760   : > { %v6071_v37 = vadd.f32 %v2657_v60, %v2370_v50 }
 0x761   : > { %3188 = vmatpush.msrb.mxu0 %v3025_v20  ;;  %v6749_v20 = vld [vmem:[#allocation13_spill] sm:$0xff] }
 0x763   : > { %3189 = vmatpush.msrb.mxu0 %v3024_v1 }
 0x765   : > { %3190 = vmatpush.msrb.mxu0 %v3023_v61 }
 0x766   : > { %v2181_v59 = vpop.f32.mrf.mxu3 }
 0x767   : > { %v2660_v62 = vpop.f32.mrf.mxu2  ;;  %3191 = vmatpush.msrb.mxu0 %v3022_v57 }
 0x768   : > { %v6075_v42 = vadd.f32 %v2660_v62, %v2373_v8 }
 0x769   : > { %3192 = vmatpush.msrb.mxu0 %v3021_v52 }
 0x76b   : > { %3193 = vmatpush.msrb.mxu0 %v3020_v16  ;;  %v6755_v16 = vld [vmem:[#allocation17_spill] sm:$0xff] }
 0x76d   : > { %3194 = vmatpush.msrb.mxu0 %v3019_v11 }
 0x76e   : > { %v2184_v0 = vpop.f32.mrf.mxu3 }
 0x76f   : > { %v2663_v22 = vpop.f32.mrf.mxu2  ;;  %v2394_v62 = vadd.f32 %v6753_v44, %v2184_v0  ;;  %v2940_v44 = vadd.f32 %v6047_v10, %v6057_v43 }
 0x770   : > { %v6079_v15 = vadd.f32 %v2663_v22, %v2376_v19  ;;  %v6756_v19 = vld [vmem:[#allocation10_spill] sm:$0xff] }
 0x771   : > { %v2391_v22 = vadd.f32 %v6756_v19, %v2181_v59  ;;  %v6759_v59 = vld [vmem:[#allocation22_spill] sm:$0xff]  ;;  %vm2972_vm13 = vcmp.ge.f32.partialorder %v2940_v44, 0.0  ;;  %v3054_v19 = vld [vmem:[%s6707_s13 + $0x18] sm:$0xff] }
 0x776   : > { %v2187_v21 = vpop.f32.mrf.mxu3 }
 0x777   : > { %v2666_v47 = vpop.f32.mrf.mxu2  ;;  %v2397_v48 = vadd.f32 %v6751_v45, %v2187_v21 }
 0x778   : > { %v6082_v32 = vadd.f32 %v2666_v47, %v2379_v23  ;;  %v6757_v23 = vld [vmem:[#allocation20_spill] sm:$0xff] }
 0x77e   : > { %v2190_v49 = vpop.f32.mrf.mxu3 }
 0x77f   : > { %v2669_v5 = vpop.f32.mrf.mxu2  ;;  %v2400_v34 = vadd.f32 %v6749_v20, %v2190_v49 }
 0x780   : > { %v6085_v7 = vadd.f32 %v2669_v5, %v2382_v55 }
 0x786   : > { %v2193_v50 = vpop.f32.mrf.mxu3 }
 0x787   : > { %v2672_v31 = vpop.f32.mrf.mxu2  ;;  %v2403_v60 = vadd.f32 %v6748_v36, %v2193_v50  ;;  %v6761_v50 = vld [vmem:[#allocation24_spill] sm:$0xff]  ;;  %v3053_v36 = vld [vmem:[%s6707_s13 + $0x10] sm:$0xff] }
 0x788   : > { %v2722_v24 = vadd.f32 %v2672_v31, %v2385_v13 }
 0x78e   : > { %v2196_v39 = vpop.f32.mrf.mxu3 }
 0x78f   : > { %v2675_v53 = vpop.f32.mrf.mxu2  ;;  %v2406_v14 = vadd.f32 %v6747_v12, %v2196_v39 }
 0x790   : > { %v2723_v58 = vadd.f32 %v2675_v53, %v2388_v18  ;;  %v3051_v18 = vld [vmem:[%s6707_s13] sm:$0xff] }
 0x791   : > { %3195 = vmatmul.f32.vlgmr.msrb.gmra.mxu0 %v3051_v18  ;;  %v3066_v18 = vld [vmem:[%s6707_s13 + $0x78] sm:$0xff] }
 0x796   : > { %v2199_v4 = vpop.f32.mrf.mxu3 }
 0x797   : > { %v2678_v26 = vpop.f32.mrf.mxu2  ;;  %v2409_v2 = vadd.f32 %v6750_v41, %v2199_v4 }
 0x798   : > { %v2724_v5 = vadd.f32 %v2678_v26, %v2391_v22  ;;  %v3061_v22 = vld [vmem:[%s6707_s13 + $0x50] sm:$0xff] }
 0x799   : > { %3198 = vmatmul.f32.gmra.mxu0 %v3053_v36  ;;  %v3598_v36 = vld [vmem:[%s6708_s14 + $0x8] sm:$0xff] }
 0x79f   : > { %v2681_v35 = vpop.f32.mrf.mxu2 }
 0x7a0   : > { %v2725_v40 = vadd.f32 %v2681_v35, %v2394_v62  ;;  %v6760_v35 = vld [vmem:[#allocation23_spill] sm:$0xff]  ;;  %v2939_v62 = vadd.f32 %v6059_v9, %v6045_v54  ;;  %v3052_v54 = vld [vmem:[%s6707_s13 + $0x8] sm:$0xff] }
 0x7a1   : > { %v2948_v49 = vadd.f32 %v6760_v35, %v2724_v5  ;;  %v3067_v5 = vld [vmem:[%s6707_s13 + $0x80] sm:$0xff]  ;;  %v3077_v35 = vld [vmem:[%s6707_s13 + $0xd0] sm:$0xff] }
 0x7a2   : > { %v2949_v53 = vadd.f32 %v6759_v59, %v2725_v40  ;;  %v3003_v43 = vmul.f32 0.2, %v2939_v62  ;;  %v3056_v40 = vld [vmem:[%s6707_s13 + $0x28] sm:$0xff]  ;;  %v3073_v59 = vld [vmem:[%s6707_s13 + $0xb0] sm:$0xff] }
 0x7a3   : > { %v3012_v4 = vmul.f32 0.2, %v2948_v49  ;;  %vm2980_vm4 = vcmp.ge.f32.partialorder %v2948_v49, 0.0 }
 0x7a4   : > { %v3013_v39 = vmul.f32 0.2, %v2949_v53  ;;  %vm2981_vm1 = vcmp.ge.f32.partialorder %v2949_v53, 0.0 }
 0x7a6   : > { %v3045_v20 = vsel %vm2981_vm1, %v2949_v53, %v3013_v39  ;;  %v3068_v53 = vld [vmem:[%s6707_s13 + $0x88] sm:$0xff]  ;;  %v3081_v39 = vld [vmem:[%s6707_s13 + $0xf0] sm:$0xff] }
 0x7a7   : > { %v2684_v27 = vpop.f32.mrf.mxu2 }
 0x7a8   : > { %v2726_v52 = vadd.f32 %v2684_v27, %v2397_v48 }
 0x7aa   : > { %v2950_v13 = vadd.f32 %v6758_v56, %v2726_v52  ;;  %v3062_v56 = vld [vmem:[%s6707_s13 + $0x58] sm:$0xff] }
 0x7ac   : > { %v3014_v27 = vmul.f32 0.2, %v2950_v13  ;;  %vm2982_vm3 = vcmp.ge.f32.partialorder %v2950_v13, 0.0 }
 0x7af   : > { %v2687_v28 = vpop.f32.mrf.mxu2 }
 0x7b0   : > { %v2727_v61 = vadd.f32 %v2687_v28, %v2400_v34  ;;  %v2947_v28 = vadd.f32 %v6761_v50, %v2723_v58  ;;  %v6764_v34 = vld [vmem:[#allocation27_spill] sm:$0xff] }
 0x7b1   : > { %v2944_v41 = vadd.f32 %v6764_v34, %v6082_v32  ;;  %v3055_v32 = vld [vmem:[%s6707_s13 + $0x20] sm:$0xff]  ;;  %v3074_v50 = vld [vmem:[%s6707_s13 + $0xb8] sm:$0xff] }
 0x7b2   : > { %v2951_v47 = vadd.f32 %v6757_v23, %v2727_v61  ;;  %v3011_v58 = vmul.f32 0.2, %v2947_v28  ;;  %vm2979_vm5 = vcmp.ge.f32.partialorder %v2947_v28, 0.0  ;;  %3201 = vmatmul.f32.gmra.mxu0 %v3055_v32  ;;  %v3063_v23 = vld [vmem:[%s6707_s13 + $0x60] sm:$0xff] }
 0x7b3   : > { %vm2976_vm8 = vcmp.ge.f32.partialorder %v2944_v41, 0.0 }
 0x7b4   : > { %v3015_v21 = vmul.f32 0.2, %v2951_v47  ;;  %vm2983_vm2 = vcmp.ge.f32.partialorder %v2951_v47, 0.0  ;;  %v3043_v45 = vsel %vm2979_vm5, %v2947_v28, %v3011_v58  ;;  %v3603_v28 = vld [vmem:[%s6708_s14 + $0x30] sm:$0xff]  ;;  %v3078_v58 = vld [vmem:[%s6707_s13 + $0xd8] sm:$0xff] }
 0x7b7   : > { %v2690_v6 = vpop.f32.mrf.mxu2 }
 0x7b8   : > { %v2728_v1 = vadd.f32 %v2690_v6, %v2403_v60  ;;  %v3047_v6 = vsel %vm2983_vm2, %v2951_v47, %v3015_v21  ;;  %v6763_v60 = vld [vmem:[#allocation26_spill] sm:$0xff]  ;;  %v3058_v47 = vld [vmem:[%s6707_s13 + $0x38] sm:$0xff] }
 0x7b9   : > { %v3070_v21 = vld [vmem:[%s6707_s13 + $0x98] sm:$0xff] }
 0x7ba   : > { %v2952_v3 = vadd.f32 %v6754_v63, %v2728_v1  ;;  %v6765_v1 = vld [vmem:[#allocation28_spill] sm:$0xff] }
 0x7bc   : > { %v3016_v29 = vmul.f32 0.2, %v2952_v3  ;;  %vm2984_vm0 = vcmp.ge.f32.partialorder %v2952_v3, 0.0 }
 0x7be   : > { %v3048_v26 = vsel %vm2984_vm0, %v2952_v3, %v3016_v29  ;;  %v3071_v29 = vld [vmem:[%s6707_s13 + $0xa0] sm:$0xff] }
 0x7bf   : > { %v2693_v33 = vpop.f32.mrf.mxu2 }
 0x7c0   : > { %v2729_v25 = vadd.f32 %v2693_v33, %v2406_v14  ;;  %v6762_v33 = vld [vmem:[#allocation25_spill] sm:$0xff]  ;;  %v3046_v14 = vsel %vm2982_vm3, %v2950_v13, %v3014_v27  ;;  %v3069_v13 = vld [vmem:[%s6707_s13 + $0x90] sm:$0xff]  ;;  %v3604_v27 = vld [vmem:[%s6708_s14 + $0x38] sm:$0xff] }
 0x7c1   : > { %v2946_v12 = vadd.f32 %v6762_v33, %v2722_v24  ;;  %v3044_v24 = vsel %vm2980_vm4, %v2948_v49, %v3012_v4  ;;  %v3072_v49 = vld [vmem:[%s6707_s13 + $0xa8] sm:$0xff]  ;;  %3805 = vmatpush.msra.mxu1 %v3604_v27  ;;  %v3601_v33 = vld [vmem:[%s6708_s14 + $0x20] sm:$0xff]  ;;  %v3599_v4 = vld [vmem:[%s6708_s14 + $0x10] sm:$0xff] }
 0x7c2   : > { %v2953_v8 = vadd.f32 %v6752_v30, %v2729_v25  ;;  %v2945_v25 = vadd.f32 %v6763_v60, %v6085_v7  ;;  %v2942_v7 = vadd.f32 %v6029_v38, %v6075_v42  ;;  %v3008_v30 = vmul.f32 0.2, %v2944_v41 }
 0x7c3   : > { %vm2978_vm6 = vcmp.ge.f32.partialorder %v2946_v12, 0.0  ;;  %3806 = vmatpush.msra.mxu1 %v3603_v28  ;;  %v3107_v28 = vld [vmem:[%s6707_s13 + $0x1c0] sm:$0xff] }
 0x7c4   : > { %v3017_v55 = vmul.f32 0.2, %v2953_v8  ;;  %vm2985_vm15 = vcmp.ge.f32.partialorder %v2953_v8, 0.0  ;;  %v3009_v48 = vmul.f32 0.2, %v2945_v25  ;;  %vm2977_vm7 = vcmp.ge.f32.partialorder %v2945_v25, 0.0 }
 0x7c5   : > { %v3040_v38 = vsel %vm2976_vm8, %v2944_v41, %v3008_v30  ;;  %v3006_v42 = vmul.f32 0.2, %v2942_v7  ;;  %vm2974_vm11 = vcmp.ge.f32.partialorder %v2942_v7, 0.0  ;;  %v3085_v41 = vld [vmem:[%s6707_s13 + $0x110] sm:$0xff] }
 0x7c6   : > { %v3049_v0 = vsel %vm2985_vm15, %v2953_v8, %v3017_v55  ;;  %v2941_v8 = vadd.f32 %v6041_v51, %v6071_v37  ;;  %v3004_v51 = vmul.f32 0.2, %v2940_v44  ;;  %v3057_v37 = vld [vmem:[%s6707_s13 + $0x30] sm:$0xff]  ;;  %v3060_v55 = vld [vmem:[%s6707_s13 + $0x48] sm:$0xff] }
 0x7c7   : > { %v2696_v17 = vpop.f32.mrf.mxu2  ;;  %v3038_v3 = vsel %vm2974_vm11, %v2942_v7, %v3006_v42  ;;  %3204 = vmatmul.f32.gmra.mxu0 %v3057_v37  ;;  %v3084_v7 = vld [vmem:[%s6707_s13 + $0x108] sm:$0xff]  ;;  %v3093_v42 = vld [vmem:[%s6707_s13 + $0x150] sm:$0xff]  ;;  %v3090_v37 = vld [vmem:[%s6707_s13 + $0x138] sm:$0xff] }
 0x7c8   : > { %v2730_v57 = vadd.f32 %v2696_v17, %v2409_v2  ;;  %v3010_v2 = vmul.f32 0.2, %v2946_v12  ;;  %v2943_v17 = vadd.f32 %v6765_v1, %v6079_v15  ;;  %v3041_v15 = vsel %vm2977_vm7, %v2945_v25, %v3009_v48  ;;  %v3597_v25 = vld [vmem:[%s6708_s14] sm:$0xff]  ;;  %v3089_v48 = vld [vmem:[%s6707_s13 + $0x130] sm:$0xff] }
 0x7c9   : > { %v3005_v63 = vmul.f32 0.2, %v2941_v8  ;;  %vm2973_vm12 = vcmp.ge.f32.partialorder %v2941_v8, 0.0  ;;  %v3087_v1 = vld [vmem:[%s6707_s13 + $0x120] sm:$0xff] }
 0x7ca   : > { %v2954_v11 = vadd.f32 %v6755_v16, %v2730_v57  ;;  %v3042_v61 = vsel %vm2978_vm6, %v2946_v12, %v3010_v2  ;;  %v3007_v57 = vmul.f32 0.2, %v2943_v17  ;;  %vm2975_vm9 = vcmp.ge.f32.partialorder %v2943_v17, 0.0  ;;  %v3600_v12 = vld [vmem:[%s6708_s14 + $0x18] sm:$0xff] }
 0x7cb   : > { %v3037_v10 = vsel %vm2973_vm12, %v2941_v8, %v3005_v63  ;;  %v3036_v16 = vsel %vm2972_vm13, %v2940_v44, %v3004_v51  ;;  %v3091_v8 = vld [vmem:[%s6707_s13 + $0x140] sm:$0xff] }
 0x7cc   : > { %v3018_v46 = vmul.f32 0.2, %v2954_v11  ;;  %vm2986_vm14 = vcmp.ge.f32.partialorder %v2954_v11, 0.0  ;;  %v3039_v52 = vsel %vm2975_vm9, %v2943_v17, %v3007_v57  ;;  %v3082_v17 = vld [vmem:[%s6707_s13 + $0xf8] sm:$0xff]  ;;  %v3095_v51 = vld [vmem:[%s6707_s13 + $0x160] sm:$0xff] }
 0x7ce   : > { %v3050_v31 = vsel %vm2986_vm14, %v2954_v11, %v3018_v46  ;;  %vm2971_vm14 = vcmp.ge.f32.partialorder %v2939_v62, 0.0  ;;  %v3059_v11 = vld [vmem:[%s6707_s13 + $0x40] sm:$0xff]  ;;  %v3065_v46 = vld [vmem:[%s6707_s13 + $0x70] sm:$0xff] }
 0x7cf   : > { %3388 = vmatpush.msrb.mxu3 %v3050_v31  ;;  %v3035_v9 = vsel %vm2971_vm14, %v2939_v62, %v3003_v43  ;;  %3207 = vmatmul.f32.gmra.mxu0 %v3059_v11  ;;  %v3064_v31 = vld [vmem:[%s6707_s13 + $0x68] sm:$0xff] }
 0x7d0   : > { %v3088_v62 = vld [vmem:[%s6707_s13 + $0x128] sm:$0xff] }
 0x7d1   : > { %3389 = vmatpush.msrb.mxu3 %v3049_v0  ;;  %v3075_v0 = vld [vmem:[%s6707_s13 + $0xc0] sm:$0xff] }
 0x7d3   : > { %3390 = vmatpush.msrb.mxu3 %v3048_v26  ;;  %v3079_v26 = vld [vmem:[%s6707_s13 + $0xe0] sm:$0xff] }
 0x7d5   : > { %3391 = vmatpush.msrb.mxu3 %v3047_v6  ;;  %v3602_v6 = vld [vmem:[%s6708_s14 + $0x28] sm:$0xff] }
 0x7d6   : > { %3807 = vmatpush.msra.mxu1 %v3602_v6  ;;  %v3102_v6 = vld [vmem:[%s6707_s13 + $0x198] sm:$0xff] }
 0x7d7   : > { %3392 = vmatpush.msrb.mxu3 %v3046_v14  ;;  %3210 = vmatmul.f32.gmra.mxu0 %v3061_v22  ;;  %v3076_v14 = vld [vmem:[%s6707_s13 + $0xc8] sm:$0xff] }
 0x7d8   : > { %3808 = vmatpush.msra.mxu1 %v3601_v33 }
 0x7d9   : > { %3393 = vmatpush.msrb.mxu3 %v3045_v20  ;;  %v3083_v20 = vld [vmem:[%s6707_s13 + $0x100] sm:$0xff] }
 0x7da   : > { %3809 = vmatpush.msra.mxu1 %v3600_v12 }
 0x7db   : > { %3394 = vmatpush.msrb.mxu3 %v3044_v24  ;;  %v3080_v24 = vld [vmem:[%s6707_s13 + $0xe8] sm:$0xff] }
 0x7dc   : > { %3810 = vmatpush.msra.mxu1 %v3599_v4  ;;  %v3104_v4 = vld [vmem:[%s6707_s13 + $0x1a8] sm:$0xff] }
 0x7dd   : > { %3395 = vmatpush.msrb.mxu3 %v3043_v45 }
 0x7de   : > { %3811 = vmatpush.msra.mxu1 %v3598_v36 }
 0x7df   : > { %3396 = vmatpush.msrb.mxu3 %v3042_v61  ;;  %3213 = vmatmul.f32.gmra.mxu0 %v3063_v23  ;;  %v3094_v23 = vld [vmem:[%s6707_s13 + $0x158] sm:$0xff] }
 0x7e0   : > { %3812 = vmatpush.msra.mxu1 %v3597_v25 }
 0x7e1   : > { %3397 = vmatpush.msrb.mxu3 %v3041_v15  ;;  %v3086_v15 = vld [vmem:[%s6707_s13 + $0x118] sm:$0xff] }
 0x7e3   : > { %3398 = vmatpush.msrb.mxu3 %v3040_v38 }
 0x7e5   : > { %3399 = vmatpush.msrb.mxu3 %v3039_v52 }
 0x7e7   : > { %3400 = vmatpush.msrb.mxu3 %v3038_v3  ;;  %3216 = vmatmul.f32.gmra.mxu0 %v3065_v46 }
 0x7e9   : > { %3401 = vmatpush.msrb.mxu3 %v3037_v10 }
 0x7eb   : > { %3402 = vmatpush.msrb.mxu3 %v3036_v16 }
 0x7ed   : > { %3403 = vmatpush.msrb.mxu3 %v3035_v9  ;;  %v3092_v9 = vld [vmem:[%s6707_s13 + $0x148] sm:$0xff] }
 0x7ee   : > { %3404 = vmatmul.f32.vlgmr.msrb.gmra.mxu3 %v3052_v54  ;;  %v3097_v54 = vld [vmem:[%s6707_s13 + $0x170] sm:$0xff] }
 0x7ef   : > { %3219 = vmatmul.f32.gmra.mxu0 %v3067_v5  ;;  %v3101_v5 = vld [vmem:[%s6707_s13 + $0x190] sm:$0xff] }
 0x7f6   : > { %3407 = vmatmul.f32.gmra.mxu3 %v3054_v19 }
 0x7f7   : > { %3222 = vmatmul.f32.gmra.mxu0 %v3069_v13 }
 0x7fe   : > { %3410 = vmatmul.f32.gmra.mxu3 %v3056_v40  ;;  %v3099_v40 = vld [vmem:[%s6707_s13 + $0x180] sm:$0xff] }
 0x7ff   : > { %3225 = vmatmul.f32.gmra.mxu0 %v3071_v29 }
 0x806   : > { %3413 = vmatmul.f32.gmra.mxu3 %v3058_v47 }
 0x807   : > { %3228 = vmatmul.f32.gmra.mxu0 %v3073_v59  ;;  %v3098_v59 = vld [vmem:[%s6707_s13 + $0x178] sm:$0xff] }
 0x80e   : > { %3416 = vmatmul.f32.gmra.mxu3 %v3060_v55  ;;  %v3196_v60 = vpop.f32.mrf.mxu0 }
 0x80f   : > { %3231 = vmatmul.f32.gmra.mxu0 %v3075_v0 }
 0x816   : > { %3419 = vmatmul.f32.gmra.mxu3 %v3062_v56  ;;  %v3199_v34 = vpop.f32.mrf.mxu0  ;;  %v3096_v56 = vld [vmem:[%s6707_s13 + $0x168] sm:$0xff] }
 0x817   : > { %3234 = vmatmul.f32.gmra.mxu0 %v3077_v35  ;;  %v3105_v35 = vld [vmem:[%s6707_s13 + $0x1b0] sm:$0xff] }
 0x81e   : > { %3422 = vmatmul.f32.gmra.mxu3 %v3064_v31 }
 0x81f   : > { %3237 = vmatmul.f32.gmra.mxu0 %v3079_v26 }
 0x826   : > { %3425 = vmatmul.f32.gmra.mxu3 %v3066_v18  ;;  %v3103_v18 = vld [vmem:[%s6707_s13 + $0x1a0] sm:$0xff] }
 0x827   : > { %3240 = vmatmul.f32.gmra.mxu0 %v3081_v39 }
 0x82e   : > { %3428 = vmatmul.f32.gmra.mxu3 %v3068_v53 }
 0x82f   : > { %3243 = vmatmul.f32.gmra.mxu0 %v3083_v20  ;;  %v3202_v2 = vpop.f32.mrf.mxu0  ;;  %v3111_v20 = vld [vmem:[%s6707_s13 + $0x1e0] sm:$0xff] }
 0x836   : > { %3431 = vmatmul.f32.gmra.mxu3 %v3070_v21 }
 0x837   : > { %3246 = vmatmul.f32.gmra.mxu0 %v3085_v41 }
 0x83e   : > { %3434 = vmatmul.f32.gmra.mxu3 %v3072_v49  ;;  %v3100_v49 = vld [vmem:[%s6707_s13 + $0x188] sm:$0xff] }
 0x83f   : > { %3249 = vmatmul.f32.gmra.mxu0 %v3087_v1  ;;  %v3108_v1 = vld [vmem:[%s6707_s13 + $0x1c8] sm:$0xff] }
 0x844   : > { %v3205_v45 = vpop.f32.mrf.mxu0 }
 0x846   : > { %3437 = vmatmul.f32.gmra.mxu3 %v3074_v50 }
 0x847   : > { %3252 = vmatmul.f32.gmra.mxu0 %v3089_v48 }
 0x84c   : > { %v3208_v61 = vpop.f32.mrf.mxu0 }
 0x84e   : > { %3440 = vmatmul.f32.gmra.mxu3 %v3076_v14  ;;  %v3109_v14 = vld [vmem:[%s6707_s13 + $0x1d0] sm:$0xff] }
 0x84f   : > { %3255 = vmatmul.f32.gmra.mxu0 %v3091_v8 }
 0x854   : > { %v3211_v57 = vpop.f32.mrf.mxu0 }
 0x856   : > { %3443 = vmatmul.f32.gmra.mxu3 %v3078_v58  ;;  %v3106_v58 = vld [vmem:[%s6707_s13 + $0x1b8] sm:$0xff] }
 0x857   : > { %3258 = vmatmul.f32.gmra.mxu0 %v3093_v42 }
 0x85c   : > { %v3214_v52 = vpop.f32.mrf.mxu0 }
 0x85e   : > { %3446 = vmatmul.f32.gmra.mxu3 %v3080_v24 }
 0x85f   : > { %3261 = vmatmul.f32.gmra.mxu0 %v3095_v51 }
 0x864   : > { %v3217_v10 = vpop.f32.mrf.mxu0 }
 0x866   : > { %3449 = vmatmul.f32.gmra.mxu3 %v3082_v17 }
 0x867   : > { %3264 = vmatmul.f32.gmra.mxu0 %v3097_v54 }
 0x86c   : > { %v3220_v11 = vpop.f32.mrf.mxu0 }
 0x86e   : > { %3452 = vmatmul.f32.gmra.mxu3 %v3084_v7  ;;  %v3115_v7 = vld [vmem:[%s6707_s13 + $0x200] sm:$0xff] }
 0x86f   : > { %3267 = vmatmul.f32.gmra.mxu0 %v3099_v40 }
 0x871   : > { %v3405_v30 = vpop.f32.mrf.mxu3 }
 0x872   : > { %v3406_v32 = vadd.f32 %v3405_v30, %v3196_v60 }
 0x874   : > { %4529 = vmatmul.msk.f32.vlgmr.msra.gmra.mxu1 %vm1012_vm10, %v3406_v32  ;;  %v3223_v47 = vpop.f32.mrf.mxu0 }
 0x876   : > { %3455 = vmatmul.f32.gmra.mxu3 %v3086_v15  ;;  %v3117_v15 = vld [vmem:[%s6707_s13 + $0x210] sm:$0xff] }
 0x877   : > { %3270 = vmatmul.f32.gmra.mxu0 %v3101_v5 }
 0x879   : > { %v3408_v44 = vpop.f32.mrf.mxu3 }
 0x87a   : > { %v3409_v38 = vadd.f32 %v3408_v44, %v3199_v34 }
 0x87c   : > { %4530 = vmatmul.msk.f32.gmra.mxu1 %vm1012_vm10, %v3409_v38  ;;  %v3226_v13 = vpop.f32.mrf.mxu0 }
 0x87e   : > { %3458 = vmatmul.f32.gmra.mxu3 %v3088_v62  ;;  %v3119_v62 = vld [vmem:[%s6707_s13 + $0x220] sm:$0xff] }
 0x87f   : > { %3273 = vmatmul.f32.gmra.mxu0 %v3103_v18  ;;  %v3122_v18 = vld [vmem:[%s6707_s13 + $0x238] sm:$0xff] }
 0x881   : > { %v3411_v63 = vpop.f32.mrf.mxu3 }
 0x882   : > { %v3412_v3 = vadd.f32 %v3411_v63, %v3202_v2  ;;  %v3113_v2 = vld [vmem:[%s6707_s13 + $0x1f0] sm:$0xff] }
 0x884   : > { %4531 = vmatmul.msk.f32.gmra.mxu1 %vm1012_vm10, %v3412_v3  ;;  %v3229_v53 = vpop.f32.mrf.mxu0 }
 0x886   : > { %3461 = vmatmul.f32.gmra.mxu3 %v3090_v37  ;;  %v3121_v37 = vld [vmem:[%s6707_s13 + $0x230] sm:$0xff] }
 0x887   : > { %3276 = vmatmul.f32.gmra.mxu0 %v3105_v35  ;;  %v3129_v35 = vld [vmem:[%s6707_s13 + $0x270] sm:$0xff] }
 0x889   : > { %v3414_v43 = vpop.f32.mrf.mxu3 }
 0x88a   : > { %v3415_v16 = vadd.f32 %v3414_v43, %v3205_v45 }
 0x88c   : > { %4532 = vmatmul.msk.f32.gmra.mxu1 %vm1012_vm10, %v3415_v16  ;;  %v3232_v26 = vpop.f32.mrf.mxu0 }
 0x88e   : > { %3464 = vmatmul.f32.gmra.mxu3 %v3092_v9 }
 0x88f   : > { %3279 = vmatmul.f32.gmra.mxu0 %v3107_v28 }
 0x891   : > { %v3417_v19 = vpop.f32.mrf.mxu3 }
 0x892   : > { %v3418_v22 = vadd.f32 %v3417_v19, %v3208_v61  ;;  %v3110_v61 = vld [vmem:[%s6707_s13 + $0x1d8] sm:$0xff] }
 0x893   : > { %v3118_v19 = vld [vmem:[%s6707_s13 + $0x218] sm:$0xff] }
 0x894   : > { %4533 = vmatmul.msk.f32.gmra.mxu1 %vm1012_vm10, %v3418_v22  ;;  %v3235_v39 = vpop.f32.mrf.mxu0 }
 0x896   : > { %3467 = vmatmul.f32.gmra.mxu3 %v3094_v23 }
 0x897   : > { %3282 = vmatmul.f32.gmra.mxu0 %v3109_v14 }
 0x899   : > { %v3420_v46 = vpop.f32.mrf.mxu3 }
 0x89a   : > { %v3421_v55 = vadd.f32 %v3420_v46, %v3211_v57  ;;  %v3112_v57 = vld [vmem:[%s6707_s13 + $0x1e8] sm:$0xff]  ;;  %v3125_v46 = vld [vmem:[%s6707_s13 + $0x250] sm:$0xff] }
 0x89c   : > { %4534 = vmatmul.msk.f32.gmra.mxu1 %vm1012_vm10, %v3421_v55  ;;  %v3238_v36 = vpop.f32.mrf.mxu0  ;;  %v3120_v55 = vld [vmem:[%s6707_s13 + $0x228] sm:$0xff] }
 0x89e   : > { %3470 = vmatmul.f32.gmra.mxu3 %v3096_v56 }
 0x89f   : > { %3285 = vmatmul.f32.gmra.mxu0 %v3111_v20 }
 0x8a1   : > { %v3423_v31 = vpop.f32.mrf.mxu3 }
 0x8a2   : > { %v3424_v29 = vadd.f32 %v3423_v31, %v3214_v52  ;;  %v3114_v52 = vld [vmem:[%s6707_s13 + $0x1f8] sm:$0xff] }
 0x8a4   : > { %4535 = vmatmul.msk.f32.gmra.mxu1 %vm1012_vm10, %v3424_v29  ;;  %v3241_v34 = vpop.f32.mrf.mxu0  ;;  %v3127_v29 = vld [vmem:[%s6707_s13 + $0x260] sm:$0xff] }
 0x8a6   : > { %3473 = vmatmul.f32.gmra.mxu3 %v3098_v59 }
 0x8a7   : > { %3288 = vmatmul.f32.gmra.mxu0 %v3113_v2 }
 0x8a9   : > { %v3426_v0 = vpop.f32.mrf.mxu3 }
 0x8aa   : > { %v3427_v21 = vadd.f32 %v3426_v0, %v3217_v10  ;;  %v3116_v10 = vld [vmem:[%s6707_s13 + $0x208] sm:$0xff] }
 0x8ac   : > { %4536 = vmatmul.msk.f32.gmra.mxu1 %vm1012_vm10, %v3427_v21  ;;  %v3244_v17 = vpop.f32.mrf.mxu0 }
 0x8ae   : > { %3476 = vmatmul.f32.gmra.mxu3 %v3100_v49  ;;  %v3124_v49 = vld [vmem:[%s6707_s13 + $0x248] sm:$0xff] }
 0x8af   : > { %3291 = vmatmul.f32.gmra.mxu0 %v3115_v7  ;;  %v3132_v7 = vld [vmem:[%s6707_s13 + $0x288] sm:$0xff] }
 0x8b1   : > { %v3429_v27 = vpop.f32.mrf.mxu3 }
 0x8b2   : > { %v3430_v50 = vadd.f32 %v3429_v27, %v3220_v11  ;;  %v3123_v11 = vld [vmem:[%s6707_s13 + $0x240] sm:$0xff] }
 0x8b4   : > { %4537 = vmatmul.msk.f32.gmra.mxu1 %vm1012_vm10, %v3430_v50  ;;  %v3247_v30 = vpop.f32.mrf.mxu0 }
 0x8b6   : > { %3479 = vmatmul.f32.gmra.mxu3 %v3102_v6  ;;  %v3131_v6 = vld [vmem:[%s6707_s13 + $0x280] sm:$0xff] }
 0x8b7   : > { %3294 = vmatmul.f32.gmra.mxu0 %v3117_v15  ;;  %v3139_v15 = vld [vmem:[%s6707_s13 + $0x2c0] sm:$0xff] }
 0x8b9   : > { %v3432_v33 = vpop.f32.mrf.mxu3 }
 0x8ba   : > { %v3433_v12 = vadd.f32 %v3432_v33, %v3223_v47 }
 0x8bc   : > { %4538 = vmatmul.msk.f32.gmra.mxu1 %vm1012_vm10, %v3433_v12  ;;  %v3250_v44 = vpop.f32.mrf.mxu0 }
 0x8be   : > { %3482 = vmatmul.f32.gmra.mxu3 %v3104_v4 }
 0x8bf   : > { %3297 = vmatmul.f32.gmra.mxu0 %v3119_v62 }
 0x8c1   : > { %v3435_v60 = vpop.f32.mrf.mxu3 }
 0x8c2   : > { %v3436_v25 = vadd.f32 %v3435_v60, %v3226_v13  ;;  %v3128_v60 = vld [vmem:[%s6707_s13 + $0x268] sm:$0xff] }
 0x8c4   : > { %4539 = vmatmul.msk.f32.gmra.mxu1 %vm1012_vm10, %v3436_v25  ;;  %v3253_v63 = vpop.f32.mrf.mxu0 }
 0x8c6   : > { %3485 = vmatmul.f32.gmra.mxu3 %v3106_v58 }
 0x8c7   : > { %3300 = vmatmul.f32.gmra.mxu0 %v3121_v37 }
 0x8c9   : > { %v3438_v41 = vpop.f32.mrf.mxu3 }
 0x8ca   : > { %v3439_v24 = vadd.f32 %v3438_v41, %v3229_v53  ;;  %v3135_v41 = vld [vmem:[%s6707_s13 + $0x2a0] sm:$0xff] }
 0x8cc   : > { %4540 = vmatmul.msk.f32.gmra.mxu1 %vm1012_vm10, %v3439_v24  ;;  %v3256_v43 = vpop.f32.mrf.mxu0  ;;  %v3130_v24 = vld [vmem:[%s6707_s13 + $0x278] sm:$0xff] }
 0x8ce   : > { %3488 = vmatmul.f32.gmra.mxu3 %v3108_v1 }
 0x8cf   : > { %3303 = vmatmul.f32.gmra.mxu0 %v3123_v11 }
 0x8d1   : > { %v3441_v45 = vpop.f32.mrf.mxu3 }
 0x8d2   : > { %v3442_v48 = vadd.f32 %v3441_v45, %v3232_v26 }
 0x8d4   : > { %4541 = vmatmul.msk.f32.gmra.mxu1 %vm1012_vm10, %v3442_v48  ;;  %v3259_v22 = vpop.f32.mrf.mxu0  ;;  %v3137_v48 = vld [vmem:[%s6707_s13 + $0x2b0] sm:$0xff] }
 0x8d6   : > { %3491 = vmatmul.f32.gmra.mxu3 %v3110_v61 }
 0x8d7   : > { %3306 = vmatmul.f32.gmra.mxu0 %v3125_v46 }
 0x8d9   : > { %v3444_v32 = vpop.f32.mrf.mxu3 }
 0x8da   : > { %v3445_v8 = vadd.f32 %v3444_v32, %v3235_v39  ;;  %v3126_v39 = vld [vmem:[%s6707_s13 + $0x258] sm:$0xff] }
 0x8dc   : > { %4542 = vmatmul.msk.f32.gmra.mxu1 %vm1012_vm10, %v3445_v8  ;;  %v3262_v5 = vpop.f32.mrf.mxu0 }
 0x8de   : > { %3494 = vmatmul.f32.gmra.mxu3 %v3112_v57  ;;  %v3134_v57 = vld [vmem:[%s6707_s13 + $0x298] sm:$0xff] }
 0x8df   : > { %3309 = vmatmul.f32.gmra.mxu0 %v3127_v29 }
 0x8e1   : > { %v3447_v38 = vpop.f32.mrf.mxu3 }
 0x8e2   : > { %v3448_v42 = vadd.f32 %v3447_v38, %v3238_v36  ;;  %v3133_v36 = vld [vmem:[%s6707_s13 + $0x290] sm:$0xff] }
 0x8e4   : > { %4543 = vmatmul.msk.f32.gmra.mxu1 %vm1012_vm10, %v3448_v42  ;;  %v3265_v59 = vpop.f32.mrf.mxu0 }
 0x8e6   : > { %3497 = vmatmul.f32.gmra.mxu3 %v3114_v52  ;;  %v3141_v52 = vld [vmem:[%s6707_s13 + $0x2d0] sm:$0xff] }
 0x8e7   : > { %3312 = vmatmul.f32.gmra.mxu0 %v3129_v35 }
 0x8e9   : > { %v3450_v3 = vpop.f32.mrf.mxu3 }
 0x8ea   : > { %v3451_v51 = vadd.f32 %v3450_v3, %v3241_v34 }
 0x8ec   : > { %4544 = vmatmul.msk.f32.gmra.mxu1 %vm1012_vm10, %v3451_v51  ;;  %v3268_v26 = vpop.f32.mrf.mxu0 }
 0x8ee   : > { %3500 = vmatmul.f32.gmra.mxu3 %v3116_v10 }
 0x8ef   : > { %3315 = vmatmul.f32.gmra.mxu0 %v3131_v6 }
 0x8f1   : > { %v3453_v16 = vpop.f32.mrf.mxu3  ;;  %v3814_v54 = vpop.f32.mrf.mxu1 }
 0x8f2   : > { %v3454_v9 = vadd.f32 %v3453_v16, %v3244_v17  ;;  %4006 = vst [vmem:[%s6369_s30] sm:$0xff] %v3814_v54  ;;  %v3138_v16 = vld [vmem:[%s6707_s13 + $0x2b8] sm:$0xff] }
 0x8f4   : > { %4545 = vmatmul.msk.f32.gmra.mxu1 %vm1012_vm10, %v3454_v9  ;;  %v3271_v33 = vpop.f32.mrf.mxu0 }
 0x8f6   : > { %3503 = vmatmul.f32.gmra.mxu3 %v3118_v19 }
 0x8f7   : > { %3318 = vmatmul.f32.gmra.mxu0 %v3133_v36 }
 0x8f9   : > { %v3456_v40 = vpop.f32.mrf.mxu3  ;;  %v3817_v23 = vpop.f32.mrf.mxu1 }
 0x8fa   : > { %v3457_v47 = vadd.f32 %v3456_v40, %v3247_v30  ;;  %4007 = vst [vmem:[%s6369_s30 + $0x8] sm:$0xff] %v3817_v23  ;;  %v3140_v40 = vld [vmem:[%s6707_s13 + $0x2c8] sm:$0xff] }
 0x8fc   : > { %4546 = vmatmul.msk.f32.gmra.mxu1 %vm1012_vm10, %v3457_v47  ;;  %v3274_v25 = vpop.f32.mrf.mxu0 }
 0x8fe   : > { %3506 = vmatmul.f32.gmra.mxu3 %v3120_v55 }
 0x8ff   : > { %3321 = vmatmul.f32.gmra.mxu0 %v3135_v41 }
 0x901   : > { %v3459_v56 = vpop.f32.mrf.mxu3  ;;  %v3820_v13 = vpop.f32.mrf.mxu1 }
 0x902   : > { %v3460_v31 = vadd.f32 %v3459_v56, %v3250_v44  ;;  %4008 = vst [vmem:[%s6369_s30 + $0x10] sm:$0xff] %v3820_v13  ;;  %v3142_v56 = vld [vmem:[%s6707_s13 + $0x2d8] sm:$0xff] }
 0x904   : > { %4547 = vmatmul.msk.f32.gmra.mxu1 %vm1012_vm10, %v3460_v31  ;;  %v3277_v2 = vpop.f32.mrf.mxu0 }
 0x906   : > { %3509 = vmatmul.f32.gmra.mxu3 %v3122_v18 }
 0x907   : > { %3324 = vmatmul.f32.gmra.mxu0 %v3137_v48 }
 0x909   : > { %v3462_v53 = vpop.f32.mrf.mxu3  ;;  %v3823_v0 = vpop.f32.mrf.mxu1 }
 0x90a   : > { %v3463_v21 = vadd.f32 %v3462_v53, %v3253_v63  ;;  %4009 = vst [vmem:[%s6369_s30 + $0x18] sm:$0xff] %v3823_v0  ;;  %v3136_v63 = vld [vmem:[%s6707_s13 + $0x2a8] sm:$0xff] }
 0x90b   : > { %v3144_v53 = vld [vmem:[%s6707_s13 + $0x2e8] sm:$0xff] }
 0x90c   : > { %4548 = vmatmul.msk.f32.gmra.mxu1 %vm1012_vm10, %v3463_v21  ;;  %v3280_v61 = vpop.f32.mrf.mxu0 }
 0x90e   : > { %3512 = vmatmul.f32.gmra.mxu3 %v3124_v49 }
 0x90f   : > { %3327 = vmatmul.f32.gmra.mxu0 %v3139_v15 }
 0x911   : > { %v3465_v27 = vpop.f32.mrf.mxu3  ;;  %v3826_v50 = vpop.f32.mrf.mxu1 }
 0x912   : > { %v3466_v28 = vadd.f32 %v3465_v27, %v3256_v43  ;;  %4010 = vst [vmem:[%s6369_s30 + $0x20] sm:$0xff] %v3826_v50  ;;  %v3143_v43 = vld [vmem:[%s6707_s13 + $0x2e0] sm:$0xff]  ;;  %v3146_v27 = vld [vmem:[%s6707_s13 + $0x2f8] sm:$0xff] }
 0x914   : > { %4549 = vmatmul.msk.f32.gmra.mxu1 %vm1012_vm10, %v3466_v28  ;;  %v3283_v44 = vpop.f32.mrf.mxu0 }
 0x916   : > { %3515 = vmatmul.f32.gmra.mxu3 %v3126_v39 }
 0x917   : > { %3330 = vmatmul.f32.gmra.mxu0 %v3141_v52 }
 0x919   : > { %v3468_v12 = vpop.f32.mrf.mxu3  ;;  %v3829_v14 = vpop.f32.mrf.mxu1 }
 0x91a   : > { %v3469_v4 = vadd.f32 %v3468_v12, %v3259_v22  ;;  %4011 = vst [vmem:[%s6369_s30 + $0x28] sm:$0xff] %v3829_v14  ;;  %v3145_v22 = vld [vmem:[%s6707_s13 + $0x2f0] sm:$0xff]  ;;  %v3148_v12 = vld [vmem:[%s6707_s13 + $0x308] sm:$0xff] }
 0x91c   : > { %4550 = vmatmul.msk.f32.gmra.mxu1 %vm1012_vm10, %v3469_v4  ;;  %v3286_v3 = vpop.f32.mrf.mxu0 }
 0x91e   : > { %3518 = vmatmul.f32.gmra.mxu3 %v3128_v60 }
 0x91f   : > { %3333 = vmatmul.f32.gmra.mxu0 %v3143_v43 }
 0x921   : > { %v3471_v20 = vpop.f32.mrf.mxu3  ;;  %v3832_v58 = vpop.f32.mrf.mxu1 }
 0x922   : > { %v3472_v34 = vadd.f32 %v3471_v20, %v3262_v5  ;;  %4012 = vst [vmem:[%s6369_s30 + $0x30] sm:$0xff] %v3832_v58  ;;  %v3147_v5 = vld [vmem:[%s6707_s13 + $0x300] sm:$0xff]  ;;  %v3150_v20 = vld [vmem:[%s6707_s13 + $0x318] sm:$0xff] }
 0x924   : > { %4551 = vmatmul.msk.f32.gmra.mxu1 %vm1012_vm10, %v3472_v34  ;;  %v3289_v54 = vpop.f32.mrf.mxu0 }
 0x926   : > { %3521 = vmatmul.f32.gmra.mxu3 %v3130_v24 }
 0x927   : > { %3336 = vmatmul.f32.gmra.mxu0 %v3145_v22 }
 0x929   : > { %v3474_v1 = vpop.f32.mrf.mxu3  ;;  %v3835_v17 = vpop.f32.mrf.mxu1 }
 0x92a   : > { %v3475_v45 = vadd.f32 %v3474_v1, %v3265_v59  ;;  %4013 = vst [vmem:[%s6369_s30 + $0x38] sm:$0xff] %v3835_v17  ;;  %v3149_v59 = vld [vmem:[%s6707_s13 + $0x310] sm:$0xff]  ;;  %v3152_v1 = vld [vmem:[%s6707_s13 + $0x328] sm:$0xff] }
 0x92c   : > { %4552 = vmatmul.msk.f32.gmra.mxu1 %vm1012_vm10, %v3475_v45  ;;  %v3292_v23 = vpop.f32.mrf.mxu0 }
 0x92e   : > { %3524 = vmatmul.f32.gmra.mxu3 %v3132_v7 }
 0x92f   : > { %3339 = vmatmul.f32.gmra.mxu0 %v3147_v5 }
 0x931   : > { %v3477_v30 = vpop.f32.mrf.mxu3  ;;  %v3838_v32 = vpop.f32.mrf.mxu1 }
 0x932   : > { %v3478_v8 = vadd.f32 %v3477_v30, %v3268_v26  ;;  %4014 = vst [vmem:[%s6369_s30 + $0x40] sm:$0xff] %v3838_v32  ;;  %v3151_v26 = vld [vmem:[%s6707_s13 + $0x320] sm:$0xff]  ;;  %v3154_v30 = vld [vmem:[%s6707_s13 + $0x338] sm:$0xff] }
 0x934   : > { %4553 = vmatmul.msk.f32.gmra.mxu1 %vm1012_vm10, %v3478_v8  ;;  %v3295_v13 = vpop.f32.mrf.mxu0 }
 0x936   : > { %3527 = vmatmul.f32.gmra.mxu3 %v3134_v57 }
 0x937   : > { %3342 = vmatmul.f32.gmra.mxu0 %v3149_v59 }
 0x939   : > { %v3480_v38 = vpop.f32.mrf.mxu3  ;;  %v3841_v42 = vpop.f32.mrf.mxu1 }
 0x93a   : > { %v3481_v62 = vadd.f32 %v3480_v38, %v3271_v33  ;;  %4015 = vst [vmem:[%s6369_s30 + $0x48] sm:$0xff] %v3841_v42  ;;  %v3153_v33 = vld [vmem:[%s6707_s13 + $0x330] sm:$0xff]  ;;  %v3156_v38 = vld [vmem:[%s6707_s13 + $0x348] sm:$0xff] }
 0x93c   : > { %4554 = vmatmul.msk.f32.gmra.mxu1 %vm1012_vm10, %v3481_v62  ;;  %v3298_v0 = vpop.f32.mrf.mxu0 }
 0x93e   : > { %3530 = vmatmul.f32.gmra.mxu3 %v3136_v63 }
 0x93f   : > { %3345 = vmatmul.f32.gmra.mxu0 %v3151_v26 }
 0x941   : > { %v3483_v51 = vpop.f32.mrf.mxu3  ;;  %v3844_v37 = vpop.f32.mrf.mxu1 }
 0x942   : > { %v3484_v10 = vadd.f32 %v3483_v51, %v3274_v25  ;;  %4016 = vst [vmem:[%s6369_s30 + $0x50] sm:$0xff] %v3844_v37  ;;  %v3155_v25 = vld [vmem:[%s6707_s13 + $0x340] sm:$0xff]  ;;  %v3158_v51 = vld [vmem:[%s6707_s13 + $0x358] sm:$0xff] }
 0x944   : > { %4555 = vmatmul.msk.f32.gmra.mxu1 %vm1012_vm10, %v3484_v10  ;;  %v3301_v50 = vpop.f32.mrf.mxu0 }
 0x946   : > { %3533 = vmatmul.f32.gmra.mxu3 %v3138_v16 }
 0x947   : > { %3348 = vmatmul.f32.gmra.mxu0 %v3153_v33 }
 0x949   : > { %v3486_v9 = vpop.f32.mrf.mxu3  ;;  %v3847_v11 = vpop.f32.mrf.mxu1 }
 0x94a   : > { %v3487_v19 = vadd.f32 %v3486_v9, %v3277_v2  ;;  %4017 = vst [vmem:[%s6369_s30 + $0x58] sm:$0xff] %v3847_v11  ;;  %v3157_v2 = vld [vmem:[%s6707_s13 + $0x350] sm:$0xff]  ;;  %v3160_v9 = vld [vmem:[%s6707_s13 + $0x368] sm:$0xff] }
 0x94c   : > { %4556 = vmatmul.msk.f32.gmra.mxu1 %vm1012_vm10, %v3487_v19  ;;  %v3304_v14 = vpop.f32.mrf.mxu0 }
 0x94e   : > { %3536 = vmatmul.f32.gmra.mxu3 %v3140_v40 }
 0x94f   : > { %3351 = vmatmul.f32.gmra.mxu0 %v3155_v25 }
 0x951   : > { %v3489_v47 = vpop.f32.mrf.mxu3  ;;  %v3850_v46 = vpop.f32.mrf.mxu1 }
 0x952   : > { %v3490_v55 = vadd.f32 %v3489_v47, %v3280_v61  ;;  %4018 = vst [vmem:[%s6369_s30 + $0x60] sm:$0xff] %v3850_v46  ;;  %v3159_v61 = vld [vmem:[%s6707_s13 + $0x360] sm:$0xff]  ;;  %v3162_v47 = vld [vmem:[%s6707_s13 + $0x378] sm:$0xff] }
 0x954   : > { %4557 = vmatmul.msk.f32.gmra.mxu1 %vm1012_vm10, %v3490_v55  ;;  %v3307_v58 = vpop.f32.mrf.mxu0 }
 0x956   : > { %3539 = vmatmul.f32.gmra.mxu3 %v3142_v56 }
 0x957   : > { %3354 = vmatmul.f32.gmra.mxu0 %v3157_v2 }
 0x959   : > { %v3492_v31 = vpop.f32.mrf.mxu3  ;;  %v3853_v29 = vpop.f32.mrf.mxu1 }
 0x95a   : > { %v3493_v18 = vadd.f32 %v3492_v31, %v3283_v44  ;;  %4019 = vst [vmem:[%s6369_s30 + $0x68] sm:$0xff] %v3853_v29  ;;  %v3161_v44 = vld [vmem:[%s6707_s13 + $0x370] sm:$0xff]  ;;  %v3164_v31 = vld [vmem:[%s6707_s13 + $0x388] sm:$0xff] }
 0x95c   : > { %4558 = vmatmul.msk.f32.gmra.mxu1 %vm1012_vm10, %v3493_v18  ;;  %v3310_v17 = vpop.f32.mrf.mxu0 }
 0x95e   : > { %3542 = vmatmul.f32.gmra.mxu3 %v3144_v53 }
 0x95f   : > { %3357 = vmatmul.f32.gmra.mxu0 %v3159_v61 }
 0x961   : > { %v3495_v21 = vpop.f32.mrf.mxu3  ;;  %v3856_v35 = vpop.f32.mrf.mxu1 }
 0x962   : > { %v3496_v49 = vadd.f32 %v3495_v21, %v3286_v3  ;;  %4020 = vst [vmem:[%s6369_s30 + $0x70] sm:$0xff] %v3856_v35  ;;  %v3163_v3 = vld [vmem:[%s6707_s13 + $0x380] sm:$0xff]  ;;  %v3166_v21 = vld [vmem:[%s6707_s13 + $0x398] sm:$0xff] }
 0x964   : > { %4559 = vmatmul.msk.f32.gmra.mxu1 %vm1012_vm10, %v3496_v49  ;;  %v3313_v32 = vpop.f32.mrf.mxu0 }
 0x966   : > { %3545 = vmatmul.f32.gmra.mxu3 %v3146_v27 }
 0x967   : > { %3360 = vmatmul.f32.gmra.mxu0 %v3161_v44 }
 0x969   : > { %v3498_v28 = vpop.f32.mrf.mxu3  ;;  %v3859_v6 = vpop.f32.mrf.mxu1 }
 0x96a   : > { %v3499_v39 = vadd.f32 %v3498_v28, %v3289_v54  ;;  %4021 = vst [vmem:[%s6369_s30 + $0x78] sm:$0xff] %v3859_v6  ;;  %v3165_v54 = vld [vmem:[%s6707_s13 + $0x390] sm:$0xff]  ;;  %v3168_v28 = vld [vmem:[%s6707_s13 + $0x3a8] sm:$0xff] }
 0x96c   : > { %4560 = vmatmul.msk.f32.gmra.mxu1 %vm1012_vm10, %v3499_v39  ;;  %v3316_v42 = vpop.f32.mrf.mxu0 }
 0x96e   : > { %3548 = vmatmul.f32.gmra.mxu3 %v3148_v12 }
 0x96f   : > { %3363 = vmatmul.f32.gmra.mxu0 %v3163_v3 }
 0x971   : > { %v3501_v4 = vpop.f32.mrf.mxu3  ;;  %v3862_v36 = vpop.f32.mrf.mxu1 }
 0x972   : > { %v3502_v60 = vadd.f32 %v3501_v4, %v3292_v23  ;;  %4022 = vst [vmem:[%s6369_s30 + $0x80] sm:$0xff] %v3862_v36  ;;  %v3167_v23 = vld [vmem:[%s6707_s13 + $0x3a0] sm:$0xff]  ;;  %v3170_v4 = vld [vmem:[%s6707_s13 + $0x3b8] sm:$0xff] }
 0x974   : > { %4561 = vmatmul.msk.f32.gmra.mxu1 %vm1012_vm10, %v3502_v60  ;;  %v3319_v37 = vpop.f32.mrf.mxu0 }
 0x976   : > { %3551 = vmatmul.f32.gmra.mxu3 %v3150_v20 }
 0x977   : > { %3366 = vmatmul.f32.gmra.mxu0 %v3165_v54 }
 0x979   : > { %v3504_v34 = vpop.f32.mrf.mxu3  ;;  %v3865_v41 = vpop.f32.mrf.mxu1 }
 0x97a   : > { %v3505_v24 = vadd.f32 %v3504_v34, %v3295_v13  ;;  %4023 = vst [vmem:[%s6369_s30 + $0x88] sm:$0xff] %v3865_v41  ;;  %v3169_v13 = vld [vmem:[%s6707_s13 + $0x3b0] sm:$0xff]  ;;  %v3172_v34 = vld [vmem:[%s6707_s13 + $0x3c8] sm:$0xff] }
 0x97c   : > { %4562 = vmatmul.msk.f32.gmra.mxu1 %vm1012_vm10, %v3505_v24  ;;  %v3322_v11 = vpop.f32.mrf.mxu0 }
 0x97e   : > { %3554 = vmatmul.f32.gmra.mxu3 %v3152_v1 }
 0x97f   : > { %3369 = vmatmul.f32.gmra.mxu0 %v3167_v23 }
 0x981   : > { %v3507_v45 = vpop.f32.mrf.mxu3  ;;  %v3868_v48 = vpop.f32.mrf.mxu1 }
 0x982   : > { %v3508_v7 = vadd.f32 %v3507_v45, %v3298_v0  ;;  %4024 = vst [vmem:[%s6369_s30 + $0x90] sm:$0xff] %v3868_v48  ;;  %v3171_v0 = vld [vmem:[%s6707_s13 + $0x3c0] sm:$0xff] }
 0x984   : > { %4563 = vmatmul.msk.f32.gmra.mxu1 %vm1012_vm10, %v3508_v7  ;;  %v3325_v46 = vpop.f32.mrf.mxu0 }
 0x986   : > { %3557 = vmatmul.f32.gmra.mxu3 %v3154_v30  ;;  %v3176_v30 = vld [vmem:[%s6707_s13 + $0x3e8] sm:$0xff] }
 0x987   : > { %3372 = vmatmul.f32.gmra.mxu0 %v3169_v13 }
 0x989   : > { %v3510_v8 = vpop.f32.mrf.mxu3  ;;  %v3871_v15 = vpop.f32.mrf.mxu1 }
 0x98a   : > { %v3511_v57 = vadd.f32 %v3510_v8, %v3301_v50  ;;  %4025 = vst [vmem:[%s6369_s30 + $0x98] sm:$0xff] %v3871_v15  ;;  %v3173_v50 = vld [vmem:[%s6707_s13 + $0x3d0] sm:$0xff] }
 0x98c   : > { %4564 = vmatmul.msk.f32.gmra.mxu1 %vm1012_vm10, %v3511_v57  ;;  %v3328_v29 = vpop.f32.mrf.mxu0  ;;  %v3178_v57 = vld [vmem:[%s6707_s13 + $0x3f8] sm:$0xff] }
 0x98e   : > { %3560 = vmatmul.f32.gmra.mxu3 %v3156_v38 }
 0x98f   : > { %3375 = vmatmul.f32.gmra.mxu0 %v3171_v0 }
 0x991   : > { %v3513_v62 = vpop.f32.mrf.mxu3  ;;  %v3874_v52 = vpop.f32.mrf.mxu1 }
 0x992   : > { %v3514_v63 = vadd.f32 %v3513_v62, %v3304_v14  ;;  %4026 = vst [vmem:[%s6369_s30 + $0xa0] sm:$0xff] %v3874_v52  ;;  %v3175_v14 = vld [vmem:[%s6707_s13 + $0x3e0] sm:$0xff] }
 0x994   : > { %4565 = vmatmul.msk.f32.gmra.mxu1 %vm1012_vm10, %v3514_v63  ;;  %v3331_v35 = vpop.f32.mrf.mxu0 }
 0x996   : > { %3563 = vmatmul.f32.gmra.mxu3 %v3158_v51 }
 0x997   : > { %3378 = vmatmul.f32.gmra.mxu0 %v3173_v50 }
 0x999   : > { %v3516_v10 = vpop.f32.mrf.mxu3  ;;  %v3877_v43 = vpop.f32.mrf.mxu1 }
 0x99a   : > { %v3517_v16 = vadd.f32 %v3516_v10, %v3307_v58  ;;  %4027 = vst [vmem:[%s6369_s30 + $0xa8] sm:$0xff] %v3877_v43  ;;  %v3177_v58 = vld [vmem:[%s6707_s13 + $0x3f0] sm:$0xff] }
 0x99c   : > { %4566 = vmatmul.msk.f32.gmra.mxu1 %vm1012_vm10, %v3517_v16  ;;  %v3334_v6 = vpop.f32.mrf.mxu0 }
 0x99e   : > { %3566 = vmatmul.f32.gmra.mxu3 %v3160_v9 }
 0x99f   : > { %3381 = vmatmul.f32.gmra.mxu0 %v3175_v14 }
 0x9a1   : > { %v3519_v19 = vpop.f32.mrf.mxu3  ;;  %v3880_v22 = vpop.f32.mrf.mxu1 }
 0x9a2   : > { %v3520_v40 = vadd.f32 %v3519_v19, %v3310_v17  ;;  %4028 = vst [vmem:[%s6369_s30 + $0xb0] sm:$0xff] %v3880_v22  ;;  %v3174_v17 = vld [vmem:[%s6707_s13 + $0x3d8] sm:$0xff] }
 0x9a4   : > { %4567 = vmatmul.msk.f32.gmra.mxu1 %vm1012_vm10, %v3520_v40  ;;  %v3337_v36 = vpop.f32.mrf.mxu0 }
 0x9a6   : > { %3569 = vmatmul.f32.gmra.mxu3 %v3162_v47 }
 0x9a7   : > { %3384 = vmatmul.f32.gmra.mxu0 %v3177_v58 }
 0x9a9   : > { %v3522_v55 = vpop.f32.mrf.mxu3  ;;  %v3883_v5 = vpop.f32.mrf.mxu1 }
 0x9aa   : > { %v3523_v56 = vadd.f32 %v3522_v55, %v3313_v32  ;;  %4029 = vst [vmem:[%s6369_s30 + $0xb8] sm:$0xff] %v3883_v5 }
 0x9ac   : > { %4568 = vmatmul.msk.f32.gmra.mxu1 %vm1012_vm10, %v3523_v56  ;;  %v3340_v41 = vpop.f32.mrf.mxu0 }
 0x9ae   : > { %3572 = vmatmul.f32.gmra.mxu3 %v3164_v31 }
 0x9b1   : > { %v3525_v18 = vpop.f32.mrf.mxu3  ;;  %v3886_v59 = vpop.f32.mrf.mxu1 }
 0x9b2   : > { %v3526_v53 = vadd.f32 %v3525_v18, %v3316_v42  ;;  %4030 = vst [vmem:[%s6369_s30 + $0xc0] sm:$0xff] %v3886_v59 }
 0x9b4   : > { %4569 = vmatmul.msk.f32.gmra.mxu1 %vm1012_vm10, %v3526_v53  ;;  %v3343_v61 = vpop.f32.mrf.mxu0 }
 0x9b6   : > { %3575 = vmatmul.f32.gmra.mxu3 %v3166_v21 }
 0x9b9   : > { %v3528_v49 = vpop.f32.mrf.mxu3  ;;  %v3889_v26 = vpop.f32.mrf.mxu1 }
 0x9ba   : > { %v3529_v27 = vadd.f32 %v3528_v49, %v3319_v37  ;;  %4031 = vst [vmem:[%s6369_s30 + $0xc8] sm:$0xff] %v3889_v26 }
 0x9bc   : > { %4570 = vmatmul.msk.f32.gmra.mxu1 %vm1012_vm10, %v3529_v27  ;;  %v3346_v44 = vpop.f32.mrf.mxu0 }
 0x9be   : > { %3578 = vmatmul.f32.gmra.mxu3 %v3168_v28 }
 0x9c1   : > { %v3531_v39 = vpop.f32.mrf.mxu3  ;;  %v3892_v33 = vpop.f32.mrf.mxu1 }
 0x9c2   : > { %v3532_v12 = vadd.f32 %v3531_v39, %v3322_v11  ;;  %4032 = vst [vmem:[%s6369_s30 + $0xd0] sm:$0xff] %v3892_v33 }
 0x9c4   : > { %4571 = vmatmul.msk.f32.gmra.mxu1 %vm1012_vm10, %v3532_v12  ;;  %v3349_v52 = vpop.f32.mrf.mxu0 }
 0x9c6   : > { %3581 = vmatmul.f32.gmra.mxu3 %v3170_v4 }
 0x9c9   : > { %v3534_v60 = vpop.f32.mrf.mxu3  ;;  %v3895_v25 = vpop.f32.mrf.mxu1 }
 0x9ca   : > { %v3535_v20 = vadd.f32 %v3534_v60, %v3325_v46  ;;  %4033 = vst [vmem:[%s6369_s30 + $0xd8] sm:$0xff] %v3895_v25 }
 0x9cc   : > { %4572 = vmatmul.msk.f32.gmra.mxu1 %vm1012_vm10, %v3535_v20  ;;  %v3352_v37 = vpop.f32.mrf.mxu0 }
 0x9ce   : > { %3584 = vmatmul.f32.gmra.mxu3 %v3172_v34 }
 0x9d1   : > { %v3537_v24 = vpop.f32.mrf.mxu3  ;;  %v3898_v2 = vpop.f32.mrf.mxu1 }
 0x9d2   : > { %v3538_v1 = vadd.f32 %v3537_v24, %v3328_v29  ;;  %4034 = vst [vmem:[%s6369_s30 + $0xe0] sm:$0xff] %v3898_v2 }
 0x9d4   : > { %4573 = vmatmul.msk.f32.gmra.mxu1 %vm1012_vm10, %v3538_v1  ;;  %v3355_v19 = vpop.f32.mrf.mxu0 }
 0x9d6   : > { %3587 = vmatmul.f32.gmra.mxu3 %v3174_v17 }
 0x9d9   : > { %v3540_v45 = vpop.f32.mrf.mxu3  ;;  %v3901_v48 = vpop.f32.mrf.mxu1 }
 0x9da   : > { %v3541_v7 = vadd.f32 %v3540_v45, %v3331_v35  ;;  %4035 = vst [vmem:[%s6369_s30 + $0xe8] sm:$0xff] %v3901_v48 }
 0x9dc   : > { %4574 = vmatmul.msk.f32.gmra.mxu1 %vm1012_vm10, %v3541_v7  ;;  %v3358_v47 = vpop.f32.mrf.mxu0 }
 0x9de   : > { %3590 = vmatmul.f32.gmra.mxu3 %v3176_v30 }
 0x9e1   : > { %v3543_v32 = vpop.f32.mrf.mxu3  ;;  %v3904_v8 = vpop.f32.mrf.mxu1 }
 0x9e2   : > { %v3544_v15 = vadd.f32 %v3543_v32, %v3334_v6  ;;  %4036 = vst [vmem:[%s6369_s30 + $0xf0] sm:$0xff] %v3904_v8 }
 0x9e4   : > { %4575 = vmatmul.msk.f32.gmra.mxu1 %vm1012_vm10, %v3544_v15  ;;  %v3361_v56 = vpop.f32.mrf.mxu0 }
 0x9e6   : > { %3593 = vmatmul.f32.gmra.mxu3 %v3178_v57 }
 0x9e9   : > { %v3546_v38 = vpop.f32.mrf.mxu3  ;;  %v3907_v42 = vpop.f32.mrf.mxu1 }
 0x9ea   : > { %v3547_v62 = vadd.f32 %v3546_v38, %v3337_v36  ;;  %4037 = vst [vmem:[%s6369_s30 + $0xf8] sm:$0xff] %v3907_v42 }
 0x9ec   : > { %4576 = vmatmul.msk.f32.gmra.mxu1 %vm1012_vm10, %v3547_v62  ;;  %v3364_v18 = vpop.f32.mrf.mxu0 }
 0x9f1   : > { %v3549_v63 = vpop.f32.mrf.mxu3  ;;  %v3910_v3 = vpop.f32.mrf.mxu1 }
 0x9f2   : > { %v3550_v51 = vadd.f32 %v3549_v63, %v3340_v41  ;;  %4038 = vst [vmem:[%s6369_s30 + $0x100] sm:$0xff] %v3910_v3 }
 0x9f4   : > { %4577 = vmatmul.msk.f32.gmra.mxu1 %vm1012_vm10, %v3550_v51  ;;  %v3367_v26 = vpop.f32.mrf.mxu0 }
 0x9f9   : > { %v3552_v10 = vpop.f32.mrf.mxu3  ;;  %v3913_v43 = vpop.f32.mrf.mxu1 }
 0x9fa   : > { %v3553_v16 = vadd.f32 %v3552_v10, %v3343_v61  ;;  %4039 = vst [vmem:[%s6369_s30 + $0x108] sm:$0xff] %v3913_v43 }
 0x9fc   : > { %4578 = vmatmul.msk.f32.gmra.mxu1 %vm1012_vm10, %v3553_v16  ;;  %v3370_v6 = vpop.f32.mrf.mxu0 }
 0xa01   : > { %v3555_v54 = vpop.f32.mrf.mxu3  ;;  %v3916_v9 = vpop.f32.mrf.mxu1 }
 0xa02   : > { %v3556_v11 = vadd.f32 %v3555_v54, %v3346_v44  ;;  %4040 = vst [vmem:[%s6369_s30 + $0x110] sm:$0xff] %v3916_v9 }
 0xa04   : > { %4579 = vmatmul.msk.f32.gmra.mxu1 %vm1012_vm10, %v3556_v11  ;;  %v3373_v14 = vpop.f32.mrf.mxu0 }
 0xa09   : > { %v3558_v22 = vpop.f32.mrf.mxu3  ;;  %v3919_v40 = vpop.f32.mrf.mxu1 }
 0xa0a   : > { %v3559_v23 = vadd.f32 %v3558_v22, %v3349_v52  ;;  %4041 = vst [vmem:[%s6369_s30 + $0x118] sm:$0xff] %v3919_v40 }
 0xa0c   : > { %4580 = vmatmul.msk.f32.gmra.mxu1 %vm1012_vm10, %v3559_v23  ;;  %v3376_v25 = vpop.f32.mrf.mxu0 }
 0xa11   : > { %v3561_v46 = vpop.f32.mrf.mxu3  ;;  %v3922_v55 = vpop.f32.mrf.mxu1 }
 0xa12   : > { %v3562_v5 = vadd.f32 %v3561_v46, %v3352_v37  ;;  %4042 = vst [vmem:[%s6369_s30 + $0x120] sm:$0xff] %v3922_v55 }
 0xa14   : > { %4581 = vmatmul.msk.f32.gmra.mxu1 %vm1012_vm10, %v3562_v5  ;;  %v3379_v1 = vpop.f32.mrf.mxu0 }
 0xa19   : > { %v3564_v13 = vpop.f32.mrf.mxu3  ;;  %v3925_v31 = vpop.f32.mrf.mxu1 }
 0xa1a   : > { %v3565_v29 = vadd.f32 %v3564_v13, %v3355_v19  ;;  %4043 = vst [vmem:[%s6369_s30 + $0x128] sm:$0xff] %v3925_v31 }
 0xa1c   : > { %4582 = vmatmul.msk.f32.gmra.mxu1 %vm1012_vm10, %v3565_v29  ;;  %v3382_v7 = vpop.f32.mrf.mxu0 }
 0xa21   : > { %v3567_v59 = vpop.f32.mrf.mxu3  ;;  %v3928_v53 = vpop.f32.mrf.mxu1 }
 0xa22   : > { %v3568_v0 = vadd.f32 %v3567_v59, %v3358_v47  ;;  %4044 = vst [vmem:[%s6369_s30 + $0x130] sm:$0xff] %v3928_v53 }
 0xa24   : > { %4583 = vmatmul.msk.f32.gmra.mxu1 %vm1012_vm10, %v3568_v0  ;;  %v3385_v8 = vpop.f32.mrf.mxu0 }
 0xa29   : > { %v3570_v21 = vpop.f32.mrf.mxu3  ;;  %v3931_v35 = vpop.f32.mrf.mxu1 }
 0xa2a   : > { %v3571_v49 = vadd.f32 %v3570_v21, %v3361_v56  ;;  %4045 = vst [vmem:[%s6369_s30 + $0x138] sm:$0xff] %v3931_v35 }
 0xa2c   : > { %4584 = vmatmul.msk.f32.gmra.mxu1 %vm1012_vm10, %v3571_v49 }
 0xa31   : > { %v3573_v27 = vpop.f32.mrf.mxu3  ;;  %v3934_v50 = vpop.f32.mrf.mxu1 }
 0xa32   : > { %v3574_v28 = vadd.f32 %v3573_v27, %v3364_v18  ;;  %4046 = vst [vmem:[%s6369_s30 + $0x140] sm:$0xff] %v3934_v50 }
 0xa34   : > { %4585 = vmatmul.msk.f32.gmra.mxu1 %vm1012_vm10, %v3574_v28 }
 0xa39   : > { %v3576_v39 = vpop.f32.mrf.mxu3  ;;  %v3937_v33 = vpop.f32.mrf.mxu1 }
 0xa3a   : > { %v3577_v12 = vadd.f32 %v3576_v39, %v3367_v26  ;;  %4047 = vst [vmem:[%s6369_s30 + $0x148] sm:$0xff] %v3937_v33 }
 0xa3c   : > { %4586 = vmatmul.msk.f32.gmra.mxu1 %vm1012_vm10, %v3577_v12 }
 0xa41   : > { %v3579_v4 = vpop.f32.mrf.mxu3  ;;  %v3940_v36 = vpop.f32.mrf.mxu1 }
 0xa42   : > { %v3580_v60 = vadd.f32 %v3579_v4, %v3370_v6  ;;  %4048 = vst [vmem:[%s6369_s30 + $0x150] sm:$0xff] %v3940_v36 }
 0xa44   : > { %4587 = vmatmul.msk.f32.gmra.mxu1 %vm1012_vm10, %v3580_v60 }
 0xa49   : > { %v3582_v20 = vpop.f32.mrf.mxu3  ;;  %v3943_v58 = vpop.f32.mrf.mxu1 }
 0xa4a   : > { %v3583_v34 = vadd.f32 %v3582_v20, %v3373_v14  ;;  %4049 = vst [vmem:[%s6369_s30 + $0x158] sm:$0xff] %v3943_v58 }
 0xa4c   : > { %4588 = vmatmul.msk.f32.gmra.mxu1 %vm1012_vm10, %v3583_v34 }
 0xa51   : > { %v3585_v41 = vpop.f32.mrf.mxu3  ;;  %v3946_v24 = vpop.f32.mrf.mxu1 }
 0xa52   : > { %v3586_v2 = vadd.f32 %v3585_v41, %v3376_v25  ;;  %4050 = vst [vmem:[%s6369_s30 + $0x160] sm:$0xff] %v3946_v24 }
 0xa54   : > { %4589 = vmatmul.msk.f32.gmra.mxu1 %vm1012_vm10, %v3586_v2 }
 0xa59   : > { %v3588_v17 = vpop.f32.mrf.mxu3  ;;  %v3949_v45 = vpop.f32.mrf.mxu1 }
 0xa5a   : > { %v3589_v48 = vadd.f32 %v3588_v17, %v3379_v1  ;;  %4051 = vst [vmem:[%s6369_s30 + $0x168] sm:$0xff] %v3949_v45 }
 0xa5c   : > { %4590 = vmatmul.msk.f32.gmra.mxu1 %vm1012_vm10, %v3589_v48 }
 0xa61   : > { %v3591_v61 = vpop.f32.mrf.mxu3  ;;  %v3952_v30 = vpop.f32.mrf.mxu1 }
 0xa62   : > { %v3592_v32 = vadd.f32 %v3591_v61, %v3382_v7  ;;  %4052 = vst [vmem:[%s6369_s30 + $0x170] sm:$0xff] %v3952_v30 }
 0xa64   : > { %4591 = vmatmul.msk.f32.gmra.mxu1 %vm1012_vm10, %v3592_v32 }
 0xa69   : > { %v3594_v15 = vpop.f32.mrf.mxu3  ;;  %v3955_v57 = vpop.f32.mrf.mxu1 }
 0xa6a   : > { %v3595_v44 = vadd.f32 %v3594_v15, %v3385_v8  ;;  %4053 = vst [vmem:[%s6369_s30 + $0x178] sm:$0xff] %v3955_v57 }
 0xa6c   : > { %4592 = vmatmul.msk.f32.gmra.mxu1 %vm1012_vm10, %v3595_v44 }
 0xa71   : > { %v3958_v38 = vpop.f32.mrf.mxu1 }
 0xa72   : > { %4054 = vst [vmem:[%s6369_s30 + $0x180] sm:$0xff] %v3958_v38 }
 0xa79   : > { %v3961_v42 = vpop.f32.mrf.mxu1 }
 0xa7a   : > { %4055 = vst [vmem:[%s6369_s30 + $0x188] sm:$0xff] %v3961_v42 }
 0xa81   : > { %v3964_v62 = vpop.f32.mrf.mxu1 }
 0xa82   : > { %4056 = vst [vmem:[%s6369_s30 + $0x190] sm:$0xff] %v3964_v62 }
 0xa89   : > { %v3967_v52 = vpop.f32.mrf.mxu1 }
 0xa8a   : > { %4057 = vst [vmem:[%s6369_s30 + $0x198] sm:$0xff] %v3967_v52 }
 0xa91   : > { %v3970_v63 = vpop.f32.mrf.mxu1 }
 0xa92   : > { %4058 = vst [vmem:[%s6369_s30 + $0x1a0] sm:$0xff] %v3970_v63 }
 0xa99   : > { %v3973_v3 = vpop.f32.mrf.mxu1 }
 0xa9a   : > { %4059 = vst [vmem:[%s6369_s30 + $0x1a8] sm:$0xff] %v3973_v3 }
 0xaa1   : > { %v3976_v51 = vpop.f32.mrf.mxu1 }
 0xaa2   : > { %4060 = vst [vmem:[%s6369_s30 + $0x1b0] sm:$0xff] %v3976_v51 }
 0xaa9   : > { %v3979_v37 = vpop.f32.mrf.mxu1 }
 0xaaa   : > { %4061 = vst [vmem:[%s6369_s30 + $0x1b8] sm:$0xff] %v3979_v37 }
 0xab1   : > { %v3982_v10 = vpop.f32.mrf.mxu1 }
 0xab2   : > { %4062 = vst [vmem:[%s6369_s30 + $0x1c0] sm:$0xff] %v3982_v10 }
 0xab9   : > { %v3985_v43 = vpop.f32.mrf.mxu1 }
 0xaba   : > { %4063 = vst [vmem:[%s6369_s30 + $0x1c8] sm:$0xff] %v3985_v43 }
 0xac1   : > { %v3988_v16 = vpop.f32.mrf.mxu1 }
 0xac2   : > { %4064 = vst [vmem:[%s6369_s30 + $0x1d0] sm:$0xff] %v3988_v16 }
 0xac9   : > { %v3991_v54 = vpop.f32.mrf.mxu1 }
 0xaca   : > { %4065 = vst [vmem:[%s6369_s30 + $0x1d8] sm:$0xff] %v3991_v54 }
 0xad1   : > { %v3994_v9 = vpop.f32.mrf.mxu1 }
 0xad2   : > { %4066 = vst [vmem:[%s6369_s30 + $0x1e0] sm:$0xff] %v3994_v9 }
 0xad9   : > { %v3997_v11 = vpop.f32.mrf.mxu1 }
 0xada   : > { %4067 = vst [vmem:[%s6369_s30 + $0x1e8] sm:$0xff] %v3997_v11 }
 0xae1   : > { %v4000_v19 = vpop.f32.mrf.mxu1 }
 0xae2   : > { %4068 = vst [vmem:[%s6369_s30 + $0x1f0] sm:$0xff] %v4000_v19 }
 0xae9   : > { %v4003_v22 = vpop.f32.mrf.mxu1 }
 0xaea   : > { %4069 = vst [vmem:[%s6369_s30 + $0x1f8] sm:$0xff] %v4003_v22 }
 0xaeb   : > { %4688 = shalt.err (!%p4685_p3)
}
 0xaec   : > { %s4726_s25 = smov 128   ;;  %s4727_s30 = smov 8  }
 0xaed   : > { %4616 = dma.vmem_to_hbm [thread:$0]  (%p4846_p5), %s4084_s23, 8192, %s4086_s20, %s4071_s24, %s4726_s25, %s4726_s25, %s4727_s30  }
 0xaee PF: > { %p4622_p4 = scmp.ge.s32.totalorder %s4723_s21, 2  ;;  %s4100_s2 = sand.u32 1, %s4711_s18  }
 0xaef   : > { %s4101_s17 = scalar_lea.sflag [#allocation3], %s4100_s2 }
 0xaf0   : > { %p4619_p7 = pnand %p4622_p4, %p4850_p6 }
 0xaf2   : > { %p4620_p8 = pneg %p4619_p7 }
 0xaf4   : > { %4706 = dma.done.wait (%p4620_p8), %s4101_s17, 8192  }
 0xaf5   : > { %4708 = vsyncadd (%p4620_p8), %s4101_s17, 4294959104  ;;  %s6766_s21 = sld [smem:[#allocation6_spill]]  ;;  %s6769_s18 = smov %s4715_s19 }
 0xaf6   : > { %s6767_s1 = sld [smem:[#allocation5_spill]] }
 0xaf7   : > { %s6768_s20 = sld [smem:[#allocation7_spill]] }
 0xafb   : > { %p25_p9 = scmp.ge.s32.totalorder %s6766_s21, 4  }
 0xafc   : > { %s6770_s19 = smov %s6767_s1 }
 0xafd   :  { %27 = sbr.rel (!%p25_p9) target bundleno = 7 (0x7), region = 131 }
 0xb02   :  { %4107 = vsyncpa [#allocation3], 1 }
 0xb03   :  { %4109 = vsyncpa [#allocation3 + $0x1], 1 }

</bundles_post_ra>
